<compile_context>
chip_gen: v5e
topology: v5e:2x2
jax: 0.10.0
libtpu: 0.0.40
codegen_flags: <defaults>
</compile_context>

<pallas_src>
import functools

import numpy as np

import jax
import jax.numpy as jnp
from jax.experimental import pallas as pl
from jax.experimental.pallas import tpu as pltpu

_EPS = 1e-5


# ----------------------------------------------------------------------------
# Fused Pallas kernel: conv1 -> conv2+pool -> conv3+pool -> flatten -> FC
# ----------------------------------------------------------------------------
def conv_stack_kernel(x_ref, w1_ref, b1_ref,
                      w2e_ref, w2o_ref, b2_ref,
                      w3e_ref, w3o_ref, b3_ref,
                      wfc_ref, bfc_ref, o_ref, *, bblk):
    """Fused ConvStack forward for one batch block (time-major rows).

    x_ref   : (T, bblk, F)      f32   mel, rows ordered (t, b)
    wN*_ref : (3, K, N)         bf16  banded conv weights (BN scale folded in)
    bN_ref  : (1, N)            f32   folded BN bias per output column
    wfc_ref : (K_fc, d_pad)     bf16  FC weight, pre-transposed + lane-padded
    bfc_ref : (1, d_pad)        f32
    o_ref   : (T-6, bblk, d_pad) f32
    """

    def tap_dots(h, w_ref):
        # h: (rows_in, K) bf16.  One MXU dot per kh tap; the kh shift is a
        # slice at offset kh*bblk -- sublane-aligned since bblk % 16 == 0.
        rows_out = h.shape[0] - 2 * bblk
        acc = jnp.dot(h[0:rows_out, :], w_ref[0],
                      preferred_element_type=jnp.float32)
        acc = acc + jnp.dot(h[bblk:bblk + rows_out, :], w_ref[1],
                            preferred_element_type=jnp.float32)
        acc = acc + jnp.dot(h[2 * bblk:2 * bblk + rows_out, :], w_ref[2],
                            preferred_element_type=jnp.float32)
        return acc

    def conv_bn_relu(h, w_ref, b_ref):
        return jnp.maximum(tap_dots(h, w_ref) + b_ref[...], 0.0)

    def conv_bn_relu_pool(h, we_ref, wo_ref, b_ref):
        # MaxPool2d((1,2)) folded into the column split: even / odd output-width
        # columns come from two separate weight matrices -> the pool is a plain
        # VPU max of two matmul results (no cross-lane gather).  Bias is per
        # channel (same for both halves), so relu(max(a,b)+bias) == pooled relu.
        acc = jnp.maximum(tap_dots(h, we_ref), tap_dots(h, wo_ref))
        return jnp.maximum(acc + b_ref[...], 0.0)

    t_in, _, feat = x_ref.shape
    x = x_ref[...].reshape(t_in * bblk, feat).astype(jnp.bfloat16)
    y1 = conv_bn_relu(x, w1_ref, b1_ref).astype(jnp.bfloat16)          # (.., c1*F)
    y2 = conv_bn_relu_pool(y1, w2e_ref, w2o_ref, b2_ref).astype(jnp.bfloat16)
    y3 = conv_bn_relu_pool(y2, w3e_ref, w3o_ref, b3_ref).astype(jnp.bfloat16)
    # Pooled (channel, width) column order == PyTorch transpose(1,2).flatten(-2),
    # so the FC applies directly; output padded to 128 lanes -> lane-dense store.
    out = jnp.dot(y3, wfc_ref[...], preferred_element_type=jnp.float32) + bfc_ref[...]
    h_out = o_ref.shape[0]
    o_ref[...] = out.reshape(h_out, bblk, out.shape[-1])


# ----------------------------------------------------------------------------
# Single pallas_call wrapper
# ----------------------------------------------------------------------------
def conv_stack_forward(mel, prepared, output_features):
    w1, b1, w2e, w2o, b2, w3e, w3o, b3, wfc, bfc = prepared
    B, T, F = mel.shape
    assert T > 6, "need at least 7 time steps (three un-padded 3x3 convs)"
    h_out = T - 6
    d_pad = wfc.shape[1]

    # Batch blocking: bblk elements per grid step -> M = bblk*(T_out) rows per
    # MXU dot.  bblk multiple of 16 keeps kh-tap offsets bf16-sublane aligned
    # and the (T, bblk, F) -> (T*bblk, F) reshape layout-free.
    if B % 16 == 0:
        bblk = 16
    elif B % 8 == 0:
        bblk = 8
    else:
        bblk = B
    grid = (B // bblk,)

    # Time-major rows (t, b): tiny layout plumbing done once outside the kernel.
    mel_t = jnp.transpose(mel, (1, 0, 2))                 # (T, B, F)

    weights = (w1, b1, w2e, w2o, b2, w3e, w3o, b3, wfc, bfc)

    # Advisory cost hint for XLA's scheduler around the custom call.
    t1, t2, t3 = T - 2, T - 4, T - 6
    flops = 2 * B * (3 * t1 * w1.shape[1] * w1.shape[2]
                     + 6 * t2 * w2e.shape[1] * w2e.shape[2]
                     + 6 * t3 * w3e.shape[1] * w3e.shape[2]
                     + t3 * wfc.shape[0] * wfc.shape[1])
    weight_bytes = sum(int(a.size) * a.dtype.itemsize for a in weights)
    bytes_accessed = (int(mel.size) * mel.dtype.itemsize
                      + weight_bytes + h_out * B * d_pad * 4)

    # Explicit VMEM budget: double-buffered input/output blocks + single-buffered
    # weights + generous headroom for the (tiny) in-kernel activations.
    block_bytes = T * bblk * F * 4 + h_out * bblk * d_pad * 4
    vmem_bytes = int(2 * block_bytes + 2 * weight_bytes + (8 << 20))

    def build(single_buffer_weights):
        def weight_spec(a):
            nd = a.ndim
            kwargs = {}
            if single_buffer_weights:
                # Invariant across the grid -> no benefit from double buffering.
                kwargs["pipeline_mode"] = pl.Buffered(1)
            return pl.BlockSpec(a.shape, lambda i, _nd=nd: (0,) * _nd, **kwargs)

        in_specs = [pl.BlockSpec((T, bblk, F), lambda i: (0, i, 0))]
        in_specs += [weight_spec(a) for a in weights]
        return pl.pallas_call(
            functools.partial(conv_stack_kernel, bblk=bblk),
            out_shape=jax.ShapeDtypeStruct((h_out, B, d_pad), jnp.float32),
            grid=grid,
            in_specs=in_specs,
            out_specs=pl.BlockSpec((h_out, bblk, d_pad), lambda i: (0, i, 0)),
            compiler_params=pltpu.CompilerParams(
                dimension_semantics=("parallel",),
                vmem_limit_bytes=vmem_bytes),
            cost_estimate=pl.CostEstimate(flops=int(flops), transcendentals=0,
                                          bytes_accessed=int(bytes_accessed)),
        )

    try:
        out = build(single_buffer_weights=True)(mel_t, *weights)
    except Exception:
        # Fallback for JAX builds that reject single-buffered (pl.Buffered(1))
        # specs; identical semantics with default double-buffered weights.
        out = build(single_buffer_weights=False)(mel_t, *weights)

    # (h_out, B, d_pad) -> (B, h_out, d_out): layout plumbing + drop lane padding.
    return jnp.transpose(out, (1, 0, 2))[..., :output_features]


# ----------------------------------------------------------------------------
# One-time host-side parameter preparation (BN fold + banded bf16 conv matrices)
# ----------------------------------------------------------------------------
def make_conv_bn_params(key, cout, cin):
    kw, kb, kg, kbeta, km, kv = jax.random.split(key, 6)
    w = jax.random.normal(kw, (cout, cin, 3, 3), jnp.float32) * 0.2
    b = jax.random.normal(kb, (cout,), jnp.float32) * 0.1
    gamma = 1.0 + 0.1 * jax.random.normal(kg, (cout,), jnp.float32)
    beta = 0.1 * jax.random.normal(kbeta, (cout,), jnp.float32)
    rmean = 0.1 * jax.random.normal(km, (cout,), jnp.float32)
    rvar = jax.random.uniform(kv, (cout,), jnp.float32, minval=0.5, maxval=1.5)
    return w, b, gamma, beta, rmean, rvar


def _fold_bn(params):
    w, b, gamma, beta, rmean, rvar = params
    scale = gamma / jnp.sqrt(rvar + _EPS)
    bias = (b - rmean) * scale + beta
    return (np.asarray(w, np.float32), np.asarray(scale, np.float32),
            np.asarray(bias, np.float32))


def _build_layer_matrices(params, width, pool):
    """Banded conv-as-matmul weights for Conv2d(3x3, pad=(0,1)) + BatchNorm(eval).

    Input-row index : ci * width + wi                     (channel, width) lanes
    Output column   : no pool : co * width + wo
                      pool    : co * (width//2) + wo//2, split into an even-wo
                                matrix and an odd-wo matrix so MaxPool2d((1,2))
                                == jnp.maximum of the two matmul results and the
                                pooled columns stay in (channel, width) order.
    Width padding of 1 is implicit (out-of-range taps omitted).  Weights are
    returned in bf16 (MXU-native); the folded bias stays f32.
    """
    w, scale, bias = _fold_bn(params)
    w = w * scale[:, None, None, None]
    cout, cin, kh_sz, kw_sz = w.shape
    assert (kh_sz, kw_sz) == (3, 3)
    if pool:
        assert width % 2 == 0, "pooled layer requires an even width"
        half = width // 2
        ncol = cout * half
        mats = [np.zeros((3, cin * width, ncol), np.float32) for _ in range(2)]
    else:
        ncol = cout * width
        mats = [np.zeros((3, cin * width, ncol), np.float32)]
    brow = np.zeros((1, ncol), np.float32)

    for co in range(cout):
        for wo in range(width):
            if pool:
                mat = mats[wo % 2]
                col = co * (width // 2) + wo // 2
            else:
                mat = mats[0]
                col = co * width + wo
            brow[0, col] = bias[co]
            for ci in range(cin):
                for kh in range(3):
                    for kw in range(3):
                        wi = wo + kw - 1              # padding (0,1) on width
                        if 0 <= wi < width:
                            mat[kh, ci * width + wi, col] = w[co, ci, kh, kw]
    mats = tuple(jnp.asarray(m, dtype=jnp.bfloat16) for m in mats)
    return mats, jnp.asarray(brow)


def prepare_params(p1, p2, p3, w_fc, b_fc, input_features, output_features):
    """Fold BN, build banded bf16 conv matrices, lane-pad + transpose FC weight."""
    F = input_features
    assert F % 4 == 0, "input_features must be divisible by 4 (two (1,2) pools)"
    assert output_features % 16 == 0, "output_features must be divisible by 16"
    (w1,), b1 = _build_layer_matrices(p1, F, pool=False)
    (w2e, w2o), b2 = _build_layer_matrices(p2, F, pool=True)
    (w3e, w3o), b3 = _build_layer_matrices(p3, F // 2, pool=True)

    d_in = w_fc.shape[1]
    d_out = output_features
    d_pad = -(-d_out // 128) * 128            # lane-dense FC output / store
    wfc = np.zeros((d_in, d_pad), np.float32)
    wfc[:, :d_out] = np.asarray(w_fc, np.float32).T
    bfc = np.zeros((1, d_pad), np.float32)
    bfc[0, :d_out] = np.asarray(b_fc, np.float32)
    return (w1, b1, w2e, w2o, b2, w3e, w3o, b3,
            jnp.asarray(wfc, dtype=jnp.bfloat16), jnp.asarray(bfc))


# ----------------------------------------------------------------------------
# Pure-JAX reference for verification (full f32 precision)
# ----------------------------------------------------------------------------
def reference_forward(mel, p1, p2, p3, w_fc, b_fc):
    def block(x, params):
        w, b, gamma, beta, rmean, rvar = params
        y = jax.lax.conv_general_dilated(
            x, w, (1, 1), ((0, 0), (1, 1)),
            dimension_numbers=("NCHW", "OIHW", "NCHW"),
            precision=jax.lax.Precision.HIGHEST)
        y = y + b[None, :, None, None]
        y = (y - rmean[None, :, None, None]) / jnp.sqrt(rvar[None, :, None, None] + _EPS)
        y = y * gamma[None, :, None, None] + beta[None, :, None, None]
        return jnp.maximum(y, 0.0)

    def pool(x):
        return jax.lax.reduce_window(
            x, -jnp.inf, jax.lax.max, (1, 1, 1, 2), (1, 1, 1, 2), "VALID")

    x = mel[:, None, :, :]
    x = block(x, p1)
    x = block(x, p2)
    x = pool(x)
    x = block(x, p3)
    x = pool(x)
    B, C, H, W = x.shape
    x = jnp.transpose(x, (0, 2, 1, 3)).reshape(B, H, C * W)
    return jnp.dot(x, w_fc.T, precision=jax.lax.Precision.HIGHEST) + b_fc


# ----------------------------------------------------------------------------
if __name__ == "__main__":
    B, T = 32, 16               # 16 batch elems per grid step -> grid=(2,), parallel
    input_features = 16         # mel bins (divisible by 4)
    output_features = 32        # divisible by 16
    c1 = output_features // 16  # 2
    c2 = output_features // 8   # 4

    key = jax.random.PRNGKey(0)
    k_mel, k1, k2, k3, kfc = jax.random.split(key, 5)
    mel = jax.random.normal(k_mel, (B, T, input_features), jnp.float32)

    p1 = make_conv_bn_params(k1, c1, 1)
    p2 = make_conv_bn_params(k2, c1, c1)
    p3 = make_conv_bn_params(k3, c2, c1)

    in_fc = c2 * (input_features // 4)       # 16
    kw_, kb_ = jax.random.split(kfc)
    w_fc = jax.random.normal(kw_, (output_features, in_fc), jnp.float32) * 0.1
    b_fc = jax.random.normal(kb_, (output_features,), jnp.float32) * 0.1

    prepared = prepare_params(p1, p2, p3, w_fc, b_fc, input_features, output_features)
    out = conv_stack_forward(mel, prepared, output_features)
    out = jax.block_until_ready(out)

    ref = reference_forward(mel, p1, p2, p3, w_fc, b_fc)
    assert out.shape == (B, T - 6, output_features), out.shape
    assert bool(jnp.all(jnp.isfinite(out)))
    max_err = float(jnp.max(jnp.abs(out - ref)))
    # Kernel feeds the MXU bf16 operands (f32 accumulate); compare against the
    # f32 HIGHEST-precision reference with a matching tolerance.
    assert jnp.allclose(out, ref, atol=7.5e-2, rtol=5e-2), f"max abs err {max_err}"

    print("KERNEL_OK")
</pallas_src>

<mosaic_0001>
module attributes {stable_mosaic.version = 11 : i64} {
  func.func @conv_stack_kernel(%arg0: i32, %arg1: memref<16x16x16xf32, #tpu.memory_space<vmem>>, %arg2: memref<3x16x32xbf16, #tpu.memory_space<vmem>>, %arg3: memref<1x32xf32, #tpu.memory_space<vmem>>, %arg4: memref<3x32x16xbf16, #tpu.memory_space<vmem>>, %arg5: memref<3x32x16xbf16, #tpu.memory_space<vmem>>, %arg6: memref<1x16xf32, #tpu.memory_space<vmem>>, %arg7: memref<3x16x16xbf16, #tpu.memory_space<vmem>>, %arg8: memref<3x16x16xbf16, #tpu.memory_space<vmem>>, %arg9: memref<1x16xf32, #tpu.memory_space<vmem>>, %arg10: memref<16x128xbf16, #tpu.memory_space<vmem>>, %arg11: memref<1x128xf32, #tpu.memory_space<vmem>>, %arg12: memref<10x16x128xf32, #tpu.memory_space<vmem>>) attributes {dimension_semantics = [#tpu.dimension_semantics<parallel>], iteration_bounds = array<i64: 2>, scalar_prefetch = 0 : i64, scratch_operands = 0 : i64, tpu.core_type = #tpu.core_type<tc>, window_params = [{transform_indices = @transform_0, window_bounds = array<i64: 16, 16, 16>}, {pipeline_mode = #tpu.pipeline_mode<synchronous>, transform_indices = @transform_1, window_bounds = array<i64: 3, 16, 32>}, {pipeline_mode = #tpu.pipeline_mode<synchronous>, transform_indices = @transform_2, window_bounds = array<i64: 1, 32>}, {pipeline_mode = #tpu.pipeline_mode<synchronous>, transform_indices = @transform_3, window_bounds = array<i64: 3, 32, 16>}, {pipeline_mode = #tpu.pipeline_mode<synchronous>, transform_indices = @transform_4, window_bounds = array<i64: 3, 32, 16>}, {pipeline_mode = #tpu.pipeline_mode<synchronous>, transform_indices = @transform_5, window_bounds = array<i64: 1, 16>}, {pipeline_mode = #tpu.pipeline_mode<synchronous>, transform_indices = @transform_6, window_bounds = array<i64: 3, 16, 16>}, {pipeline_mode = #tpu.pipeline_mode<synchronous>, transform_indices = @transform_7, window_bounds = array<i64: 3, 16, 16>}, {pipeline_mode = #tpu.pipeline_mode<synchronous>, transform_indices = @transform_8, window_bounds = array<i64: 1, 16>}, {pipeline_mode = #tpu.pipeline_mode<synchronous>, transform_indices = @transform_9, window_bounds = array<i64: 16, 128>}, {pipeline_mode = #tpu.pipeline_mode<synchronous>, transform_indices = @transform_10, window_bounds = array<i64: 1, 128>}, {transform_indices = @transform_11, window_bounds = array<i64: 10, 16, 128>}]} {
    %c0 = arith.constant 0 : index
    %c0_0 = arith.constant 0 : index
    %c0_1 = arith.constant 0 : index
    %0 = vector.load %arg1[%c0, %c0_0, %c0_1] : memref<16x16x16xf32, #tpu.memory_space<vmem>>, vector<16x16x16xf32>
    %1 = vector.shape_cast %0 : vector<16x16x16xf32> to vector<256x16xf32>
    %2 = arith.truncf %1 : vector<256x16xf32> to vector<256x16xbf16>
    %3 = vector.extract_strided_slice %2 {offsets = [0, 0], sizes = [224, 16], strides = [1, 1]} : vector<256x16xbf16> to vector<224x16xbf16>
    %c0_2 = arith.constant 0 : index
    %c0_3 = arith.constant 0 : index
    %c0_4 = arith.constant 0 : index
    %4 = vector.load %arg2[%c0_2, %c0_3, %c0_4] : memref<3x16x32xbf16, #tpu.memory_space<vmem>>, vector<1x16x32xbf16>
    %5 = vector.shape_cast %4 : vector<1x16x32xbf16> to vector<16x32xbf16>
    %cst = arith.constant dense<0.000000e+00> : vector<224x32xf32>
    %6 = tpu.matmul %3, %5, %cst {dimension_numbers = #tpu.dot_dimension_numbers<[1], [0], [0], [1], [0, 0, 1, 1], [], []>} : vector<224x16xbf16>, vector<16x32xbf16>, vector<224x32xf32> -> vector<224x32xf32>
    %7 = vector.extract_strided_slice %2 {offsets = [16, 0], sizes = [224, 16], strides = [1, 1]} : vector<256x16xbf16> to vector<224x16xbf16>
    %c1 = arith.constant 1 : index
    %c0_5 = arith.constant 0 : index
    %c0_6 = arith.constant 0 : index
    %8 = vector.load %arg2[%c1, %c0_5, %c0_6] : memref<3x16x32xbf16, #tpu.memory_space<vmem>>, vector<1x16x32xbf16>
    %9 = vector.shape_cast %8 : vector<1x16x32xbf16> to vector<16x32xbf16>
    %cst_7 = arith.constant dense<0.000000e+00> : vector<224x32xf32>
    %10 = tpu.matmul %7, %9, %cst_7 {dimension_numbers = #tpu.dot_dimension_numbers<[1], [0], [0], [1], [0, 0, 1, 1], [], []>} : vector<224x16xbf16>, vector<16x32xbf16>, vector<224x32xf32> -> vector<224x32xf32>
    %11 = arith.addf %6, %10 : vector<224x32xf32>
    %12 = vector.extract_strided_slice %2 {offsets = [32, 0], sizes = [224, 16], strides = [1, 1]} : vector<256x16xbf16> to vector<224x16xbf16>
    %c2 = arith.constant 2 : index
    %c0_8 = arith.constant 0 : index
    %c0_9 = arith.constant 0 : index
    %13 = vector.load %arg2[%c2, %c0_8, %c0_9] : memref<3x16x32xbf16, #tpu.memory_space<vmem>>, vector<1x16x32xbf16>
    %14 = vector.shape_cast %13 : vector<1x16x32xbf16> to vector<16x32xbf16>
    %cst_10 = arith.constant dense<0.000000e+00> : vector<224x32xf32>
    %15 = tpu.matmul %12, %14, %cst_10 {dimension_numbers = #tpu.dot_dimension_numbers<[1], [0], [0], [1], [0, 0, 1, 1], [], []>} : vector<224x16xbf16>, vector<16x32xbf16>, vector<224x32xf32> -> vector<224x32xf32>
    %16 = arith.addf %11, %15 : vector<224x32xf32>
    %c0_11 = arith.constant 0 : index
    %c0_12 = arith.constant 0 : index
    %17 = vector.load %arg3[%c0_11, %c0_12] : memref<1x32xf32, #tpu.memory_space<vmem>>, vector<1x32xf32>
    %18 = vector.broadcast %17 : vector<1x32xf32> to vector<224x32xf32>
    %19 = arith.addf %16, %18 : vector<224x32xf32>
    %cst_13 = arith.constant 0.000000e+00 : f32
    %20 = vector.broadcast %cst_13 : f32 to vector<224x32xf32>
    %21 = arith.maximumf %19, %20 : vector<224x32xf32>
    %22 = arith.truncf %21 : vector<224x32xf32> to vector<224x32xbf16>
    %23 = vector.extract_strided_slice %22 {offsets = [0, 0], sizes = [192, 32], strides = [1, 1]} : vector<224x32xbf16> to vector<192x32xbf16>
    %c0_14 = arith.constant 0 : index
    %c0_15 = arith.constant 0 : index
    %c0_16 = arith.constant 0 : index
    %24 = vector.load %arg4[%c0_14, %c0_15, %c0_16] : memref<3x32x16xbf16, #tpu.memory_space<vmem>>, vector<1x32x16xbf16>
    %25 = vector.shape_cast %24 : vector<1x32x16xbf16> to vector<32x16xbf16>
    %cst_17 = arith.constant dense<0.000000e+00> : vector<192x16xf32>
    %26 = tpu.matmul %23, %25, %cst_17 {dimension_numbers = #tpu.dot_dimension_numbers<[1], [0], [0], [1], [0, 0, 1, 1], [], []>} : vector<192x32xbf16>, vector<32x16xbf16>, vector<192x16xf32> -> vector<192x16xf32>
    %27 = vector.extract_strided_slice %22 {offsets = [16, 0], sizes = [192, 32], strides = [1, 1]} : vector<224x32xbf16> to vector<192x32xbf16>
    %c1_18 = arith.constant 1 : index
    %c0_19 = arith.constant 0 : index
    %c0_20 = arith.constant 0 : index
    %28 = vector.load %arg4[%c1_18, %c0_19, %c0_20] : memref<3x32x16xbf16, #tpu.memory_space<vmem>>, vector<1x32x16xbf16>
    %29 = vector.shape_cast %28 : vector<1x32x16xbf16> to vector<32x16xbf16>
    %cst_21 = arith.constant dense<0.000000e+00> : vector<192x16xf32>
    %30 = tpu.matmul %27, %29, %cst_21 {dimension_numbers = #tpu.dot_dimension_numbers<[1], [0], [0], [1], [0, 0, 1, 1], [], []>} : vector<192x32xbf16>, vector<32x16xbf16>, vector<192x16xf32> -> vector<192x16xf32>
    %31 = arith.addf %26, %30 : vector<192x16xf32>
    %32 = vector.extract_strided_slice %22 {offsets = [32, 0], sizes = [192, 32], strides = [1, 1]} : vector<224x32xbf16> to vector<192x32xbf16>
    %c2_22 = arith.constant 2 : index
    %c0_23 = arith.constant 0 : index
    %c0_24 = arith.constant 0 : index
    %33 = vector.load %arg4[%c2_22, %c0_23, %c0_24] : memref<3x32x16xbf16, #tpu.memory_space<vmem>>, vector<1x32x16xbf16>
    %34 = vector.shape_cast %33 : vector<1x32x16xbf16> to vector<32x16xbf16>
    %cst_25 = arith.constant dense<0.000000e+00> : vector<192x16xf32>
    %35 = tpu.matmul %32, %34, %cst_25 {dimension_numbers = #tpu.dot_dimension_numbers<[1], [0], [0], [1], [0, 0, 1, 1], [], []>} : vector<192x32xbf16>, vector<32x16xbf16>, vector<192x16xf32> -> vector<192x16xf32>
    %36 = arith.addf %31, %35 : vector<192x16xf32>
    %37 = vector.extract_strided_slice %22 {offsets = [0, 0], sizes = [192, 32], strides = [1, 1]} : vector<224x32xbf16> to vector<192x32xbf16>
    %c0_26 = arith.constant 0 : index
    %c0_27 = arith.constant 0 : index
    %c0_28 = arith.constant 0 : index
    %38 = vector.load %arg5[%c0_26, %c0_27, %c0_28] : memref<3x32x16xbf16, #tpu.memory_space<vmem>>, vector<1x32x16xbf16>
    %39 = vector.shape_cast %38 : vector<1x32x16xbf16> to vector<32x16xbf16>
    %cst_29 = arith.constant dense<0.000000e+00> : vector<192x16xf32>
    %40 = tpu.matmul %37, %39, %cst_29 {dimension_numbers = #tpu.dot_dimension_numbers<[1], [0], [0], [1], [0, 0, 1, 1], [], []>} : vector<192x32xbf16>, vector<32x16xbf16>, vector<192x16xf32> -> vector<192x16xf32>
    %41 = vector.extract_strided_slice %22 {offsets = [16, 0], sizes = [192, 32], strides = [1, 1]} : vector<224x32xbf16> to vector<192x32xbf16>
    %c1_30 = arith.constant 1 : index
    %c0_31 = arith.constant 0 : index
    %c0_32 = arith.constant 0 : index
    %42 = vector.load %arg5[%c1_30, %c0_31, %c0_32] : memref<3x32x16xbf16, #tpu.memory_space<vmem>>, vector<1x32x16xbf16>
    %43 = vector.shape_cast %42 : vector<1x32x16xbf16> to vector<32x16xbf16>
    %cst_33 = arith.constant dense<0.000000e+00> : vector<192x16xf32>
    %44 = tpu.matmul %41, %43, %cst_33 {dimension_numbers = #tpu.dot_dimension_numbers<[1], [0], [0], [1], [0, 0, 1, 1], [], []>} : vector<192x32xbf16>, vector<32x16xbf16>, vector<192x16xf32> -> vector<192x16xf32>
    %45 = arith.addf %40, %44 : vector<192x16xf32>
    %46 = vector.extract_strided_slice %22 {offsets = [32, 0], sizes = [192, 32], strides = [1, 1]} : vector<224x32xbf16> to vector<192x32xbf16>
    %c2_34 = arith.constant 2 : index
    %c0_35 = arith.constant 0 : index
    %c0_36 = arith.constant 0 : index
    %47 = vector.load %arg5[%c2_34, %c0_35, %c0_36] : memref<3x32x16xbf16, #tpu.memory_space<vmem>>, vector<1x32x16xbf16>
    %48 = vector.shape_cast %47 : vector<1x32x16xbf16> to vector<32x16xbf16>
    %cst_37 = arith.constant dense<0.000000e+00> : vector<192x16xf32>
    %49 = tpu.matmul %46, %48, %cst_37 {dimension_numbers = #tpu.dot_dimension_numbers<[1], [0], [0], [1], [0, 0, 1, 1], [], []>} : vector<192x32xbf16>, vector<32x16xbf16>, vector<192x16xf32> -> vector<192x16xf32>
    %50 = arith.addf %45, %49 : vector<192x16xf32>
    %51 = arith.maximumf %36, %50 : vector<192x16xf32>
    %c0_38 = arith.constant 0 : index
    %c0_39 = arith.constant 0 : index
    %52 = vector.load %arg6[%c0_38, %c0_39] : memref<1x16xf32, #tpu.memory_space<vmem>>, vector<1x16xf32>
    %53 = vector.broadcast %52 : vector<1x16xf32> to vector<192x16xf32>
    %54 = arith.addf %51, %53 : vector<192x16xf32>
    %cst_40 = arith.constant 0.000000e+00 : f32
    %55 = vector.broadcast %cst_40 : f32 to vector<192x16xf32>
    %56 = arith.maximumf %54, %55 : vector<192x16xf32>
    %57 = arith.truncf %56 : vector<192x16xf32> to vector<192x16xbf16>
    %58 = vector.extract_strided_slice %57 {offsets = [0, 0], sizes = [160, 16], strides = [1, 1]} : vector<192x16xbf16> to vector<160x16xbf16>
    %c0_41 = arith.constant 0 : index
    %c0_42 = arith.constant 0 : index
    %c0_43 = arith.constant 0 : index
    %59 = vector.load %arg7[%c0_41, %c0_42, %c0_43] : memref<3x16x16xbf16, #tpu.memory_space<vmem>>, vector<1x16x16xbf16>
    %60 = vector.shape_cast %59 : vector<1x16x16xbf16> to vector<16x16xbf16>
    %cst_44 = arith.constant dense<0.000000e+00> : vector<160x16xf32>
    %61 = tpu.matmul %58, %60, %cst_44 {dimension_numbers = #tpu.dot_dimension_numbers<[1], [0], [0], [1], [0, 0, 1, 1], [], []>} : vector<160x16xbf16>, vector<16x16xbf16>, vector<160x16xf32> -> vector<160x16xf32>
    %62 = vector.extract_strided_slice %57 {offsets = [16, 0], sizes = [160, 16], strides = [1, 1]} : vector<192x16xbf16> to vector<160x16xbf16>
    %c1_45 = arith.constant 1 : index
    %c0_46 = arith.constant 0 : index
    %c0_47 = arith.constant 0 : index
    %63 = vector.load %arg7[%c1_45, %c0_46, %c0_47] : memref<3x16x16xbf16, #tpu.memory_space<vmem>>, vector<1x16x16xbf16>
    %64 = vector.shape_cast %63 : vector<1x16x16xbf16> to vector<16x16xbf16>
    %cst_48 = arith.constant dense<0.000000e+00> : vector<160x16xf32>
    %65 = tpu.matmul %62, %64, %cst_48 {dimension_numbers = #tpu.dot_dimension_numbers<[1], [0], [0], [1], [0, 0, 1, 1], [], []>} : vector<160x16xbf16>, vector<16x16xbf16>, vector<160x16xf32> -> vector<160x16xf32>
    %66 = arith.addf %61, %65 : vector<160x16xf32>
    %67 = vector.extract_strided_slice %57 {offsets = [32, 0], sizes = [160, 16], strides = [1, 1]} : vector<192x16xbf16> to vector<160x16xbf16>
    %c2_49 = arith.constant 2 : index
    %c0_50 = arith.constant 0 : index
    %c0_51 = arith.constant 0 : index
    %68 = vector.load %arg7[%c2_49, %c0_50, %c0_51] : memref<3x16x16xbf16, #tpu.memory_space<vmem>>, vector<1x16x16xbf16>
    %69 = vector.shape_cast %68 : vector<1x16x16xbf16> to vector<16x16xbf16>
    %cst_52 = arith.constant dense<0.000000e+00> : vector<160x16xf32>
    %70 = tpu.matmul %67, %69, %cst_52 {dimension_numbers = #tpu.dot_dimension_numbers<[1], [0], [0], [1], [0, 0, 1, 1], [], []>} : vector<160x16xbf16>, vector<16x16xbf16>, vector<160x16xf32> -> vector<160x16xf32>
    %71 = arith.addf %66, %70 : vector<160x16xf32>
    %72 = vector.extract_strided_slice %57 {offsets = [0, 0], sizes = [160, 16], strides = [1, 1]} : vector<192x16xbf16> to vector<160x16xbf16>
    %c0_53 = arith.constant 0 : index
    %c0_54 = arith.constant 0 : index
    %c0_55 = arith.constant 0 : index
    %73 = vector.load %arg8[%c0_53, %c0_54, %c0_55] : memref<3x16x16xbf16, #tpu.memory_space<vmem>>, vector<1x16x16xbf16>
    %74 = vector.shape_cast %73 : vector<1x16x16xbf16> to vector<16x16xbf16>
    %cst_56 = arith.constant dense<0.000000e+00> : vector<160x16xf32>
    %75 = tpu.matmul %72, %74, %cst_56 {dimension_numbers = #tpu.dot_dimension_numbers<[1], [0], [0], [1], [0, 0, 1, 1], [], []>} : vector<160x16xbf16>, vector<16x16xbf16>, vector<160x16xf32> -> vector<160x16xf32>
    %76 = vector.extract_strided_slice %57 {offsets = [16, 0], sizes = [160, 16], strides = [1, 1]} : vector<192x16xbf16> to vector<160x16xbf16>
    %c1_57 = arith.constant 1 : index
    %c0_58 = arith.constant 0 : index
    %c0_59 = arith.constant 0 : index
    %77 = vector.load %arg8[%c1_57, %c0_58, %c0_59] : memref<3x16x16xbf16, #tpu.memory_space<vmem>>, vector<1x16x16xbf16>
    %78 = vector.shape_cast %77 : vector<1x16x16xbf16> to vector<16x16xbf16>
    %cst_60 = arith.constant dense<0.000000e+00> : vector<160x16xf32>
    %79 = tpu.matmul %76, %78, %cst_60 {dimension_numbers = #tpu.dot_dimension_numbers<[1], [0], [0], [1], [0, 0, 1, 1], [], []>} : vector<160x16xbf16>, vector<16x16xbf16>, vector<160x16xf32> -> vector<160x16xf32>
    %80 = arith.addf %75, %79 : vector<160x16xf32>
    %81 = vector.extract_strided_slice %57 {offsets = [32, 0], sizes = [160, 16], strides = [1, 1]} : vector<192x16xbf16> to vector<160x16xbf16>
    %c2_61 = arith.constant 2 : index
    %c0_62 = arith.constant 0 : index
    %c0_63 = arith.constant 0 : index
    %82 = vector.load %arg8[%c2_61, %c0_62, %c0_63] : memref<3x16x16xbf16, #tpu.memory_space<vmem>>, vector<1x16x16xbf16>
    %83 = vector.shape_cast %82 : vector<1x16x16xbf16> to vector<16x16xbf16>
    %cst_64 = arith.constant dense<0.000000e+00> : vector<160x16xf32>
    %84 = tpu.matmul %81, %83, %cst_64 {dimension_numbers = #tpu.dot_dimension_numbers<[1], [0], [0], [1], [0, 0, 1, 1], [], []>} : vector<160x16xbf16>, vector<16x16xbf16>, vector<160x16xf32> -> vector<160x16xf32>
    %85 = arith.addf %80, %84 : vector<160x16xf32>
    %86 = arith.maximumf %71, %85 : vector<160x16xf32>
    %c0_65 = arith.constant 0 : index
    %c0_66 = arith.constant 0 : index
    %87 = vector.load %arg9[%c0_65, %c0_66] : memref<1x16xf32, #tpu.memory_space<vmem>>, vector<1x16xf32>
    %88 = vector.broadcast %87 : vector<1x16xf32> to vector<160x16xf32>
    %89 = arith.addf %86, %88 : vector<160x16xf32>
    %cst_67 = arith.constant 0.000000e+00 : f32
    %90 = vector.broadcast %cst_67 : f32 to vector<160x16xf32>
    %91 = arith.maximumf %89, %90 : vector<160x16xf32>
    %92 = arith.truncf %91 : vector<160x16xf32> to vector<160x16xbf16>
    %c0_68 = arith.constant 0 : index
    %c0_69 = arith.constant 0 : index
    %93 = vector.load %arg10[%c0_68, %c0_69] : memref<16x128xbf16, #tpu.memory_space<vmem>>, vector<16x128xbf16>
    %cst_70 = arith.constant dense<0.000000e+00> : vector<160x128xf32>
    %94 = tpu.matmul %92, %93, %cst_70 {dimension_numbers = #tpu.dot_dimension_numbers<[1], [0], [0], [1], [0, 0, 1, 1], [], []>} : vector<160x16xbf16>, vector<16x128xbf16>, vector<160x128xf32> -> vector<160x128xf32>
    %c0_71 = arith.constant 0 : index
    %c0_72 = arith.constant 0 : index
    %95 = vector.load %arg11[%c0_71, %c0_72] : memref<1x128xf32, #tpu.memory_space<vmem>>, vector<1x128xf32>
    %96 = vector.broadcast %95 : vector<1x128xf32> to vector<160x128xf32>
    %97 = arith.addf %94, %96 : vector<160x128xf32>
    %98 = vector.shape_cast %97 : vector<160x128xf32> to vector<10x16x128xf32>
    %c0_73 = arith.constant 0 : index
    %c0_74 = arith.constant 0 : index
    %c0_75 = arith.constant 0 : index
    %99 = vector.load %arg12[%c0_73, %c0_74, %c0_75] : memref<10x16x128xf32, #tpu.memory_space<vmem>>, vector<10x16x128xf32>
    tpu.vector_store %arg12[%c0_73, %c0_74, %c0_75], %98 {strides = array<i32>} : memref<10x16x128xf32, #tpu.memory_space<vmem>>, vector<10x16x128xf32>,
    return
  }
  func.func @transform_0(%arg0: i32) -> (i32, i32, i32) {
    %c0_i32 = arith.constant 0 : i32
    %c0_i32_0 = arith.constant 0 : i32
    %c0_i32_1 = arith.constant 0 : i32
    return %c0_i32, %arg0, %c0_i32_0 : i32, i32, i32
  }
  func.func @transform_1(%arg0: i32) -> (i32, i32, i32) {
    %c0_i32 = arith.constant 0 : i32
    %c0_i32_0 = arith.constant 0 : i32
    %c0_i32_1 = arith.constant 0 : i32
    %c0_i32_2 = arith.constant 0 : i32
    return %c0_i32, %c0_i32_0, %c0_i32_1 : i32, i32, i32
  }
  func.func @transform_2(%arg0: i32) -> (i32, i32) {
    %c0_i32 = arith.constant 0 : i32
    %c0_i32_0 = arith.constant 0 : i32
    %c0_i32_1 = arith.constant 0 : i32
    return %c0_i32, %c0_i32_0 : i32, i32
  }
  func.func @transform_3(%arg0: i32) -> (i32, i32, i32) {
    %c0_i32 = arith.constant 0 : i32
    %c0_i32_0 = arith.constant 0 : i32
    %c0_i32_1 = arith.constant 0 : i32
    %c0_i32_2 = arith.constant 0 : i32
    return %c0_i32, %c0_i32_0, %c0_i32_1 : i32, i32, i32
  }
  func.func @transform_4(%arg0: i32) -> (i32, i32, i32) {
    %c0_i32 = arith.constant 0 : i32
    %c0_i32_0 = arith.constant 0 : i32
    %c0_i32_1 = arith.constant 0 : i32
    %c0_i32_2 = arith.constant 0 : i32
    return %c0_i32, %c0_i32_0, %c0_i32_1 : i32, i32, i32
  }
  func.func @transform_5(%arg0: i32) -> (i32, i32) {
    %c0_i32 = arith.constant 0 : i32
    %c0_i32_0 = arith.constant 0 : i32
    %c0_i32_1 = arith.constant 0 : i32
    return %c0_i32, %c0_i32_0 : i32, i32
  }
  func.func @transform_6(%arg0: i32) -> (i32, i32, i32) {
    %c0_i32 = arith.constant 0 : i32
    %c0_i32_0 = arith.constant 0 : i32
    %c0_i32_1 = arith.constant 0 : i32
    %c0_i32_2 = arith.constant 0 : i32
    return %c0_i32, %c0_i32_0, %c0_i32_1 : i32, i32, i32
  }
  func.func @transform_7(%arg0: i32) -> (i32, i32, i32) {
    %c0_i32 = arith.constant 0 : i32
    %c0_i32_0 = arith.constant 0 : i32
    %c0_i32_1 = arith.constant 0 : i32
    %c0_i32_2 = arith.constant 0 : i32
    return %c0_i32, %c0_i32_0, %c0_i32_1 : i32, i32, i32
  }
  func.func @transform_8(%arg0: i32) -> (i32, i32) {
    %c0_i32 = arith.constant 0 : i32
    %c0_i32_0 = arith.constant 0 : i32
    %c0_i32_1 = arith.constant 0 : i32
    return %c0_i32, %c0_i32_0 : i32, i32
  }
  func.func @transform_9(%arg0: i32) -> (i32, i32) {
    %c0_i32 = arith.constant 0 : i32
    %c0_i32_0 = arith.constant 0 : i32
    %c0_i32_1 = arith.constant 0 : i32
    return %c0_i32, %c0_i32_0 : i32, i32
  }
  func.func @transform_10(%arg0: i32) -> (i32, i32) {
    %c0_i32 = arith.constant 0 : i32
    %c0_i32_0 = arith.constant 0 : i32
    %c0_i32_1 = arith.constant 0 : i32
    return %c0_i32, %c0_i32_0 : i32, i32
  }
  func.func @transform_11(%arg0: i32) -> (i32, i32, i32) {
    %c0_i32 = arith.constant 0 : i32
    %c0_i32_0 = arith.constant 0 : i32
    %c0_i32_1 = arith.constant 0 : i32
    return %c0_i32, %arg0, %c0_i32_0 : i32, i32, i32
  }
}

module attributes {stable_mosaic.version = 11 : i64} {
  func.func @conv_stack_kernel(%arg0: i32, %arg1: memref<16x16x16xf32, #tpu.memory_space<vmem>>, %arg2: memref<3x16x32xbf16, #tpu.memory_space<vmem>>, %arg3: memref<1x32xf32, #tpu.memory_space<vmem>>, %arg4: memref<3x32x16xbf16, #tpu.memory_space<vmem>>, %arg5: memref<3x32x16xbf16, #tpu.memory_space<vmem>>, %arg6: memref<1x16xf32, #tpu.memory_space<vmem>>, %arg7: memref<3x16x16xbf16, #tpu.memory_space<vmem>>, %arg8: memref<3x16x16xbf16, #tpu.memory_space<vmem>>, %arg9: memref<1x16xf32, #tpu.memory_space<vmem>>, %arg10: memref<16x128xbf16, #tpu.memory_space<vmem>>, %arg11: memref<1x128xf32, #tpu.memory_space<vmem>>, %arg12: memref<10x16x128xf32, #tpu.memory_space<vmem>>) attributes {dimension_semantics = [#tpu.dimension_semantics<parallel>], iteration_bounds = array<i64: 2>, scalar_prefetch = 0 : i64, scratch_operands = 0 : i64, tpu.core_type = #tpu.core_type<tc>, window_params = [{transform_indices = @transform_0, window_bounds = array<i64: 16, 16, 16>}, {pipeline_mode = #tpu.pipeline_mode<synchronous>, transform_indices = @transform_1, window_bounds = array<i64: 3, 16, 32>}, {pipeline_mode = #tpu.pipeline_mode<synchronous>, transform_indices = @transform_2, window_bounds = array<i64: 1, 32>}, {pipeline_mode = #tpu.pipeline_mode<synchronous>, transform_indices = @transform_3, window_bounds = array<i64: 3, 32, 16>}, {pipeline_mode = #tpu.pipeline_mode<synchronous>, transform_indices = @transform_4, window_bounds = array<i64: 3, 32, 16>}, {pipeline_mode = #tpu.pipeline_mode<synchronous>, transform_indices = @transform_5, window_bounds = array<i64: 1, 16>}, {pipeline_mode = #tpu.pipeline_mode<synchronous>, transform_indices = @transform_6, window_bounds = array<i64: 3, 16, 16>}, {pipeline_mode = #tpu.pipeline_mode<synchronous>, transform_indices = @transform_7, window_bounds = array<i64: 3, 16, 16>}, {pipeline_mode = #tpu.pipeline_mode<synchronous>, transform_indices = @transform_8, window_bounds = array<i64: 1, 16>}, {pipeline_mode = #tpu.pipeline_mode<synchronous>, transform_indices = @transform_9, window_bounds = array<i64: 16, 128>}, {pipeline_mode = #tpu.pipeline_mode<synchronous>, transform_indices = @transform_10, window_bounds = array<i64: 1, 128>}, {transform_indices = @transform_11, window_bounds = array<i64: 10, 16, 128>}]} {
    %c0 = arith.constant 0 : index
    %c0_0 = arith.constant 0 : index
    %c0_1 = arith.constant 0 : index
    %0 = vector.load %arg1[%c0, %c0_0, %c0_1] : memref<16x16x16xf32, #tpu.memory_space<vmem>>, vector<16x16x16xf32>
    %1 = vector.shape_cast %0 : vector<16x16x16xf32> to vector<256x16xf32>
    %2 = arith.truncf %1 : vector<256x16xf32> to vector<256x16xbf16>
    %3 = vector.extract_strided_slice %2 {offsets = [0, 0], sizes = [224, 16], strides = [1, 1]} : vector<256x16xbf16> to vector<224x16xbf16>
    %c0_2 = arith.constant 0 : index
    %c0_3 = arith.constant 0 : index
    %c0_4 = arith.constant 0 : index
    %4 = vector.load %arg2[%c0_2, %c0_3, %c0_4] : memref<3x16x32xbf16, #tpu.memory_space<vmem>>, vector<1x16x32xbf16>
    %5 = vector.shape_cast %4 : vector<1x16x32xbf16> to vector<16x32xbf16>
    %cst = arith.constant dense<0.000000e+00> : vector<224x32xf32>
    %6 = tpu.matmul %3, %5, %cst {dimension_numbers = #tpu.dot_dimension_numbers<[1], [0], [0], [1], [0, 0, 1, 1], [], []>} : vector<224x16xbf16>, vector<16x32xbf16>, vector<224x32xf32> -> vector<224x32xf32>
    %7 = vector.extract_strided_slice %2 {offsets = [16, 0], sizes = [224, 16], strides = [1, 1]} : vector<256x16xbf16> to vector<224x16xbf16>
    %c1 = arith.constant 1 : index
    %c0_5 = arith.constant 0 : index
    %c0_6 = arith.constant 0 : index
    %8 = vector.load %arg2[%c1, %c0_5, %c0_6] : memref<3x16x32xbf16, #tpu.memory_space<vmem>>, vector<1x16x32xbf16>
    %9 = vector.shape_cast %8 : vector<1x16x32xbf16> to vector<16x32xbf16>
    %cst_7 = arith.constant dense<0.000000e+00> : vector<224x32xf32>
    %10 = tpu.matmul %7, %9, %cst_7 {dimension_numbers = #tpu.dot_dimension_numbers<[1], [0], [0], [1], [0, 0, 1, 1], [], []>} : vector<224x16xbf16>, vector<16x32xbf16>, vector<224x32xf32> -> vector<224x32xf32>
    %11 = arith.addf %6, %10 : vector<224x32xf32>
    %12 = vector.extract_strided_slice %2 {offsets = [32, 0], sizes = [224, 16], strides = [1, 1]} : vector<256x16xbf16> to vector<224x16xbf16>
    %c2 = arith.constant 2 : index
    %c0_8 = arith.constant 0 : index
    %c0_9 = arith.constant 0 : index
    %13 = vector.load %arg2[%c2, %c0_8, %c0_9] : memref<3x16x32xbf16, #tpu.memory_space<vmem>>, vector<1x16x32xbf16>
    %14 = vector.shape_cast %13 : vector<1x16x32xbf16> to vector<16x32xbf16>
    %cst_10 = arith.constant dense<0.000000e+00> : vector<224x32xf32>
    %15 = tpu.matmul %12, %14, %cst_10 {dimension_numbers = #tpu.dot_dimension_numbers<[1], [0], [0], [1], [0, 0, 1, 1], [], []>} : vector<224x16xbf16>, vector<16x32xbf16>, vector<224x32xf32> -> vector<224x32xf32>
    %16 = arith.addf %11, %15 : vector<224x32xf32>
    %c0_11 = arith.constant 0 : index
    %c0_12 = arith.constant 0 : index
    %17 = vector.load %arg3[%c0_11, %c0_12] : memref<1x32xf32, #tpu.memory_space<vmem>>, vector<1x32xf32>
    %18 = vector.broadcast %17 : vector<1x32xf32> to vector<224x32xf32>
    %19 = arith.addf %16, %18 : vector<224x32xf32>
    %cst_13 = arith.constant 0.000000e+00 : f32
    %20 = vector.broadcast %cst_13 : f32 to vector<224x32xf32>
    %21 = arith.maximumf %19, %20 : vector<224x32xf32>
    %22 = arith.truncf %21 : vector<224x32xf32> to vector<224x32xbf16>
    %23 = vector.extract_strided_slice %22 {offsets = [0, 0], sizes = [192, 32], strides = [1, 1]} : vector<224x32xbf16> to vector<192x32xbf16>
    %c0_14 = arith.constant 0 : index
    %c0_15 = arith.constant 0 : index
    %c0_16 = arith.constant 0 : index
    %24 = vector.load %arg4[%c0_14, %c0_15, %c0_16] : memref<3x32x16xbf16, #tpu.memory_space<vmem>>, vector<1x32x16xbf16>
    %25 = vector.shape_cast %24 : vector<1x32x16xbf16> to vector<32x16xbf16>
    %cst_17 = arith.constant dense<0.000000e+00> : vector<192x16xf32>
    %26 = tpu.matmul %23, %25, %cst_17 {dimension_numbers = #tpu.dot_dimension_numbers<[1], [0], [0], [1], [0, 0, 1, 1], [], []>} : vector<192x32xbf16>, vector<32x16xbf16>, vector<192x16xf32> -> vector<192x16xf32>
    %27 = vector.extract_strided_slice %22 {offsets = [16, 0], sizes = [192, 32], strides = [1, 1]} : vector<224x32xbf16> to vector<192x32xbf16>
    %c1_18 = arith.constant 1 : index
    %c0_19 = arith.constant 0 : index
    %c0_20 = arith.constant 0 : index
    %28 = vector.load %arg4[%c1_18, %c0_19, %c0_20] : memref<3x32x16xbf16, #tpu.memory_space<vmem>>, vector<1x32x16xbf16>
    %29 = vector.shape_cast %28 : vector<1x32x16xbf16> to vector<32x16xbf16>
    %cst_21 = arith.constant dense<0.000000e+00> : vector<192x16xf32>
    %30 = tpu.matmul %27, %29, %cst_21 {dimension_numbers = #tpu.dot_dimension_numbers<[1], [0], [0], [1], [0, 0, 1, 1], [], []>} : vector<192x32xbf16>, vector<32x16xbf16>, vector<192x16xf32> -> vector<192x16xf32>
    %31 = arith.addf %26, %30 : vector<192x16xf32>
    %32 = vector.extract_strided_slice %22 {offsets = [32, 0], sizes = [192, 32], strides = [1, 1]} : vector<224x32xbf16> to vector<192x32xbf16>
    %c2_22 = arith.constant 2 : index
    %c0_23 = arith.constant 0 : index
    %c0_24 = arith.constant 0 : index
    %33 = vector.load %arg4[%c2_22, %c0_23, %c0_24] : memref<3x32x16xbf16, #tpu.memory_space<vmem>>, vector<1x32x16xbf16>
    %34 = vector.shape_cast %33 : vector<1x32x16xbf16> to vector<32x16xbf16>
    %cst_25 = arith.constant dense<0.000000e+00> : vector<192x16xf32>
    %35 = tpu.matmul %32, %34, %cst_25 {dimension_numbers = #tpu.dot_dimension_numbers<[1], [0], [0], [1], [0, 0, 1, 1], [], []>} : vector<192x32xbf16>, vector<32x16xbf16>, vector<192x16xf32> -> vector<192x16xf32>
    %36 = arith.addf %31, %35 : vector<192x16xf32>
    %37 = vector.extract_strided_slice %22 {offsets = [0, 0], sizes = [192, 32], strides = [1, 1]} : vector<224x32xbf16> to vector<192x32xbf16>
    %c0_26 = arith.constant 0 : index
    %c0_27 = arith.constant 0 : index
    %c0_28 = arith.constant 0 : index
    %38 = vector.load %arg5[%c0_26, %c0_27, %c0_28] : memref<3x32x16xbf16, #tpu.memory_space<vmem>>, vector<1x32x16xbf16>
    %39 = vector.shape_cast %38 : vector<1x32x16xbf16> to vector<32x16xbf16>
    %cst_29 = arith.constant dense<0.000000e+00> : vector<192x16xf32>
    %40 = tpu.matmul %37, %39, %cst_29 {dimension_numbers = #tpu.dot_dimension_numbers<[1], [0], [0], [1], [0, 0, 1, 1], [], []>} : vector<192x32xbf16>, vector<32x16xbf16>, vector<192x16xf32> -> vector<192x16xf32>
    %41 = vector.extract_strided_slice %22 {offsets = [16, 0], sizes = [192, 32], strides = [1, 1]} : vector<224x32xbf16> to vector<192x32xbf16>
    %c1_30 = arith.constant 1 : index
    %c0_31 = arith.constant 0 : index
    %c0_32 = arith.constant 0 : index
    %42 = vector.load %arg5[%c1_30, %c0_31, %c0_32] : memref<3x32x16xbf16, #tpu.memory_space<vmem>>, vector<1x32x16xbf16>
    %43 = vector.shape_cast %42 : vector<1x32x16xbf16> to vector<32x16xbf16>
    %cst_33 = arith.constant dense<0.000000e+00> : vector<192x16xf32>
    %44 = tpu.matmul %41, %43, %cst_33 {dimension_numbers = #tpu.dot_dimension_numbers<[1], [0], [0], [1], [0, 0, 1, 1], [], []>} : vector<192x32xbf16>, vector<32x16xbf16>, vector<192x16xf32> -> vector<192x16xf32>
    %45 = arith.addf %40, %44 : vector<192x16xf32>
    %46 = vector.extract_strided_slice %22 {offsets = [32, 0], sizes = [192, 32], strides = [1, 1]} : vector<224x32xbf16> to vector<192x32xbf16>
    %c2_34 = arith.constant 2 : index
    %c0_35 = arith.constant 0 : index
    %c0_36 = arith.constant 0 : index
    %47 = vector.load %arg5[%c2_34, %c0_35, %c0_36] : memref<3x32x16xbf16, #tpu.memory_space<vmem>>, vector<1x32x16xbf16>
    %48 = vector.shape_cast %47 : vector<1x32x16xbf16> to vector<32x16xbf16>
    %cst_37 = arith.constant dense<0.000000e+00> : vector<192x16xf32>
    %49 = tpu.matmul %46, %48, %cst_37 {dimension_numbers = #tpu.dot_dimension_numbers<[1], [0], [0], [1], [0, 0, 1, 1], [], []>} : vector<192x32xbf16>, vector<32x16xbf16>, vector<192x16xf32> -> vector<192x16xf32>
    %50 = arith.addf %45, %49 : vector<192x16xf32>
    %51 = arith.maximumf %36, %50 : vector<192x16xf32>
    %c0_38 = arith.constant 0 : index
    %c0_39 = arith.constant 0 : index
    %52 = vector.load %arg6[%c0_38, %c0_39] : memref<1x16xf32, #tpu.memory_space<vmem>>, vector<1x16xf32>
    %53 = vector.broadcast %52 : vector<1x16xf32> to vector<192x16xf32>
    %54 = arith.addf %51, %53 : vector<192x16xf32>
    %cst_40 = arith.constant 0.000000e+00 : f32
    %55 = vector.broadcast %cst_40 : f32 to vector<192x16xf32>
    %56 = arith.maximumf %54, %55 : vector<192x16xf32>
    %57 = arith.truncf %56 : vector<192x16xf32> to vector<192x16xbf16>
    %58 = vector.extract_strided_slice %57 {offsets = [0, 0], sizes = [160, 16], strides = [1, 1]} : vector<192x16xbf16> to vector<160x16xbf16>
    %c0_41 = arith.constant 0 : index
    %c0_42 = arith.constant 0 : index
    %c0_43 = arith.constant 0 : index
    %59 = vector.load %arg7[%c0_41, %c0_42, %c0_43] : memref<3x16x16xbf16, #tpu.memory_space<vmem>>, vector<1x16x16xbf16>
    %60 = vector.shape_cast %59 : vector<1x16x16xbf16> to vector<16x16xbf16>
    %cst_44 = arith.constant dense<0.000000e+00> : vector<160x16xf32>
    %61 = tpu.matmul %58, %60, %cst_44 {dimension_numbers = #tpu.dot_dimension_numbers<[1], [0], [0], [1], [0, 0, 1, 1], [], []>} : vector<160x16xbf16>, vector<16x16xbf16>, vector<160x16xf32> -> vector<160x16xf32>
    %62 = vector.extract_strided_slice %57 {offsets = [16, 0], sizes = [160, 16], strides = [1, 1]} : vector<192x16xbf16> to vector<160x16xbf16>
    %c1_45 = arith.constant 1 : index
    %c0_46 = arith.constant 0 : index
    %c0_47 = arith.constant 0 : index
    %63 = vector.load %arg7[%c1_45, %c0_46, %c0_47] : memref<3x16x16xbf16, #tpu.memory_space<vmem>>, vector<1x16x16xbf16>
    %64 = vector.shape_cast %63 : vector<1x16x16xbf16> to vector<16x16xbf16>
    %cst_48 = arith.constant dense<0.000000e+00> : vector<160x16xf32>
    %65 = tpu.matmul %62, %64, %cst_48 {dimension_numbers = #tpu.dot_dimension_numbers<[1], [0], [0], [1], [0, 0, 1, 1], [], []>} : vector<160x16xbf16>, vector<16x16xbf16>, vector<160x16xf32> -> vector<160x16xf32>
    %66 = arith.addf %61, %65 : vector<160x16xf32>
    %67 = vector.extract_strided_slice %57 {offsets = [32, 0], sizes = [160, 16], strides = [1, 1]} : vector<192x16xbf16> to vector<160x16xbf16>
    %c2_49 = arith.constant 2 : index
    %c0_50 = arith.constant 0 : index
    %c0_51 = arith.constant 0 : index
    %68 = vector.load %arg7[%c2_49, %c0_50, %c0_51] : memref<3x16x16xbf16, #tpu.memory_space<vmem>>, vector<1x16x16xbf16>
    %69 = vector.shape_cast %68 : vector<1x16x16xbf16> to vector<16x16xbf16>
    %cst_52 = arith.constant dense<0.000000e+00> : vector<160x16xf32>
    %70 = tpu.matmul %67, %69, %cst_52 {dimension_numbers = #tpu.dot_dimension_numbers<[1], [0], [0], [1], [0, 0, 1, 1], [], []>} : vector<160x16xbf16>, vector<16x16xbf16>, vector<160x16xf32> -> vector<160x16xf32>
    %71 = arith.addf %66, %70 : vector<160x16xf32>
    %72 = vector.extract_strided_slice %57 {offsets = [0, 0], sizes = [160, 16], strides = [1, 1]} : vector<192x16xbf16> to vector<160x16xbf16>
    %c0_53 = arith.constant 0 : index
    %c0_54 = arith.constant 0 : index
    %c0_55 = arith.constant 0 : index
    %73 = vector.load %arg8[%c0_53, %c0_54, %c0_55] : memref<3x16x16xbf16, #tpu.memory_space<vmem>>, vector<1x16x16xbf16>
    %74 = vector.shape_cast %73 : vector<1x16x16xbf16> to vector<16x16xbf16>
    %cst_56 = arith.constant dense<0.000000e+00> : vector<160x16xf32>
    %75 = tpu.matmul %72, %74, %cst_56 {dimension_numbers = #tpu.dot_dimension_numbers<[1], [0], [0], [1], [0, 0, 1, 1], [], []>} : vector<160x16xbf16>, vector<16x16xbf16>, vector<160x16xf32> -> vector<160x16xf32>
    %76 = vector.extract_strided_slice %57 {offsets = [16, 0], sizes = [160, 16], strides = [1, 1]} : vector<192x16xbf16> to vector<160x16xbf16>
    %c1_57 = arith.constant 1 : index
    %c0_58 = arith.constant 0 : index
    %c0_59 = arith.constant 0 : index
    %77 = vector.load %arg8[%c1_57, %c0_58, %c0_59] : memref<3x16x16xbf16, #tpu.memory_space<vmem>>, vector<1x16x16xbf16>
    %78 = vector.shape_cast %77 : vector<1x16x16xbf16> to vector<16x16xbf16>
    %cst_60 = arith.constant dense<0.000000e+00> : vector<160x16xf32>
    %79 = tpu.matmul %76, %78, %cst_60 {dimension_numbers = #tpu.dot_dimension_numbers<[1], [0], [0], [1], [0, 0, 1, 1], [], []>} : vector<160x16xbf16>, vector<16x16xbf16>, vector<160x16xf32> -> vector<160x16xf32>
    %80 = arith.addf %75, %79 : vector<160x16xf32>
    %81 = vector.extract_strided_slice %57 {offsets = [32, 0], sizes = [160, 16], strides = [1, 1]} : vector<192x16xbf16> to vector<160x16xbf16>
    %c2_61 = arith.constant 2 : index
    %c0_62 = arith.constant 0 : index
    %c0_63 = arith.constant 0 : index
    %82 = vector.load %arg8[%c2_61, %c0_62, %c0_63] : memref<3x16x16xbf16, #tpu.memory_space<vmem>>, vector<1x16x16xbf16>
    %83 = vector.shape_cast %82 : vector<1x16x16xbf16> to vector<16x16xbf16>
    %cst_64 = arith.constant dense<0.000000e+00> : vector<160x16xf32>
    %84 = tpu.matmul %81, %83, %cst_64 {dimension_numbers = #tpu.dot_dimension_numbers<[1], [0], [0], [1], [0, 0, 1, 1], [], []>} : vector<160x16xbf16>, vector<16x16xbf16>, vector<160x16xf32> -> vector<160x16xf32>
    %85 = arith.addf %80, %84 : vector<160x16xf32>
    %86 = arith.maximumf %71, %85 : vector<160x16xf32>
    %c0_65 = arith.constant 0 : index
    %c0_66 = arith.constant 0 : index
    %87 = vector.load %arg9[%c0_65, %c0_66] : memref<1x16xf32, #tpu.memory_space<vmem>>, vector<1x16xf32>
    %88 = vector.broadcast %87 : vector<1x16xf32> to vector<160x16xf32>
    %89 = arith.addf %86, %88 : vector<160x16xf32>
    %cst_67 = arith.constant 0.000000e+00 : f32
    %90 = vector.broadcast %cst_67 : f32 to vector<160x16xf32>
    %91 = arith.maximumf %89, %90 : vector<160x16xf32>
    %92 = arith.truncf %91 : vector<160x16xf32> to vector<160x16xbf16>
    %c0_68 = arith.constant 0 : index
    %c0_69 = arith.constant 0 : index
    %93 = vector.load %arg10[%c0_68, %c0_69] : memref<16x128xbf16, #tpu.memory_space<vmem>>, vector<16x128xbf16>
    %cst_70 = arith.constant dense<0.000000e+00> : vector<160x128xf32>
    %94 = tpu.matmul %92, %93, %cst_70 {dimension_numbers = #tpu.dot_dimension_numbers<[1], [0], [0], [1], [0, 0, 1, 1], [], []>} : vector<160x16xbf16>, vector<16x128xbf16>, vector<160x128xf32> -> vector<160x128xf32>
    %c0_71 = arith.constant 0 : index
    %c0_72 = arith.constant 0 : index
    %95 = vector.load %arg11[%c0_71, %c0_72] : memref<1x128xf32, #tpu.memory_space<vmem>>, vector<1x128xf32>
    %96 = vector.broadcast %95 : vector<1x128xf32> to vector<160x128xf32>
    %97 = arith.addf %94, %96 : vector<160x128xf32>
    %98 = vector.shape_cast %97 : vector<160x128xf32> to vector<10x16x128xf32>
    %c0_73 = arith.constant 0 : index
    %c0_74 = arith.constant 0 : index
    %c0_75 = arith.constant 0 : index
    %99 = vector.load %arg12[%c0_73, %c0_74, %c0_75] : memref<10x16x128xf32, #tpu.memory_space<vmem>>, vector<10x16x128xf32>
    tpu.vector_store %arg12[%c0_73, %c0_74, %c0_75], %98 {strides = array<i32>} : memref<10x16x128xf32, #tpu.memory_space<vmem>>, vector<10x16x128xf32>,
    return
  }
  func.func @transform_0(%arg0: i32) -> (i32, i32, i32) {
    %c0_i32 = arith.constant 0 : i32
    %c0_i32_0 = arith.constant 0 : i32
    %c0_i32_1 = arith.constant 0 : i32
    return %c0_i32, %arg0, %c0_i32_0 : i32, i32, i32
  }
  func.func @transform_1(%arg0: i32) -> (i32, i32, i32) {
    %c0_i32 = arith.constant 0 : i32
    %c0_i32_0 = arith.constant 0 : i32
    %c0_i32_1 = arith.constant 0 : i32
    %c0_i32_2 = arith.constant 0 : i32
    return %c0_i32, %c0_i32_0, %c0_i32_1 : i32, i32, i32
  }
  func.func @transform_2(%arg0: i32) -> (i32, i32) {
    %c0_i32 = arith.constant 0 : i32
    %c0_i32_0 = arith.constant 0 : i32
    %c0_i32_1 = arith.constant 0 : i32
    return %c0_i32, %c0_i32_0 : i32, i32
  }
  func.func @transform_3(%arg0: i32) -> (i32, i32, i32) {
    %c0_i32 = arith.constant 0 : i32
    %c0_i32_0 = arith.constant 0 : i32
    %c0_i32_1 = arith.constant 0 : i32
    %c0_i32_2 = arith.constant 0 : i32
    return %c0_i32, %c0_i32_0, %c0_i32_1 : i32, i32, i32
  }
  func.func @transform_4(%arg0: i32) -> (i32, i32, i32) {
    %c0_i32 = arith.constant 0 : i32
    %c0_i32_0 = arith.constant 0 : i32
    %c0_i32_1 = arith.constant 0 : i32
    %c0_i32_2 = arith.constant 0 : i32
    return %c0_i32, %c0_i32_0, %c0_i32_1 : i32, i32, i32
  }
  func.func @transform_5(%arg0: i32) -> (i32, i32) {
    %c0_i32 = arith.constant 0 : i32
    %c0_i32_0 = arith.constant 0 : i32
    %c0_i32_1 = arith.constant 0 : i32
    return %c0_i32, %c0_i32_0 : i32, i32
  }
  func.func @transform_6(%arg0: i32) -> (i32, i32, i32) {
    %c0_i32 = arith.constant 0 : i32
    %c0_i32_0 = arith.constant 0 : i32
    %c0_i32_1 = arith.constant 0 : i32
    %c0_i32_2 = arith.constant 0 : i32
    return %c0_i32, %c0_i32_0, %c0_i32_1 : i32, i32, i32
  }
  func.func @transform_7(%arg0: i32) -> (i32, i32, i32) {
    %c0_i32 = arith.constant 0 : i32
    %c0_i32_0 = arith.constant 0 : i32
    %c0_i32_1 = arith.constant 0 : i32
    %c0_i32_2 = arith.constant 0 : i32
    return %c0_i32, %c0_i32_0, %c0_i32_1 : i32, i32, i32
  }
  func.func @transform_8(%arg0: i32) -> (i32, i32) {
    %c0_i32 = arith.constant 0 : i32
    %c0_i32_0 = arith.constant 0 : i32
    %c0_i32_1 = arith.constant 0 : i32
    return %c0_i32, %c0_i32_0 : i32, i32
  }
  func.func @transform_9(%arg0: i32) -> (i32, i32) {
    %c0_i32 = arith.constant 0 : i32
    %c0_i32_0 = arith.constant 0 : i32
    %c0_i32_1 = arith.constant 0 : i32
    return %c0_i32, %c0_i32_0 : i32, i32
  }
  func.func @transform_10(%arg0: i32) -> (i32, i32) {
    %c0_i32 = arith.constant 0 : i32
    %c0_i32_0 = arith.constant 0 : i32
    %c0_i32_1 = arith.constant 0 : i32
    return %c0_i32, %c0_i32_0 : i32, i32
  }
  func.func @transform_11(%arg0: i32) -> (i32, i32, i32) {
    %c0_i32 = arith.constant 0 : i32
    %c0_i32_0 = arith.constant 0 : i32
    %c0_i32_1 = arith.constant 0 : i32
    return %c0_i32, %arg0, %c0_i32_0 : i32, i32, i32
  }
}

</mosaic_0001>

<bundles_post_ra>
// kernel: tpu_custom_call.1
= control target key start
LH: loop header
LB: loop body
LE: loop exit
PB: predicated region body
PF: predicated region fallthrough
CT: control target
= control target key end

     0   :  { %s4355_s0 = inlined_call_operand.vmem [shape: f32[16,32,16], index: 0, kind: input, shape index: {}]   ;;  %s4356_s1 = inlined_call_operand.vmem [shape: bf16[3,16,32], index: 1, kind: input, shape index: {}]   ;;  %s4357_s2 = inlined_call_operand.vmem [shape: f32[1,32], index: 2, kind: input, shape index: {}]   ;;  %s4358_s3 = inlined_call_operand.vmem [shape: bf16[3,32,16], index: 3, kind: input, shape index: {}]   ;;  %s4359_s4 = inlined_call_operand.vmem [shape: bf16[3,32,16], index: 4, kind: input, shape index: {}]   ;;  %s4360_s5 = inlined_call_operand.vmem [shape: f32[1,16], index: 5, kind: input, shape index: {}]   ;;  %s4361_s6 = inlined_call_operand.vmem [shape: bf16[3,16,16], index: 6, kind: input, shape index: {}]   ;;  %s4362_s7 = inlined_call_operand.vmem [shape: bf16[3,16,16], index: 7, kind: input, shape index: {}]   ;;  %s4363_s8 = inlined_call_operand.vmem [shape: f32[1,16], index: 8, kind: input, shape index: {}]   ;;  %s4364_s9 = inlined_call_operand.vmem [shape: bf16[16,128], index: 9, kind: input, shape index: {}]   ;;  %s4365_s10 = inlined_call_operand.vmem [shape: f32[1,128], index: 10, kind: input, shape index: {}]   ;;  %s4366_s11 = inlined_call_operand.hbm [shape: f32[10,32,128], index: 11, kind: output, shape index: {}]  }
   0x1   :  { %4367 = sst [smem:[#allocation30_spill]] %s4355_s0 }
   0x2   :  { %16 = vsyncpa [#allocation4], 0 }
   0x3   :  { %18 = vsyncpa [#allocation4 + $0x1], 0  ;;  %s3235_s17 = smov 0   ;;  %s3237_s18 = smov 0  }
   0x4   :  { %s3239_s19 = smov 0   ;;  %s3241_s20 = smov 0  }
   0x5 LB: > { %s2738_s21 = sadd.s32 4294967295, %s3166_s20   ;;  %s2739_s22 = sadd.s32 4294967294, %s3166_s20   ;;  %s3166_s20 = sphi %s3241_s20, %s4418_s20   ;;  %s3162_s19 = sphi %s3239_s19, %s4417_s19   ;;  %s3158_s18 = sphi %s3237_s18, %s4416_s18   ;;  %s3154_s17 = sphi %s3235_s17, %s4415_s17  }
   0x6   : > { %s3258_s23 = sadd.s32 1, %s3166_s20   ;;  %s31_s24 = sadd.s32 1, %s3162_s19 }
   0x7   : > { %s28_s25 = ssub.s32 %s3166_s20, %s3258_s23  ;;  %p38_p0 = scmp.ne.s32.totalorder %s3162_s19, %s3158_s18 }
   0x8   : > { %p29_p1 = scmp.eq.s32.totalorder %s28_s25, 0  ;;  %p39_p2 = scmp.eq.s32.totalorder %s3166_s20, 0 }
   0x9   : > { %p278_p3 = scmp.eq.s32.totalorder %s2738_s21, 1  ;;  %p283_p4 = scmp.ne.s32.totalorder %s3158_s18, %s3154_s17 }
   0xa   : > { %s3271_s26 = scalar_select %p29_p1, %s3162_s19, %s31_s24  }
   0xb   : > { %p40_p5 = por %p39_p2, %p38_p0  ;;  %p3273_p6 = por %p278_p3, %p38_p0 }
   0xc   : > { %p284_p7 = scmp.eq.s32.totalorder %s2739_s22, 1  ;;  %p2741_p9 = scmp.ge.s32.totalorder %s3166_s20, 2 }
   0xe   : > { %p3277_p8 = por %p284_p7, %p283_p4  ;;  %330 = sbr.rel (%p2741_p9) target bundleno = 61 (0x3d), region = 56 }
  0x13   : > { %333 = sbr.rel (!%p40_p5) target bundleno = 61 (0x3d), region = 60  ;;  %s335_s29 = sand.u32 (%p40_p5), 1, %s3162_s19  }
  0x14   : > { %s3051_s30 = sshll.u32 (%p40_p5), %s3166_s20, 4  ;;  %s2742_s12 = sshll.u32 (%p40_p5), %s335_s29, 8 }
  0x15   : > { %s4370_s0 = sld [smem:[#allocation30_spill]] (%p40_p5)  ;;  %s3294_s16 = scalar_lea.vmem (%p40_p5), [#allocation2], %s2742_s12 }
  0x1b   : > { %s3289_s15 = scalar_lea.vmem %s4370_s0, %s3051_s30 }
  0x1c   : > { %v431_v0 = vld [vmem:[%s3289_s15] sm:$0xff]  ;;  %v433_v1 = vld [vmem:[%s3289_s15 + $0x8] sm:$0xff] }
  0x1d   : > { %v435_v2 = vld [vmem:[%s3289_s15 + $0x20] sm:$0xff]  ;;  %432 = vst [vmem:[%s3294_s16] sm:$0xff] %v431_v0  ;;  %v437_v3 = vld [vmem:[%s3289_s15 + $0x28] sm:$0xff] }
  0x1e   : > { %434 = vst [vmem:[%s3294_s16 + $0x8] sm:$0xff] %v433_v1  ;;  %v439_v4 = vld [vmem:[%s3289_s15 + $0x40] sm:$0xff]  ;;  %v441_v5 = vld [vmem:[%s3289_s15 + $0x48] sm:$0xff] }
  0x1f   : > { %436 = vst [vmem:[%s3294_s16 + $0x10] sm:$0xff] %v435_v2  ;;  %v443_v6 = vld [vmem:[%s3289_s15 + $0x60] sm:$0xff]  ;;  %v445_v7 = vld [vmem:[%s3289_s15 + $0x68] sm:$0xff] }
  0x20   : > { %438 = vst [vmem:[%s3294_s16 + $0x18] sm:$0xff] %v437_v3  ;;  %v447_v8 = vld [vmem:[%s3289_s15 + $0x80] sm:$0xff]  ;;  %v449_v9 = vld [vmem:[%s3289_s15 + $0x88] sm:$0xff] }
  0x21   : > { %440 = vst [vmem:[%s3294_s16 + $0x20] sm:$0xff] %v439_v4  ;;  %v451_v10 = vld [vmem:[%s3289_s15 + $0xa0] sm:$0xff]  ;;  %v453_v11 = vld [vmem:[%s3289_s15 + $0xa8] sm:$0xff] }
  0x22   : > { %442 = vst [vmem:[%s3294_s16 + $0x28] sm:$0xff] %v441_v5  ;;  %v455_v12 = vld [vmem:[%s3289_s15 + $0xc0] sm:$0xff]  ;;  %v457_v13 = vld [vmem:[%s3289_s15 + $0xc8] sm:$0xff] }
  0x23   : > { %444 = vst [vmem:[%s3294_s16 + $0x30] sm:$0xff] %v443_v6  ;;  %v459_v14 = vld [vmem:[%s3289_s15 + $0xe0] sm:$0xff]  ;;  %v461_v15 = vld [vmem:[%s3289_s15 + $0xe8] sm:$0xff] }
  0x24   : > { %446 = vst [vmem:[%s3294_s16 + $0x38] sm:$0xff] %v445_v7  ;;  %v463_v16 = vld [vmem:[%s3289_s15 + $0x100] sm:$0xff]  ;;  %v465_v17 = vld [vmem:[%s3289_s15 + $0x108] sm:$0xff] }
  0x25   : > { %448 = vst [vmem:[%s3294_s16 + $0x40] sm:$0xff] %v447_v8  ;;  %v467_v18 = vld [vmem:[%s3289_s15 + $0x120] sm:$0xff]  ;;  %v469_v19 = vld [vmem:[%s3289_s15 + $0x128] sm:$0xff] }
  0x26   : > { %450 = vst [vmem:[%s3294_s16 + $0x48] sm:$0xff] %v449_v9  ;;  %v471_v20 = vld [vmem:[%s3289_s15 + $0x140] sm:$0xff]  ;;  %v473_v21 = vld [vmem:[%s3289_s15 + $0x148] sm:$0xff] }
  0x27   : > { %452 = vst [vmem:[%s3294_s16 + $0x50] sm:$0xff] %v451_v10  ;;  %v475_v22 = vld [vmem:[%s3289_s15 + $0x160] sm:$0xff]  ;;  %v477_v23 = vld [vmem:[%s3289_s15 + $0x168] sm:$0xff] }
  0x28   : > { %454 = vst [vmem:[%s3294_s16 + $0x58] sm:$0xff] %v453_v11  ;;  %v479_v24 = vld [vmem:[%s3289_s15 + $0x180] sm:$0xff]  ;;  %v481_v25 = vld [vmem:[%s3289_s15 + $0x188] sm:$0xff] }
  0x29   : > { %456 = vst [vmem:[%s3294_s16 + $0x60] sm:$0xff] %v455_v12  ;;  %v483_v26 = vld [vmem:[%s3289_s15 + $0x1a0] sm:$0xff]  ;;  %v485_v27 = vld [vmem:[%s3289_s15 + $0x1a8] sm:$0xff] }
  0x2a   : > { %458 = vst [vmem:[%s3294_s16 + $0x68] sm:$0xff] %v457_v13  ;;  %v487_v28 = vld [vmem:[%s3289_s15 + $0x1c0] sm:$0xff]  ;;  %v489_v29 = vld [vmem:[%s3289_s15 + $0x1c8] sm:$0xff] }
  0x2b   : > { %460 = vst [vmem:[%s3294_s16 + $0x70] sm:$0xff] %v459_v14  ;;  %v491_v30 = vld [vmem:[%s3289_s15 + $0x1e0] sm:$0xff]  ;;  %v493_v31 = vld [vmem:[%s3289_s15 + $0x1e8] sm:$0xff] }
  0x2c   : > { %462 = vst [vmem:[%s3294_s16 + $0x78] sm:$0xff] %v461_v15 }
  0x2d   : > { %464 = vst [vmem:[%s3294_s16 + $0x80] sm:$0xff] %v463_v16 }
  0x2e   : > { %466 = vst [vmem:[%s3294_s16 + $0x88] sm:$0xff] %v465_v17 }
  0x2f   : > { %468 = vst [vmem:[%s3294_s16 + $0x90] sm:$0xff] %v467_v18 }
  0x30   : > { %470 = vst [vmem:[%s3294_s16 + $0x98] sm:$0xff] %v469_v19 }
  0x31   : > { %472 = vst [vmem:[%s3294_s16 + $0xa0] sm:$0xff] %v471_v20 }
  0x32   : > { %474 = vst [vmem:[%s3294_s16 + $0xa8] sm:$0xff] %v473_v21 }
  0x33   : > { %476 = vst [vmem:[%s3294_s16 + $0xb0] sm:$0xff] %v475_v22 }
  0x34   : > { %478 = vst [vmem:[%s3294_s16 + $0xb8] sm:$0xff] %v477_v23 }
  0x35   : > { %480 = vst [vmem:[%s3294_s16 + $0xc0] sm:$0xff] %v479_v24 }
  0x36   : > { %482 = vst [vmem:[%s3294_s16 + $0xc8] sm:$0xff] %v481_v25 }
  0x37   : > { %484 = vst [vmem:[%s3294_s16 + $0xd0] sm:$0xff] %v483_v26 }
  0x38   : > { %486 = vst [vmem:[%s3294_s16 + $0xd8] sm:$0xff] %v485_v27 }
  0x39   : > { %488 = vst [vmem:[%s3294_s16 + $0xe0] sm:$0xff] %v487_v28 }
  0x3a   : > { %490 = vst [vmem:[%s3294_s16 + $0xe8] sm:$0xff] %v489_v29 }
  0x3b   : > { %492 = vst [vmem:[%s3294_s16 + $0xf0] sm:$0xff] %v491_v30 }
  0x3c   : > { %494 = vst [vmem:[%s3294_s16 + $0xf8] sm:$0xff] %v493_v31 }
  0x3d PF: > { %p2745_p10 = scmp.ge.s32.totalorder %s3166_s20, 1  ;;  %p499_p11 = scmp.lt.s32.totalorder %s3166_s20, 3 }
  0x3f   : > { %p500_p12 = pnand %p2745_p10, %p499_p11 }
  0x41   : > { %503 = sbr.rel (%p500_p12) target bundleno = 1428 (0x594), region = 98 }
  0x46   : > { %v3053_v32 = vld [vmem:[%s4356_s1 + $0x8] sm:$0xff]  ;;  %v3052_v33 = vld [vmem:[%s4356_s1] sm:$0xff]  ;;  %v3054_v34 = vld [vmem:[%s4356_s1 + $0x10] sm:$0xff]  ;;  %s3369_s13 = sand.u32 1, %s3158_s18   ;;  %vm693_vm0 = vcmask 130048   ;;  %vm1201_vm1 = vcmask 261120  }
  0x47   : > { %s2746_s14 = sshll.u32 %s3369_s13, 8  ;;  %743 = vmatpush.bf16.msra.mxu0 %v3053_v32  ;;  %836 = vmatpush.bf16.msra.mxu1 %v3052_v33  ;;  %s3075_s22 = smul.u32 160, %s3369_s13 }
  0x48   : > { %932 = vmatpush.bf16.msra.mxu2 %v3054_v34  ;;  %s3372_s15 = scalar_lea.vmem [#allocation2], %s2746_s14  ;;  %s2633_s29 = scalar_lea.sflag [#allocation4], %s3369_s13 }
  0x49   : > { %v550_v35 = vld [vmem:[%s3372_s15 + $0x10] sm:$0xff]  ;;  %v551_v36 = vld [vmem:[%s3372_s15 + $0x18] sm:$0xff]  ;;  %v548_v37 = vld [vmem:[%s3372_s15] sm:$0xff] }
  0x4a   : > { %v582_v38 = vpack.c.bf16 %v550_v35, %v550_v35  ;;  %v583_v39 = vpack.c.bf16 %v551_v36, %v551_v36  ;;  %v549_v40 = vld [vmem:[%s3372_s15 + $0x8] sm:$0xff]  ;;  %v580_v41 = vpack.c.bf16 %v548_v37, %v548_v37  ;;  %v552_v42 = vld [vmem:[%s3372_s15 + $0x20] sm:$0xff]  ;;  %v554_v56 = vld [vmem:[%s3372_s15 + $0x30] sm:$0xff] }
  0x4b   : > { %v553_v43 = vld [vmem:[%s3372_s15 + $0x28] sm:$0xff]  ;;  %v581_v44 = vpack.c.bf16 %v549_v40, %v549_v40  ;;  %v584_v45 = vpack.c.bf16 %v552_v42, %v552_v42  ;;  %v555_v57 = vld [vmem:[%s3372_s15 + $0x38] sm:$0xff]  ;;  %v586_v58 = vpack.c.bf16 %v554_v56, %v554_v56  ;;  %v556_v63 = vld [vmem:[%s3372_s15 + $0x40] sm:$0xff] }
  0x4c   : > { %v585_v46 = vpack.c.bf16 %v553_v43, %v553_v43  ;;  %v645_v47 = vunpack.c.l.b16 %v582_v38  ;;  %v646_v48 = vunpack.c.l.b16 %v583_v39  ;;  %v817_v49 = vunpack.c.l.b16 %v580_v41  ;;  %v557_v0 = vld [vmem:[%s3372_s15 + $0x48] sm:$0xff]  ;;  %v558_v6 = vld [vmem:[%s3372_s15 + $0x50] sm:$0xff]  ;;  %v559_v7 = vld [vmem:[%s3372_s15 + $0x58] sm:$0xff] }
  0x4d   : > { %v818_v50 = vunpack.c.l.b16 %v581_v44  ;;  %v647_v51 = vunpack.c.l.b16 %v584_v45  ;;  %v587_v59 = vpack.c.bf16 %v555_v57, %v555_v57  ;;  %v649_v60 = vunpack.c.l.b16 %v586_v58  ;;  %v560_v13 = vld [vmem:[%s3372_s15 + $0x60] sm:$0xff]  ;;  %v561_v14 = vld [vmem:[%s3372_s15 + $0x68] sm:$0xff]  ;;  %v562_v20 = vld [vmem:[%s3372_s15 + $0x70] sm:$0xff] }
  0x4e   : > { %v648_v52 = vunpack.c.l.b16 %v585_v46  ;;  %v673_v53 = vpack.c.b16 %v646_v48, %v645_v47  ;;  %v588_v1 = vpack.c.bf16 %v556_v63, %v556_v63  ;;  %v589_v2 = vpack.c.bf16 %v557_v0, %v557_v0  ;;  %v563_v21 = vld [vmem:[%s3372_s15 + $0x78] sm:$0xff]  ;;  %v564_v27 = vld [vmem:[%s3372_s15 + $0x80] sm:$0xff]  ;;  %v565_v28 = vld [vmem:[%s3372_s15 + $0x88] sm:$0xff] }
  0x4f   : > { %v819_v54 = vpack.c.b16 %v818_v50, %v817_v49  ;;  %v650_v61 = vunpack.c.l.b16 %v587_v59  ;;  %v590_v8 = vpack.c.bf16 %v558_v6, %v558_v6  ;;  %v591_v9 = vpack.c.bf16 %v559_v7, %v559_v7  ;;  %v566_v34 = vld [vmem:[%s3372_s15 + $0x90] sm:$0xff]  ;;  %v567_v35 = vld [vmem:[%s3372_s15 + $0x98] sm:$0xff]  ;;  %v568_v41 = vld [vmem:[%s3372_s15 + $0xa0] sm:$0xff] }
  0x50   : > { %v674_v55 = vpack.c.b16 %v648_v52, %v647_v51  ;;  %2753 = vmatmul.msk.bf16.vlgmr.msra.gmra.mxu0 %vm693_vm0, %v673_v53  ;;  %v651_v3 = vunpack.c.l.b16 %v588_v1  ;;  %v652_v4 = vunpack.c.l.b16 %v589_v2  ;;  %v592_v15 = vpack.c.bf16 %v560_v13, %v560_v13  ;;  %v569_v42 = vld [vmem:[%s3372_s15 + $0xa8] sm:$0xff]  ;;  %v3058_v51 = vld [vmem:[%s4358_s3 + $0x18] sm:$0xff]  ;;  %v570_v52 = vld [vmem:[%s3372_s15 + $0xb0] sm:$0xff] }
  0x51   : > { %2771 = vmatmul.msk.bf16.vlgmr.msra.gmra.mxu1 %vm693_vm0, %v819_v54  ;;  %v675_v62 = vpack.c.b16 %v650_v61, %v649_v60  ;;  %v653_v10 = vunpack.c.l.b16 %v590_v8  ;;  %v654_v11 = vunpack.c.l.b16 %v591_v9  ;;  %v593_v16 = vpack.c.bf16 %v561_v14, %v561_v14  ;;  %1244 = vmatpush.bf16.msra.mxu3 %v3058_v51  ;;  %v3437_v57 = vld [vmem:[%s4357_s2] ss:$0 sm:$0xff]  ;;  %v3056_v7 = vld [vmem:[%s4358_s3 + $0x8] sm:$0xff] }
  0x52   : > { %2791 = vmatmul.msk.bf16.vlgmr.msra.gmra.mxu2 %vm693_vm0, %v674_v55  ;;  %v676_v5 = vpack.c.b16 %v652_v4, %v651_v3  ;;  %v655_v17 = vunpack.c.l.b16 %v592_v15  ;;  %v594_v22 = vpack.c.bf16 %v562_v20, %v562_v20  ;;  %v595_v23 = vpack.c.bf16 %v563_v21, %v563_v21  ;;  %v572_v13 = vld [vmem:[%s3372_s15 + $0xc0] sm:$0xff]  ;;  %v573_v14 = vld [vmem:[%s3372_s15 + $0xc8] sm:$0xff] }
  0x53   : > { %v677_v12 = vpack.c.b16 %v654_v11, %v653_v10  ;;  %v656_v18 = vunpack.c.l.b16 %v593_v16  ;;  %v596_v29 = vpack.c.bf16 %v564_v27, %v564_v27  ;;  %v597_v30 = vpack.c.bf16 %v565_v28, %v565_v28 }
  0x54   : > { %v657_v24 = vunpack.c.l.b16 %v594_v22  ;;  %v658_v25 = vunpack.c.l.b16 %v595_v23  ;;  %v598_v36 = vpack.c.bf16 %v566_v34, %v566_v34  ;;  %v599_v37 = vpack.c.bf16 %v567_v35, %v567_v35 }
  0x55   : > { %v678_v19 = vpack.c.b16 %v656_v18, %v655_v17  ;;  %v659_v31 = vunpack.c.l.b16 %v596_v29  ;;  %v660_v32 = vunpack.c.l.b16 %v597_v30  ;;  %v600_v43 = vpack.c.bf16 %v568_v41, %v568_v41 }
  0x56   : > { %v679_v26 = vpack.c.b16 %v658_v25, %v657_v24  ;;  %v661_v38 = vunpack.c.l.b16 %v598_v36  ;;  %v662_v39 = vunpack.c.l.b16 %v599_v37  ;;  %v601_v44 = vpack.c.bf16 %v569_v42, %v569_v42 }
  0x57   : > { %v680_v33 = vpack.c.b16 %v660_v32, %v659_v31  ;;  %v663_v45 = vunpack.c.l.b16 %v600_v43  ;;  %v602_v59 = vpack.c.bf16 %v570_v52, %v570_v52  ;;  %v604_v17 = vpack.c.bf16 %v572_v13, %v572_v13 }
  0x58   : > { %v681_v40 = vpack.c.b16 %v662_v39, %v661_v38  ;;  %v664_v46 = vunpack.c.l.b16 %v601_v44  ;;  %v605_v22 = vpack.c.bf16 %v573_v14, %v573_v14  ;;  %v574_v39 = vld [vmem:[%s3372_s15 + $0xd0] sm:$0xff] }
  0x59   : > { %v665_v0 = vunpack.c.l.b16 %v602_v59  ;;  %v606_v43 = vpack.c.bf16 %v574_v39, %v574_v39 }
  0x5a   : > { %v3420_v48 = vpack.c.b16 %v664_v46, %v663_v45  ;;  %v668_v27 = vunpack.c.l.b16 %v605_v22  ;;  %v3059_v22 = vld [vmem:[%s4358_s3 + $0x20] sm:$0xff] }
  0x60   : > { %2754 = vmatmul.msk.bf16.gmra.mxu0 %vm693_vm0, %v674_v55 }
  0x61   : > { %2772 = vmatmul.msk.bf16.gmra.mxu1 %vm693_vm0, %v673_v53  ;;  %v571_v53 = vld [vmem:[%s3372_s15 + $0xb8] sm:$0xff] }
  0x62   : > { %2792 = vmatmul.msk.bf16.gmra.mxu2 %vm693_vm0, %v675_v62  ;;  %v603_v60 = vpack.c.bf16 %v571_v53, %v571_v53 }
  0x64   : > { %v666_v1 = vunpack.c.l.b16 %v603_v60 }
  0x66   : > { %v3440_v6 = vpack.c.b16 %v666_v1, %v665_v0 }
  0x70   : > { %2755 = vmatmul.msk.bf16.gmra.mxu0 %vm693_vm0, %v675_v62 }
  0x71   : > { %2773 = vmatmul.msk.bf16.gmra.mxu1 %vm693_vm0, %v674_v55  ;;  %v3057_v55 = vld [vmem:[%s4358_s3 + $0x10] sm:$0xff] }
  0x72   : > { %2793 = vmatmul.msk.bf16.gmra.mxu2 %vm693_vm0, %v676_v5  ;;  %1245 = vmatpush.bf16.msra.mxu3 %v3057_v55 }
  0x76   : > { %1333 = vmatpush.bf16.msrb.mxu3 %v3056_v7 }
  0x80   : > { %2756 = vmatmul.msk.bf16.gmra.mxu0 %vm693_vm0, %v676_v5 }
  0x81   : > { %2774 = vmatmul.msk.bf16.gmra.mxu1 %vm693_vm0, %v675_v62 }
  0x82   : > { %2794 = vmatmul.msk.bf16.gmra.mxu2 %vm693_vm0, %v677_v12 }
  0x90   : > { %2757 = vmatmul.msk.bf16.gmra.mxu0 %vm693_vm0, %v677_v12 }
  0x91   : > { %2775 = vmatmul.msk.bf16.gmra.mxu1 %vm693_vm0, %v676_v5 }
  0x92   : > { %2795 = vmatmul.msk.bf16.gmra.mxu2 %vm693_vm0, %v678_v19 }
  0xa0   : > { %2758 = vmatmul.msk.bf16.gmra.mxu0 %vm693_vm0, %v678_v19 }
  0xa1   : > { %2776 = vmatmul.msk.bf16.gmra.mxu1 %vm693_vm0, %v677_v12 }
  0xa2   : > { %2796 = vmatmul.msk.bf16.gmra.mxu2 %vm693_vm0, %v679_v26 }
  0xb0   : > { %2759 = vmatmul.msk.bf16.gmra.mxu0 %vm693_vm0, %v679_v26 }
  0xb1   : > { %2777 = vmatmul.msk.bf16.gmra.mxu1 %vm693_vm0, %v678_v19 }
  0xb2   : > { %2797 = vmatmul.msk.bf16.gmra.mxu2 %vm693_vm0, %v680_v33 }
  0xc0   : > { %2760 = vmatmul.msk.bf16.gmra.mxu0 %vm693_vm0, %v680_v33 }
  0xc1   : > { %2778 = vmatmul.msk.bf16.gmra.mxu1 %vm693_vm0, %v679_v26  ;;  %v667_v26 = vunpack.c.l.b16 %v604_v17 }
  0xc2   : > { %2798 = vmatmul.msk.bf16.gmra.mxu2 %vm693_vm0, %v681_v40 }
  0xcd   : > { %v745_v47 = vpop.f32.mrf.mxu0 }
  0xce   : > { %v838_v49 = vpop.f32.mrf.mxu1 }
  0xcf   : > { %v839_v50 = vadd.f32 %v838_v49, %v745_v47 }
  0xd0   : > { %2761 = vmatmul.msk.bf16.gmra.mxu0 %vm693_vm0, %v681_v40 }
  0xd1   : > { %2779 = vmatmul.msk.bf16.gmra.mxu1 %vm693_vm0, %v680_v33  ;;  %v3456_v33 = vpack.c.b16 %v668_v27, %v667_v26 }
  0xd2   : > { %2799 = vmatmul.msk.bf16.gmra.mxu2 %vm693_vm0, %v3420_v48 }
  0xd5   : > { %v934_v54 = vpop.f32.mrf.mxu2  ;;  %v747_v58 = vpop.f32.mrf.mxu0 }
  0xd6   : > { %v1004_v56 = vadd.f32 %v934_v54, %v839_v50  ;;  %v840_v61 = vpop.f32.mrf.mxu1 }
  0xd7   : > { %v841_v62 = vadd.f32 %v840_v61, %v747_v58 }
  0xd8   : > { %v1036_v63 = vadd.f32 %v3437_v57, %v1004_v56 }
  0xda   : > { %v1064_v3 = vmax.f32 %v1036_v63, 0.0 }
  0xdc   : > { %v1092_v10 = vpack.c.bf16 %v1064_v3, %v1064_v3  ;;  %v577_v3 = vld [vmem:[%s3372_s15 + $0xe8] sm:$0xff] }
  0xdd   : > { %v936_v2 = vpop.f32.mrf.mxu2  ;;  %v750_v5 = vpop.f32.mrf.mxu0 }
  0xde   : > { %v1005_v4 = vadd.f32 %v936_v2, %v841_v62  ;;  %v843_v8 = vpop.f32.mrf.mxu1  ;;  %v1309_v18 = vunpack.c.l.b16 %v1092_v10  ;;  %v576_v2 = vld [vmem:[%s3372_s15 + $0xe0] sm:$0xff] }
  0xdf   : > { %v844_v12 = vadd.f32 %v843_v8, %v750_v5  ;;  %v608_v7 = vpack.c.bf16 %v576_v2, %v576_v2 }
  0xe0   : > { %v1037_v9 = vadd.f32 %v3437_v57, %v1005_v4  ;;  %2762 = vmatmul.msk.bf16.gmra.mxu0 %vm693_vm0, %v3420_v48 }
  0xe1   : > { %2780 = vmatmul.msk.bf16.gmra.mxu1 %vm693_vm0, %v681_v40  ;;  %v575_v40 = vld [vmem:[%s3372_s15 + $0xd8] sm:$0xff] }
  0xe2   : > { %v1065_v11 = vmax.f32 %v1037_v9, 0.0  ;;  %2800 = vmatmul.msk.bf16.gmra.mxu2 %vm693_vm0, %v3440_v6  ;;  %v607_v49 = vpack.c.bf16 %v575_v40, %v575_v40 }
  0xe4   : > { %v1093_v15 = vpack.c.bf16 %v1065_v11, %v1065_v11  ;;  %v670_v53 = vunpack.c.l.b16 %v607_v49 }
  0xe5   : > { %v939_v16 = vpop.f32.mrf.mxu2  ;;  %v752_v21 = vpop.f32.mrf.mxu0 }
  0xe6   : > { %v1310_v19 = vunpack.c.l.b16 %v1093_v15  ;;  %v1006_v20 = vadd.f32 %v939_v16, %v844_v12  ;;  %v845_v23 = vpop.f32.mrf.mxu1  ;;  %v609_v12 = vpack.c.bf16 %v577_v3, %v577_v3  ;;  %v3064_v15 = vld [vmem:[%s4359_s4 + $0x18] sm:$0xff]  ;;  %v3062_v16 = vld [vmem:[%s4359_s4 + $0x8] sm:$0xff] }
  0xe7   : > { %v846_v28 = vadd.f32 %v845_v23, %v752_v21  ;;  %1541 = vmatpush.bf16.msrb.mxu1 %v3064_v15  ;;  %1622 = vmatpush.bf16.msrb.mxu2 %v3062_v16  ;;  %v3063_v23 = vld [vmem:[%s4359_s4 + $0x10] sm:$0xff] }
  0xe8   : > { %v3453_v24 = vpack.c.b16 %v1310_v19, %v1309_v18  ;;  %v1038_v25 = vadd.f32 %v3437_v57, %v1006_v20  ;;  %v671_v18 = vunpack.c.l.b16 %v608_v7  ;;  %v672_v19 = vunpack.c.l.b16 %v609_v12 }
  0xea   : > { %v1066_v30 = vmax.f32 %v1038_v25, 0.0  ;;  %v3061_v25 = vld [vmem:[%s4359_s4] sm:$0xff] }
  0xeb   : > { %1542 = vmatpush.bf16.msrb.mxu1 %v3063_v23  ;;  %1623 = vmatpush.bf16.msrb.mxu2 %v3061_v25 }
  0xec   : > { %v1094_v36 = vpack.c.bf16 %v1066_v30, %v1066_v30 }
  0xed   : > { %v941_v29 = vpop.f32.mrf.mxu2  ;;  %v755_v32 = vpop.f32.mrf.mxu0 }
  0xee   : > { %v1007_v31 = vadd.f32 %v941_v29, %v846_v28  ;;  %v848_v34 = vpop.f32.mrf.mxu1  ;;  %v1153_v44 = vunpack.c.l.b16 %v1094_v36  ;;  %v686_v29 = vpack.c.b16 %v672_v19, %v671_v18  ;;  %v578_v36 = vld [vmem:[%s3372_s15 + $0xf0] sm:$0xff] }
  0xef   : > { %v849_v38 = vadd.f32 %v848_v34, %v755_v32  ;;  %v610_v40 = vpack.c.bf16 %v578_v36, %v578_v36 }
  0xf0   : > { %v1039_v35 = vadd.f32 %v3437_v57, %v1007_v31  ;;  %2763 = vmatmul.msk.bf16.gmra.mxu0 %vm693_vm0, %v3440_v6 }
  0xf1   : > { %2781 = vmatmul.msk.bf16.gmra.mxu1 %vm693_vm0, %v3420_v48  ;;  %v669_v48 = vunpack.c.l.b16 %v606_v43 }
  0xf2   : > { %v1067_v37 = vmax.f32 %v1039_v35, 0.0  ;;  %2801 = vmatmul.msk.bf16.gmra.mxu2 %vm693_vm0, %v3456_v33 }
  0xf3   : > { %v3472_v60 = vpack.c.b16 %v670_v53, %v669_v48 }
  0xf4   : > { %v1095_v41 = vpack.c.bf16 %v1067_v37, %v1067_v37  ;;  %v579_v37 = vld [vmem:[%s3372_s15 + $0xf8] sm:$0xff]  ;;  %s4271_s15 = scalar_lea.vmem [#allocation3], %s3075_s22 }
  0xf5   : > { %v944_v42 = vpop.f32.mrf.mxu2  ;;  %v757_v47 = vpop.f32.mrf.mxu0 }
  0xf6   : > { %v1154_v45 = vunpack.c.l.b16 %v1095_v41  ;;  %v1008_v46 = vadd.f32 %v944_v42, %v849_v38  ;;  %v850_v50 = vpop.f32.mrf.mxu1 }
  0xf7   : > { %v851_v54 = vadd.f32 %v850_v50, %v757_v47 }
  0xf8   : > { %v3467_v51 = vpack.c.b16 %v1154_v45, %v1153_v44  ;;  %v1040_v52 = vadd.f32 %v3437_v57, %v1008_v46  ;;  %v611_v45 = vpack.c.bf16 %v579_v37, %v579_v37 }
  0xfa   : > { %2817 = vmatmul.msk.bf16.vlgmr.msra.gmra.mxu3 %vm1201_vm1, %v3467_v51  ;;  %v1068_v56 = vmax.f32 %v1040_v52, 0.0  ;;  %v914_v50 = vunpack.c.l.b16 %v611_v45 }
  0xfc   : > { %v1096_v63 = vpack.c.bf16 %v1068_v56, %v1068_v56 }
  0xfd   : > { %v946_v55 = vpop.f32.mrf.mxu2  ;;  %v760_v59 = vpop.f32.mrf.mxu0 }
  0xfe   : > { %v1009_v58 = vadd.f32 %v946_v55, %v851_v54  ;;  %v853_v61 = vpop.f32.mrf.mxu1  ;;  %v1155_v8 = vunpack.c.l.b16 %v1096_v63 }
  0xff   : > { %v854_v1 = vadd.f32 %v853_v61, %v760_v59 }
 0x100   : > { %v1041_v62 = vadd.f32 %v3437_v57, %v1009_v58  ;;  %2764 = vmatmul.msk.bf16.gmra.mxu0 %vm693_vm0, %v3456_v33 }
 0x101   : > { %2782 = vmatmul.msk.bf16.gmra.mxu1 %vm693_vm0, %v3440_v6  ;;  %v3060_v6 = vld [vmem:[%s4358_s3 + $0x28] sm:$0xff] }
 0x102   : > { %v1069_v0 = vmax.f32 %v1041_v62, 0.0  ;;  %2802 = vmatmul.msk.bf16.gmra.mxu2 %vm693_vm0, %v3472_v60  ;;  %1427 = vmatpush.bf16.msrb.mxu0 %v3060_v6 }
 0x104   : > { %v1097_v4 = vpack.c.bf16 %v1069_v0, %v1069_v0 }
 0x105   : > { %v949_v5 = vpop.f32.mrf.mxu2  ;;  %v762_v11 = vpop.f32.mrf.mxu0 }
 0x106   : > { %v1156_v9 = vunpack.c.l.b16 %v1097_v4  ;;  %v1010_v10 = vadd.f32 %v949_v5, %v854_v1  ;;  %v855_v13 = vpop.f32.mrf.mxu1  ;;  %1428 = vmatpush.bf16.msrb.mxu0 %v3059_v22 }
 0x107   : > { %v856_v20 = vadd.f32 %v855_v13, %v762_v11 }
 0x108   : > { %v3483_v14 = vpack.c.b16 %v1156_v9, %v1155_v8  ;;  %v1042_v17 = vadd.f32 %v3437_v57, %v1010_v10 }
 0x10a   : > { %2818 = vmatmul.msk.bf16.gmra.mxu3 %vm1201_vm1, %v3483_v14  ;;  %v1070_v26 = vmax.f32 %v1042_v17, 0.0 }
 0x10c   : > { %v1098_v32 = vpack.c.bf16 %v1070_v26, %v1070_v26 }
 0x10d   : > { %v951_v21 = vpop.f32.mrf.mxu2  ;;  %v765_v28 = vpop.f32.mrf.mxu0 }
 0x10e   : > { %v1011_v27 = vadd.f32 %v951_v21, %v856_v20  ;;  %v858_v30 = vpop.f32.mrf.mxu1  ;;  %v1157_v41 = vunpack.c.l.b16 %v1098_v32 }
 0x10f   : > { %v859_v35 = vadd.f32 %v858_v30, %v765_v28 }
 0x110   : > { %v1043_v31 = vadd.f32 %v3437_v57, %v1011_v27  ;;  %2765 = vmatmul.msk.bf16.gmra.mxu0 %vm693_vm0, %v3472_v60 }
 0x111   : > { %2783 = vmatmul.msk.bf16.gmra.mxu1 %vm693_vm0, %v3456_v33  ;;  %v913_v33 = vunpack.c.l.b16 %v610_v40 }
 0x112   : > { %v1071_v34 = vmax.f32 %v1043_v31, 0.0  ;;  %2803 = vmatmul.msk.bf16.gmra.mxu2 %vm693_vm0, %v686_v29 }
 0x113   : > { %v915_v56 = vpack.c.b16 %v914_v50, %v913_v33 }
 0x114   : > { %v1099_v38 = vpack.c.bf16 %v1071_v34, %v1071_v34 }
 0x115   : > { %v954_v39 = vpop.f32.mrf.mxu2  ;;  %v767_v44 = vpop.f32.mrf.mxu0 }
 0x116   : > { %v1158_v42 = vunpack.c.l.b16 %v1099_v38  ;;  %v1012_v43 = vadd.f32 %v954_v39, %v859_v35  ;;  %v860_v46 = vpop.f32.mrf.mxu1  ;;  %v3055_v35 = vld [vmem:[%s4358_s3] sm:$0xff] }
 0x117   : > { %v861_v52 = vadd.f32 %v860_v46, %v767_v44  ;;  %1334 = vmatpush.bf16.msrb.mxu3 %v3055_v35 }
 0x118   : > { %v3514_v47 = vpack.c.b16 %v1158_v42, %v1157_v41  ;;  %v1044_v49 = vadd.f32 %v3437_v57, %v1012_v43 }
 0x11a   : > { %2819 = vmatmul.msk.bf16.gmra.mxu3 %vm1201_vm1, %v3514_v47  ;;  %v1072_v53 = vmax.f32 %v1044_v49, 0.0 }
 0x11c   : > { %v1100_v61 = vpack.c.bf16 %v1072_v53, %v1072_v53 }
 0x11d   : > { %v956_v48 = vpop.f32.mrf.mxu2  ;;  %v770_v55 = vpop.f32.mrf.mxu0 }
 0x11e   : > { %v1013_v54 = vadd.f32 %v956_v48, %v861_v52  ;;  %v863_v58 = vpop.f32.mrf.mxu1  ;;  %v1159_v2 = vunpack.c.l.b16 %v1100_v61 }
 0x11f   : > { %v864_v63 = vadd.f32 %v863_v58, %v770_v55 }
 0x120   : > { %v1045_v59 = vadd.f32 %v3437_v57, %v1013_v54  ;;  %2766 = vmatmul.msk.bf16.gmra.mxu0 %vm693_vm0, %v686_v29 }
 0x121   : > { %2784 = vmatmul.msk.bf16.gmra.mxu1 %vm693_vm0, %v3472_v60 }
 0x122   : > { %v1073_v62 = vmax.f32 %v1045_v59, 0.0  ;;  %2804 = vmatmul.msk.bf16.gmra.mxu2 %vm693_vm0, %v915_v56 }
 0x124   : > { %v1101_v0 = vpack.c.bf16 %v1073_v62, %v1073_v62 }
 0x125   : > { %v959_v1 = vpop.f32.mrf.mxu2  ;;  %v772_v5 = vpop.f32.mrf.mxu0 }
 0x126   : > { %v1160_v3 = vunpack.c.l.b16 %v1101_v0  ;;  %v1014_v4 = vadd.f32 %v959_v1, %v864_v63  ;;  %v865_v7 = vpop.f32.mrf.mxu1 }
 0x127   : > { %v866_v10 = vadd.f32 %v865_v7, %v772_v5 }
 0x128   : > { %v3524_v8 = vpack.c.b16 %v1160_v3, %v1159_v2  ;;  %v1046_v9 = vadd.f32 %v3437_v57, %v1014_v4 }
 0x12a   : > { %2820 = vmatmul.msk.bf16.gmra.mxu3 %vm1201_vm1, %v3524_v8  ;;  %v1074_v12 = vmax.f32 %v1046_v9, 0.0 }
 0x12c   : > { %v1102_v16 = vpack.c.bf16 %v1074_v12, %v1074_v12 }
 0x12d   : > { %v961_v11 = vpop.f32.mrf.mxu2  ;;  %v775_v13 = vpop.f32.mrf.mxu0 }
 0x12e   : > { %v1015_v60 = vadd.f32 %v961_v11, %v866_v10  ;;  %v868_v6 = vpop.f32.mrf.mxu1  ;;  %v1161_v21 = vunpack.c.l.b16 %v1102_v16 }
 0x12f   : > { %v869_v18 = vadd.f32 %v868_v6, %v775_v13 }
 0x130   : > { %v1047_v15 = vadd.f32 %v3437_v57, %v1015_v60  ;;  %2861 = vmatmul.msk.bf16.vlgmr.msrb.gmra.mxu0 %vm1201_vm1, %v3483_v14 }
 0x131   : > { %2885 = vmatmul.msk.bf16.vlgmr.msrb.gmra.mxu1 %vm1201_vm1, %v3467_v51 }
 0x132   : > { %v1075_v17 = vmax.f32 %v1047_v15, 0.0  ;;  %2905 = vmatmul.msk.bf16.vlgmr.msrb.gmra.mxu2 %vm1201_vm1, %v3453_v24 }
 0x134   : > { %v1103_v19 = vpack.c.bf16 %v1075_v17, %v1075_v17 }
 0x135   : > { %v964_v20 = vpop.f32.mrf.mxu2  ;;  %v777_v25 = vpop.f32.mrf.mxu0 }
 0x136   : > { %v1162_v22 = vunpack.c.l.b16 %v1103_v19  ;;  %v1016_v23 = vadd.f32 %v964_v20, %v869_v18  ;;  %v870_v26 = vpop.f32.mrf.mxu1 }
 0x137   : > { %v871_v29 = vadd.f32 %v870_v26, %v777_v25 }
 0x138   : > { %v3536_v27 = vpack.c.b16 %v1162_v22, %v1161_v21  ;;  %v1048_v28 = vadd.f32 %v3437_v57, %v1016_v23 }
 0x13a   : > { %2821 = vmatmul.msk.bf16.gmra.mxu3 %vm1201_vm1, %v3536_v27  ;;  %v1076_v31 = vmax.f32 %v1048_v28, 0.0 }
 0x13c   : > { %v1104_v38 = vpack.c.bf16 %v1076_v31, %v1076_v31 }
 0x13d   : > { %v966_v30 = vpop.f32.mrf.mxu2  ;;  %v780_v34 = vpop.f32.mrf.mxu0 }
 0x13e   : > { %v1017_v32 = vadd.f32 %v966_v30, %v871_v29  ;;  %v873_v36 = vpop.f32.mrf.mxu1  ;;  %v1163_v43 = vunpack.c.l.b16 %v1104_v38 }
 0x13f   : > { %v874_v40 = vadd.f32 %v873_v36, %v780_v34 }
 0x140   : > { %v1049_v37 = vadd.f32 %v3437_v57, %v1017_v32  ;;  %2862 = vmatmul.msk.bf16.gmra.mxu0 %vm1201_vm1, %v3514_v47 }
 0x141   : > { %2886 = vmatmul.msk.bf16.gmra.mxu1 %vm1201_vm1, %v3483_v14 }
 0x142   : > { %v1077_v39 = vmax.f32 %v1049_v37, 0.0  ;;  %2906 = vmatmul.msk.bf16.gmra.mxu2 %vm1201_vm1, %v3467_v51 }
 0x144   : > { %v1105_v41 = vpack.c.bf16 %v1077_v39, %v1077_v39 }
 0x145   : > { %v969_v42 = vpop.f32.mrf.mxu2  ;;  %v782_v46 = vpop.f32.mrf.mxu0 }
 0x146   : > { %v1164_v44 = vunpack.c.l.b16 %v1105_v41  ;;  %v1018_v45 = vadd.f32 %v969_v42, %v874_v40  ;;  %v875_v49 = vpop.f32.mrf.mxu1 }
 0x147   : > { %v876_v52 = vadd.f32 %v875_v49, %v782_v46 }
 0x148   : > { %v3551_v33 = vpack.c.b16 %v1164_v44, %v1163_v43  ;;  %v1050_v50 = vadd.f32 %v3437_v57, %v1018_v45 }
 0x14a   : > { %2822 = vmatmul.msk.bf16.gmra.mxu3 %vm1201_vm1, %v3551_v33  ;;  %v1078_v53 = vmax.f32 %v1050_v50, 0.0 }
 0x14c   : > { %v1106_v59 = vpack.c.bf16 %v1078_v53, %v1078_v53 }
 0x14d   : > { %v971_v48 = vpop.f32.mrf.mxu2  ;;  %v785_v55 = vpop.f32.mrf.mxu0 }
 0x14e   : > { %v1019_v54 = vadd.f32 %v971_v48, %v876_v52  ;;  %v878_v56 = vpop.f32.mrf.mxu1  ;;  %v1165_v1 = vunpack.c.l.b16 %v1106_v59 }
 0x14f   : > { %v879_v62 = vadd.f32 %v878_v56, %v785_v55 }
 0x150   : > { %v1051_v58 = vadd.f32 %v3437_v57, %v1019_v54  ;;  %2863 = vmatmul.msk.bf16.gmra.mxu0 %vm1201_vm1, %v3524_v8 }
 0x151   : > { %2887 = vmatmul.msk.bf16.gmra.mxu1 %vm1201_vm1, %v3514_v47 }
 0x152   : > { %v1079_v61 = vmax.f32 %v1051_v58, 0.0  ;;  %2907 = vmatmul.msk.bf16.gmra.mxu2 %vm1201_vm1, %v3483_v14 }
 0x154   : > { %v1107_v63 = vpack.c.bf16 %v1079_v61, %v1079_v61 }
 0x155   : > { %v974_v0 = vpop.f32.mrf.mxu2  ;;  %v787_v4 = vpop.f32.mrf.mxu0 }
 0x156   : > { %v1166_v2 = vunpack.c.l.b16 %v1107_v63  ;;  %v1020_v3 = vadd.f32 %v974_v0, %v879_v62  ;;  %v880_v5 = vpop.f32.mrf.mxu1 }
 0x157   : > { %v881_v10 = vadd.f32 %v880_v5, %v787_v4 }
 0x158   : > { %v3563_v7 = vpack.c.b16 %v1166_v2, %v1165_v1  ;;  %v1052_v9 = vadd.f32 %v3437_v57, %v1020_v3 }
 0x15a   : > { %2823 = vmatmul.msk.bf16.gmra.mxu3 %vm1201_vm1, %v3563_v7  ;;  %v1080_v12 = vmax.f32 %v1052_v9, 0.0 }
 0x15c   : > { %v1108_v16 = vpack.c.bf16 %v1080_v12, %v1080_v12 }
 0x15d   : > { %v976_v11 = vpop.f32.mrf.mxu2  ;;  %v790_v13 = vpop.f32.mrf.mxu0 }
 0x15e   : > { %v1021_v60 = vadd.f32 %v976_v11, %v881_v10  ;;  %v883_v6 = vpop.f32.mrf.mxu1  ;;  %v1167_v21 = vunpack.c.l.b16 %v1108_v16 }
 0x15f   : > { %v884_v18 = vadd.f32 %v883_v6, %v790_v13 }
 0x160   : > { %v1053_v15 = vadd.f32 %v3437_v57, %v1021_v60  ;;  %2864 = vmatmul.msk.bf16.gmra.mxu0 %vm1201_vm1, %v3536_v27 }
 0x161   : > { %2888 = vmatmul.msk.bf16.gmra.mxu1 %vm1201_vm1, %v3524_v8 }
 0x162   : > { %v1081_v17 = vmax.f32 %v1053_v15, 0.0  ;;  %2908 = vmatmul.msk.bf16.gmra.mxu2 %vm1201_vm1, %v3514_v47 }
 0x164   : > { %v1109_v19 = vpack.c.bf16 %v1081_v17, %v1081_v17 }
 0x165   : > { %v979_v20 = vpop.f32.mrf.mxu2  ;;  %v792_v25 = vpop.f32.mrf.mxu0 }
 0x166   : > { %v1168_v22 = vunpack.c.l.b16 %v1109_v19  ;;  %v1022_v23 = vadd.f32 %v979_v20, %v884_v18  ;;  %v885_v26 = vpop.f32.mrf.mxu1 }
 0x167   : > { %v886_v30 = vadd.f32 %v885_v26, %v792_v25 }
 0x168   : > { %v3575_v28 = vpack.c.b16 %v1168_v22, %v1167_v21  ;;  %v1054_v29 = vadd.f32 %v3437_v57, %v1022_v23 }
 0x16a   : > { %2824 = vmatmul.msk.bf16.gmra.mxu3 %vm1201_vm1, %v3575_v28  ;;  %v1082_v32 = vmax.f32 %v1054_v29, 0.0 }
 0x16c   : > { %v1110_v38 = vpack.c.bf16 %v1082_v32, %v1082_v32 }
 0x16d   : > { %v981_v31 = vpop.f32.mrf.mxu2  ;;  %v795_v35 = vpop.f32.mrf.mxu0 }
 0x16e   : > { %v1023_v34 = vadd.f32 %v981_v31, %v886_v30  ;;  %v888_v36 = vpop.f32.mrf.mxu1  ;;  %v1169_v43 = vunpack.c.l.b16 %v1110_v38  ;;  %v3066_v38 = vld [vmem:[%s4359_s4 + $0x28] sm:$0xff] }
 0x16f   : > { %v889_v40 = vadd.f32 %v888_v36, %v795_v35  ;;  %1708 = vmatpush.bf16.msra.mxu3 %v3066_v38 }
 0x170   : > { %v1055_v37 = vadd.f32 %v3437_v57, %v1023_v34  ;;  %2865 = vmatmul.msk.bf16.gmra.mxu0 %vm1201_vm1, %v3551_v33 }
 0x171   : > { %2889 = vmatmul.msk.bf16.gmra.mxu1 %vm1201_vm1, %v3536_v27 }
 0x172   : > { %v1083_v39 = vmax.f32 %v1055_v37, 0.0  ;;  %2909 = vmatmul.msk.bf16.gmra.mxu2 %vm1201_vm1, %v3524_v8 }
 0x174   : > { %v1111_v41 = vpack.c.bf16 %v1083_v39, %v1083_v39 }
 0x175   : > { %v984_v42 = vpop.f32.mrf.mxu2  ;;  %v797_v46 = vpop.f32.mrf.mxu0 }
 0x176   : > { %v1170_v44 = vunpack.c.l.b16 %v1111_v41  ;;  %v1024_v45 = vadd.f32 %v984_v42, %v889_v40  ;;  %v890_v49 = vpop.f32.mrf.mxu1 }
 0x177   : > { %v891_v48 = vadd.f32 %v890_v49, %v797_v46 }
 0x178   : > { %v3587_v50 = vpack.c.b16 %v1170_v44, %v1169_v43  ;;  %v1056_v52 = vadd.f32 %v3437_v57, %v1024_v45 }
 0x17a   : > { %2825 = vmatmul.msk.bf16.gmra.mxu3 %vm1201_vm1, %v3587_v50  ;;  %v1084_v55 = vmax.f32 %v1056_v52, 0.0 }
 0x17c   : > { %v1112_v62 = vpack.c.bf16 %v1084_v55, %v1084_v55 }
 0x17d   : > { %v986_v53 = vpop.f32.mrf.mxu2  ;;  %v3592_v54 = vpop.f32.mrf.mxu3 }
 0x17e   : > { %v1025_v56 = vadd.f32 %v986_v53, %v891_v48  ;;  %v800_v58 = vpop.f32.mrf.mxu0  ;;  %v893_v59 = vpop.f32.mrf.mxu1  ;;  %v1171_v4 = vunpack.c.l.b16 %v1112_v62 }
 0x17f   : > { %v894_v0 = vadd.f32 %v893_v59, %v800_v58 }
 0x180   : > { %v1057_v61 = vadd.f32 %v3437_v57, %v1025_v56  ;;  %2866 = vmatmul.msk.bf16.gmra.mxu0 %vm1201_vm1, %v3563_v7 }
 0x181   : > { %2890 = vmatmul.msk.bf16.gmra.mxu1 %vm1201_vm1, %v3551_v33 }
 0x182   : > { %v1085_v63 = vmax.f32 %v1057_v61, 0.0  ;;  %2910 = vmatmul.msk.bf16.gmra.mxu2 %vm1201_vm1, %v3536_v27 }
 0x184   : > { %v1113_v1 = vpack.c.bf16 %v1085_v63, %v1085_v63 }
 0x185   : > { %v989_v2 = vpop.f32.mrf.mxu2  ;;  %v3601_v3 = vpop.f32.mrf.mxu3 }
 0x186   : > { %v1172_v5 = vunpack.c.l.b16 %v1113_v1  ;;  %v1026_v9 = vadd.f32 %v989_v2, %v894_v0  ;;  %v802_v10 = vpop.f32.mrf.mxu0  ;;  %v895_v11 = vpop.f32.mrf.mxu1 }
 0x187   : > { %v896_v13 = vadd.f32 %v895_v11, %v802_v10 }
 0x188   : > { %v3603_v12 = vpack.c.b16 %v1172_v5, %v1171_v4  ;;  %v1058_v60 = vadd.f32 %v3437_v57, %v1026_v9 }
 0x18a   : > { %2826 = vmatmul.msk.bf16.gmra.mxu3 %vm1201_vm1, %v3603_v12  ;;  %v1086_v16 = vmax.f32 %v1058_v60, 0.0 }
 0x18c   : > { %v1114_v21 = vpack.c.bf16 %v1086_v16, %v1086_v16 }
 0x18d   : > { %v991_v6 = vpop.f32.mrf.mxu2  ;;  %v3608_v15 = vpop.f32.mrf.mxu3 }
 0x18e   : > { %v1027_v17 = vadd.f32 %v991_v6, %v896_v13  ;;  %v805_v18 = vpop.f32.mrf.mxu0  ;;  %v898_v19 = vpop.f32.mrf.mxu1  ;;  %v1173_v30 = vunpack.c.l.b16 %v1114_v21 }
 0x18f   : > { %v899_v23 = vadd.f32 %v898_v19, %v805_v18 }
 0x190   : > { %v1059_v20 = vadd.f32 %v3437_v57, %v1027_v17  ;;  %2867 = vmatmul.msk.bf16.gmra.mxu0 %vm1201_vm1, %v3575_v28 }
 0x191   : > { %2891 = vmatmul.msk.bf16.gmra.mxu1 %vm1201_vm1, %v3563_v7 }
 0x192   : > { %v1087_v22 = vmax.f32 %v1059_v20, 0.0  ;;  %2911 = vmatmul.msk.bf16.gmra.mxu2 %vm1201_vm1, %v3551_v33 }
 0x194   : > { %v1115_v25 = vpack.c.bf16 %v1087_v22, %v1087_v22 }
 0x195   : > { %v994_v26 = vpop.f32.mrf.mxu2  ;;  %v3617_v29 = vpop.f32.mrf.mxu3 }
 0x196   : > { %v1174_v31 = vunpack.c.l.b16 %v1115_v25  ;;  %v1028_v32 = vadd.f32 %v994_v26, %v899_v23  ;;  %v807_v35 = vpop.f32.mrf.mxu0  ;;  %v900_v36 = vpop.f32.mrf.mxu1  ;;  %v3065_v26 = vld [vmem:[%s4359_s4 + $0x20] sm:$0xff] }
 0x197   : > { %v901_v39 = vadd.f32 %v900_v36, %v807_v35  ;;  %1709 = vmatpush.bf16.msra.mxu3 %v3065_v26 }
 0x198   : > { %v3619_v34 = vpack.c.b16 %v1174_v31, %v1173_v30  ;;  %v1060_v37 = vadd.f32 %v3437_v57, %v1028_v32 }
 0x19a   : > { %2827 = vmatmul.msk.bf16.gmra.mxu3 %vm1201_vm1, %v3619_v34  ;;  %v1088_v42 = vmax.f32 %v1060_v37, 0.0 }
 0x19c   : > { %v1116_v45 = vpack.c.bf16 %v1088_v42, %v1088_v42 }
 0x19d   : > { %v996_v40 = vpop.f32.mrf.mxu2  ;;  %v3627_v41 = vpop.f32.mrf.mxu3 }
 0x19e   : > { %v1029_v43 = vadd.f32 %v996_v40, %v901_v39  ;;  %v1175_v48 = vunpack.c.l.b16 %v1116_v45  ;;  %v810_v59 = vpop.f32.mrf.mxu0  ;;  %v903_v61 = vpop.f32.mrf.mxu1 }
 0x19f   : > { %v904_v2 = vadd.f32 %v903_v61, %v810_v59 }
 0x1a0   : > { %v1061_v44 = vadd.f32 %v3437_v57, %v1029_v43  ;;  %2868 = vmatmul.msk.bf16.gmra.mxu0 %vm1201_vm1, %v3587_v50 }
 0x1a1   : > { %2892 = vmatmul.msk.bf16.gmra.mxu1 %vm1201_vm1, %v3575_v28 }
 0x1a2   : > { %v1089_v46 = vmax.f32 %v1061_v44, 0.0  ;;  %2912 = vmatmul.msk.bf16.gmra.mxu2 %vm1201_vm1, %v3563_v7  ;;  %v3069_v44 = vld [vmem:[%s4361_s6 + $0x10] sm:$0xff] }
 0x1a3   : > { %2142 = vmatpush.bf16.msra.mxu2 %v3069_v44 }
 0x1a4   : > { %v1117_v49 = vpack.c.bf16 %v1089_v46, %v1089_v46  ;;  %v3068_v46 = vld [vmem:[%s4361_s6 + $0x8] sm:$0xff] }
 0x1a5   : > { %v3636_v52 = vpop.f32.mrf.mxu3  ;;  %v999_v63 = vpop.f32.mrf.mxu2  ;;  %1993 = vmatpush.bf16.msra.mxu0 %v3068_v46 }
 0x1a6   : > { %v1176_v53 = vunpack.c.l.b16 %v1117_v49  ;;  %v812_v0 = vpop.f32.mrf.mxu0  ;;  %v905_v1 = vpop.f32.mrf.mxu1  ;;  %v3067_v49 = vld [vmem:[%s4361_s6] sm:$0xff] }
 0x1a7   : > { %v906_v4 = vadd.f32 %v905_v1, %v812_v0  ;;  %2066 = vmatpush.bf16.msra.mxu1 %v3067_v49 }
 0x1a8   : > { %v3638_v55 = vpack.c.b16 %v1176_v53, %v1175_v48 }
 0x1aa   : > { %2828 = vmatmul.msk.bf16.gmra.mxu3 %vm1201_vm1, %v3638_v55 }
 0x1ad   : > { %v3642_v56 = vpop.f32.mrf.mxu3  ;;  %v1001_v9 = vpop.f32.mrf.mxu2 }
 0x1ae   : > { %v1031_v10 = vadd.f32 %v1001_v9, %v906_v4  ;;  %v1544_v9 = vpop.f32.mrf.mxu1 }
 0x1b0   : > { %2869 = vmatmul.msk.bf16.gmra.mxu0 %vm1201_vm1, %v3603_v12  ;;  %v1063_v60 = vadd.f32 %v3437_v57, %v1031_v10 }
 0x1b1   : > { %2893 = vmatmul.msk.bf16.gmra.mxu1 %vm1201_vm1, %v3587_v50 }
 0x1b2   : > { %2913 = vmatmul.msk.bf16.gmra.mxu2 %vm1201_vm1, %v3575_v28  ;;  %v1091_v16 = vmax.f32 %v1063_v60, 0.0 }
 0x1b4   : > { %v1119_v18 = vpack.c.bf16 %v1091_v16, %v1091_v16 }
 0x1b5   : > { %v3650_v58 = vpop.f32.mrf.mxu3 }
 0x1b6   : > { %v1404_v20 = vunpack.c.l.b16 %v1119_v18 }
 0x1ba   : > { %2837 = vmatmul.msk.bf16.vlgmr.msrb.gmra.mxu3 %vm1201_vm1, %v3453_v24  ;;  %v1030_v24 = vadd.f32 %v999_v63, %v904_v2 }
 0x1bc   : > { %v1062_v11 = vadd.f32 %v3437_v57, %v1030_v24 }
 0x1bd   : > { %v3654_v62 = vpop.f32.mrf.mxu3 }
 0x1be   : > { %v1090_v6 = vmax.f32 %v1062_v11, 0.0  ;;  %v1430_v11 = vpop.f32.mrf.mxu0 }
 0x1c0   : > { %2870 = vmatmul.msk.bf16.gmra.mxu0 %vm1201_vm1, %v3619_v34  ;;  %v1118_v17 = vpack.c.bf16 %v1090_v6, %v1090_v6 }
 0x1c1   : > { %2894 = vmatmul.msk.bf16.gmra.mxu1 %vm1201_vm1, %v3603_v12 }
 0x1c2   : > { %2914 = vmatmul.msk.bf16.gmra.mxu2 %vm1201_vm1, %v3587_v50  ;;  %v1403_v19 = vunpack.c.l.b16 %v1118_v17 }
 0x1c4   : > { %v3680_v57 = vpack.c.b16 %v1404_v20, %v1403_v19  ;;  %v1625_v19 = vpop.f32.mrf.mxu2 }
 0x1c5   : > { %v3662_v5 = vpop.f32.mrf.mxu3 }
 0x1ca   : > { %2838 = vmatmul.msk.bf16.gmra.mxu3 %vm1201_vm1, %v3467_v51 }
 0x1cc   : > { %v1627_v44 = vpop.f32.mrf.mxu2 }
 0x1cd   : > { %v3668_v13 = vpop.f32.mrf.mxu3 }
 0x1d0   : > { %2871 = vmatmul.msk.bf16.gmra.mxu0 %vm1201_vm1, %v3638_v55 }
 0x1d1   : > { %2895 = vmatmul.msk.bf16.gmra.mxu1 %vm1201_vm1, %v3619_v34 }
 0x1d2   : > { %2915 = vmatmul.msk.bf16.gmra.mxu2 %vm1201_vm1, %v3603_v12 }
 0x1d5   : > { %v3676_v51 = vpop.f32.mrf.mxu3 }
 0x1da   : > { %2839 = vmatmul.msk.bf16.gmra.mxu3 %vm1201_vm1, %v3483_v14 }
 0x1dd   : > { %v3682_v21 = vpop.f32.mrf.mxu3 }
 0x1e0   : > { %2872 = vmatmul.msk.bf16.gmra.mxu0 %vm1201_vm1, %v3680_v57 }
 0x1e1   : > { %2896 = vmatmul.msk.bf16.gmra.mxu1 %vm1201_vm1, %v3638_v55 }
 0x1e2   : > { %2916 = vmatmul.msk.bf16.gmra.mxu2 %vm1201_vm1, %v3619_v34 }
 0x1e5   : > { %v3690_v22 = vpop.f32.mrf.mxu3 }
 0x1e6   : > { %4371 = vst [vmem:[#allocation8_spill] sm:$0xff] %v3690_v22 }
 0x1ea   : > { %2840 = vmatmul.msk.bf16.gmra.mxu3 %vm1201_vm1, %v3514_v47 }
 0x1ed   : > { %v3694_v23 = vpop.f32.mrf.mxu3 }
 0x1ee   : > { %4372 = vst [vmem:[#allocation9_spill] sm:$0xff] %v3694_v23 }
 0x1f5   : > { %v3696_v25 = vpop.f32.mrf.mxu3 }
 0x1f6   : > { %4373 = vst [vmem:[#allocation10_spill] sm:$0xff] %v3696_v25 }
 0x1fa   : > { %2841 = vmatmul.msk.bf16.gmra.mxu3 %vm1201_vm1, %v3524_v8 }
 0x1fd   : > { %v3703_v30 = vpop.f32.mrf.mxu3 }
 0x1fe   : > { %4374 = vst [vmem:[#allocation11_spill] sm:$0xff] %v3703_v30 }
 0x205   : > { %v3705_v31 = vpop.f32.mrf.mxu3 }
 0x206   : > { %4375 = vst [vmem:[#allocation12_spill] sm:$0xff] %v3705_v31 }
 0x20a   : > { %2842 = vmatmul.msk.bf16.gmra.mxu3 %vm1201_vm1, %v3536_v27 }
 0x20d   : > { %v3709_v32 = vpop.f32.mrf.mxu3 }
 0x20e   : > { %4376 = vst [vmem:[#allocation13_spill] sm:$0xff] %v3709_v32 }
 0x215   : > { %v3711_v35 = vpop.f32.mrf.mxu3 }
 0x216   : > { %4377 = vst [vmem:[#allocation14_spill] sm:$0xff] %v3711_v35 }
 0x21a   : > { %2843 = vmatmul.msk.bf16.gmra.mxu3 %vm1201_vm1, %v3551_v33 }
 0x21d   : > { %v3715_v36 = vpop.f32.mrf.mxu3 }
 0x21e   : > { %4378 = vst [vmem:[#allocation15_spill] sm:$0xff] %v3715_v36 }
 0x225   : > { %v3717_v37 = vpop.f32.mrf.mxu3 }
 0x226   : > { %4379 = vst [vmem:[#allocation16_spill] sm:$0xff] %v3717_v37 }
 0x22a   : > { %2844 = vmatmul.msk.bf16.gmra.mxu3 %vm1201_vm1, %v3563_v7 }
 0x22d   : > { %v3721_v38 = vpop.f32.mrf.mxu3 }
 0x22e   : > { %4380 = vst [vmem:[#allocation17_spill] sm:$0xff] %v3721_v38  ;;  %v1630_v38 = vpop.f32.mrf.mxu2 }
 0x235   : > { %v3723_v39 = vpop.f32.mrf.mxu3 }
 0x236   : > { %4381 = vst [vmem:[#allocation18_spill] sm:$0xff] %v3723_v39  ;;  %v1632_v35 = vpop.f32.mrf.mxu2 }
 0x23a   : > { %2845 = vmatmul.msk.bf16.gmra.mxu3 %vm1201_vm1, %v3575_v28 }
 0x23d   : > { %v1336_v40 = vpop.f32.mrf.mxu3 }
 0x23e   : > { %v1635_v32 = vpop.f32.mrf.mxu2  ;;  %v1337_v31 = vadd.f32 %v1336_v40, %v3592_v54 }
 0x245   : > { %v3727_v42 = vpop.f32.mrf.mxu3 }
 0x246   : > { %v3829_v30 = vpop.f32.mrf.mxu2  ;;  %v1339_v54 = vadd.f32 %v3727_v42, %v3601_v3 }
 0x24a   : > { %2846 = vmatmul.msk.bf16.gmra.mxu3 %vm1201_vm1, %v3587_v50 }
 0x24d   : > { %v3731_v43 = vpop.f32.mrf.mxu3 }
 0x24e   : > { %v3843_v23 = vpop.f32.mrf.mxu2 }
 0x255   : > { %v3736_v45 = vpop.f32.mrf.mxu3 }
 0x25a   : > { %2847 = vmatmul.msk.bf16.gmra.mxu3 %vm1201_vm1, %v3603_v12 }
 0x25d   : > { %v3746_v48 = vpop.f32.mrf.mxu3 }
 0x265   : > { %v3748_v53 = vpop.f32.mrf.mxu3 }
 0x26a   : > { %2848 = vmatmul.msk.bf16.gmra.mxu3 %vm1201_vm1, %v3619_v34 }
 0x26d   : > { %v3752_v59 = vpop.f32.mrf.mxu3 }
 0x275   : > { %v3754_v61 = vpop.f32.mrf.mxu3 }
 0x27a   : > { %2929 = vmatmul.msk.bf16.vlgmr.msra.gmra.mxu3 %vm1201_vm1, %v3483_v14  ;;  %v1546_v14 = vpop.f32.mrf.mxu1 }
 0x27d   : > { %v3758_v63 = vpop.f32.mrf.mxu3 }
 0x282   : > { %v1549_v60 = vpop.f32.mrf.mxu1 }
 0x283   : > { %v1631_v3 = vadd.f32 %v1630_v38, %v1549_v60 }
 0x285   : > { %v3760_v0 = vpop.f32.mrf.mxu3 }
 0x28a   : > { %2930 = vmatmul.msk.bf16.gmra.mxu3 %vm1201_vm1, %v3514_v47  ;;  %v3784_v16 = vpop.f32.mrf.mxu1 }
 0x28b   : > { %v1633_v38 = vadd.f32 %v1632_v35, %v3784_v16  ;;  %v1347_v35 = vadd.f32 %v3746_v48, %v3627_v41  ;;  %v1349_v48 = vadd.f32 %v3748_v53, %v3636_v52 }
 0x28d   : > { %v3764_v1 = vpop.f32.mrf.mxu3 }
 0x295   : > { %v3766_v2 = vpop.f32.mrf.mxu3 }
 0x29a   : > { %2931 = vmatmul.msk.bf16.gmra.mxu3 %vm1201_vm1, %v3524_v8  ;;  %v1432_v8 = vpop.f32.mrf.mxu0 }
 0x29d   : > { %v3770_v4 = vpop.f32.mrf.mxu3 }
 0x2a2   : > { %v1435_v18 = vpop.f32.mrf.mxu0 }
 0x2a5   : > { %v3772_v24 = vpop.f32.mrf.mxu3 }
 0x2a6   : > { %4382 = vst [vmem:[#allocation19_spill] sm:$0xff] %v3772_v24  ;;  %v1491_v24 = vadd.f32 %v1432_v8, %v1339_v54 }
 0x2aa   : > { %2932 = vmatmul.msk.bf16.gmra.mxu3 %vm1201_vm1, %v3536_v27  ;;  %v3790_v27 = vpop.f32.mrf.mxu1  ;;  %v3794_v26 = vpop.f32.mrf.mxu0 }
 0x2ad   : > { %v3776_v10 = vpop.f32.mrf.mxu3 }
 0x2ae   : > { %4383 = vst [vmem:[#allocation20_spill] sm:$0xff] %v3776_v10 }
 0x2b2   : > { %v3802_v49 = vpop.f32.mrf.mxu0 }
 0x2b5   : > { %v3778_v47 = vpop.f32.mrf.mxu3 }
 0x2b6   : > { %4384 = vst [vmem:[#allocation21_spill] sm:$0xff] %v3778_v47  ;;  %v1490_v47 = vadd.f32 %v1430_v11, %v1337_v31 }
 0x2ba   : > { %2933 = vmatmul.msk.bf16.gmra.mxu3 %vm1201_vm1, %v3551_v33  ;;  %v3796_v33 = vpop.f32.mrf.mxu1  ;;  %v3810_v36 = vpop.f32.mrf.mxu0 }
 0x2bd   : > { %v3782_v6 = vpop.f32.mrf.mxu3 }
 0x2be   : > { %4385 = vst [vmem:[#allocation22_spill] sm:$0xff] %v3782_v6  ;;  %v1626_v6 = vadd.f32 %v1625_v19, %v1544_v9 }
 0x2c5   : > { %v3786_v17 = vpop.f32.mrf.mxu3 }
 0x2c6   : > { %4386 = vst [vmem:[#allocation23_spill] sm:$0xff] %v3786_v17 }
 0x2ca   : > { %2934 = vmatmul.msk.bf16.gmra.mxu3 %vm1201_vm1, %v3563_v7  ;;  %v3806_v7 = vpop.f32.mrf.mxu1 }
 0x2cd   : > { %v3792_v20 = vpop.f32.mrf.mxu3 }
 0x2ce   : > { %4387 = vst [vmem:[#allocation24_spill] sm:$0xff] %v3792_v20 }
 0x2d2   : > { %v3812_v20 = vpop.f32.mrf.mxu1 }
 0x2d5   : > { %v3798_v46 = vpop.f32.mrf.mxu3 }
 0x2d6   : > { %4388 = vst [vmem:[#allocation25_spill] sm:$0xff] %v3798_v46 }
 0x2da   : > { %2935 = vmatmul.msk.bf16.gmra.mxu3 %vm1201_vm1, %v3575_v28  ;;  %v3818_v28 = vpop.f32.mrf.mxu0  ;;  %v3820_v17 = vpop.f32.mrf.mxu1 }
 0x2dd   : > { %v3804_v39 = vpop.f32.mrf.mxu3 }
 0x2de   : > { %4389 = vst [vmem:[#allocation26_spill] sm:$0xff] %v3804_v39 }
 0x2e5   : > { %v3808_v37 = vpop.f32.mrf.mxu3 }
 0x2e6   : > { %4390 = vst [vmem:[#allocation27_spill] sm:$0xff] %v3808_v37  ;;  %v3827_v37 = vpop.f32.mrf.mxu0 }
 0x2ea   : > { %2936 = vmatmul.msk.bf16.gmra.mxu3 %vm1201_vm1, %v3587_v50  ;;  %v3831_v50 = vpop.f32.mrf.mxu1 }
 0x2ed   : > { %v3816_v46 = vpop.f32.mrf.mxu3 }
 0x2ee   : > { %4391 = vst [vmem:[#allocation28_spill] sm:$0xff] %v3816_v46  ;;  %v3841_v9 = vpop.f32.mrf.mxu0 }
 0x2f2   : > { %v3845_v11 = vpop.f32.mrf.mxu1 }
 0x2f5   : > { %v3822_v39 = vpop.f32.mrf.mxu3 }
 0x2f6   : > { %4392 = vst [vmem:[#allocation29_spill] sm:$0xff] %v3822_v39  ;;  %v3836_v39 = vld [vmem:[%s4360_s5] ss:$0 sm:$0xff]  ;;  %v3852_v54 = vpop.f32.mrf.mxu0 }
 0x2fa   : > { %2937 = vmatmul.msk.bf16.gmra.mxu3 %vm1201_vm1, %v3603_v12  ;;  %v1628_v12 = vadd.f32 %v1627_v44, %v1546_v14 }
 0x2fd   : > { %v1711_v46 = vpop.f32.mrf.mxu3 }
 0x2fe   : > { %v1771_v25 = vadd.f32 %v1711_v46, %v1626_v6  ;;  %v1342_v6 = vadd.f32 %v3731_v43, %v3608_v15  ;;  %v3856_v15 = vpop.f32.mrf.mxu1  ;;  %v1344_v43 = vadd.f32 %v3736_v45, %v3617_v29  ;;  %v3870_v29 = vpop.f32.mrf.mxu0 }
 0x300   : > { %v1795_v10 = vmax.f32 %v1490_v47, %v1771_v25  ;;  %v1492_v44 = vadd.f32 %v1435_v18, %v1342_v6  ;;  %v3072_v6 = vld [vmem:[%s4362_s7 + $0x10] sm:$0xff] }
 0x301   : > { %2365 = vmatpush.bf16.msrb.mxu2 %v3072_v6 }
 0x302   : > { %v1823_v40 = vadd.f32 %v3836_v39, %v1795_v10 }
 0x304   : > { %v1847_v25 = vmax.f32 %v1823_v40, 0.0 }
 0x305   : > { %v1713_v19 = vpop.f32.mrf.mxu3 }
 0x306   : > { %v1772_v31 = vadd.f32 %v1713_v19, %v1628_v12  ;;  %v1871_v42 = vpack.c.bf16 %v1847_v25, %v1847_v25  ;;  %v3854_v12 = vpop.f32.mrf.mxu2 }
 0x308   : > { %v1796_v47 = vmax.f32 %v1491_v24, %v1772_v31  ;;  %v2047_v24 = vunpack.c.l.b16 %v1871_v42  ;;  %v1493_v31 = vadd.f32 %v3794_v26, %v1344_v43  ;;  %v3879_v26 = vpop.f32.mrf.mxu1 }
 0x30a   : > { %v1824_v46 = vadd.f32 %v3836_v39, %v1796_v47  ;;  %2938 = vmatmul.msk.bf16.gmra.mxu3 %vm1201_vm1, %v3619_v34 }
 0x30c   : > { %v1848_v14 = vmax.f32 %v1824_v46, 0.0  ;;  %v1636_v46 = vadd.f32 %v1635_v32, %v3790_v27  ;;  %v3070_v32 = vld [vmem:[%s4362_s7] sm:$0xff]  ;;  %v3893_v27 = vpop.f32.mrf.mxu0 }
 0x30d   : > { %v1716_v10 = vpop.f32.mrf.mxu3  ;;  %2297 = vmatpush.bf16.msrb.mxu1 %v3070_v32 }
 0x30e   : > { %v1872_v22 = vpack.c.bf16 %v1848_v14, %v1848_v14  ;;  %v1773_v8 = vadd.f32 %v1716_v10, %v1631_v3  ;;  %v3872_v45 = vpop.f32.mrf.mxu2  ;;  %v1494_v10 = vadd.f32 %v3802_v49, %v1347_v35  ;;  %v1638_v49 = vadd.f32 %v3829_v30, %v3796_v33 }
 0x30f   : > { %v1352_v30 = vadd.f32 %v3752_v59, %v3642_v56 }
 0x310   : > { %v2048_v40 = vunpack.c.l.b16 %v1872_v22  ;;  %v1797_v19 = vmax.f32 %v1492_v44, %v1773_v8  ;;  %v3902_v52 = vpop.f32.mrf.mxu1 }
 0x312   : > { %v3860_v34 = vpack.c.b16 %v2048_v40, %v2047_v24  ;;  %v1825_v60 = vadd.f32 %v3836_v39, %v1797_v19 }
 0x314   : > { %2961 = vmatmul.msk.bf16.vlgmr.msra.gmra.mxu1 %vm693_vm0, %v3860_v34  ;;  %v1849_v22 = vmax.f32 %v1825_v60, 0.0  ;;  %v1495_v60 = vadd.f32 %v3810_v36, %v1349_v48  ;;  %v3912_v35 = vpop.f32.mrf.mxu0 }
 0x315   : > { %v1718_v18 = vpop.f32.mrf.mxu3 }
 0x316   : > { %v1774_v25 = vadd.f32 %v1718_v18, %v1633_v38  ;;  %v1873_v3 = vpack.c.bf16 %v1849_v22, %v1849_v22  ;;  %v1647_v43 = vpop.f32.mrf.mxu2  ;;  %v1641_v22 = vadd.f32 %v3843_v23, %v3806_v7  ;;  %v1643_v23 = vadd.f32 %v3854_v12, %v3812_v20 }
 0x318   : > { %v1798_v47 = vmax.f32 %v1493_v31, %v1774_v25  ;;  %v1920_v24 = vunpack.c.l.b16 %v1873_v3 }
 0x31a   : > { %v1826_v16 = vadd.f32 %v3836_v39, %v1798_v47  ;;  %2939 = vmatmul.msk.bf16.gmra.mxu3 %vm1201_vm1, %v3638_v55  ;;  %v3071_v55 = vld [vmem:[%s4362_s7 + $0x8] sm:$0xff] }
 0x31b   : > { %2232 = vmatpush.bf16.msrb.mxu0 %v3071_v55  ;;  %v1646_v55 = vadd.f32 %v3872_v45, %v3820_v17  ;;  %v1648_v17 = vadd.f32 %v1647_v43, %v3831_v50  ;;  %v1362_v50 = vadd.f32 %v3764_v1, %v3668_v13  ;;  %v1364_v13 = vadd.f32 %v3766_v2, %v3676_v51 }
 0x31c   : > { %v1850_v42 = vmax.f32 %v1826_v16, 0.0 }
 0x31d   : > { %v1721_v14 = vpop.f32.mrf.mxu3  ;;  %v1501_v51 = vadd.f32 %v3893_v27, %v1364_v13 }
 0x31e   : > { %v1874_v44 = vpack.c.bf16 %v1850_v42, %v1850_v42  ;;  %v1775_v8 = vadd.f32 %v1721_v14, %v1636_v46  ;;  %v1650_v36 = vpop.f32.mrf.mxu2  ;;  %v1496_v46 = vadd.f32 %v3818_v28, %v1352_v30  ;;  %v3915_v14 = vpop.f32.mrf.mxu1 }
 0x320   : > { %v1921_v40 = vunpack.c.l.b16 %v1874_v44  ;;  %v1799_v41 = vmax.f32 %v1494_v10, %v1775_v8 }
 0x322   : > { %v3885_v19 = vpack.c.b16 %v1921_v40, %v1920_v24  ;;  %v1827_v38 = vadd.f32 %v3836_v39, %v1799_v41  ;;  %v1357_v41 = vadd.f32 %v3758_v63, %v3654_v62  ;;  %v1359_v62 = vadd.f32 %v3760_v0, %v3662_v5 }
 0x324   : > { %2947 = vmatmul.msk.bf16.vlgmr.msra.gmra.mxu0 %vm693_vm0, %v3885_v19  ;;  %2962 = vmatmul.msk.bf16.gmra.mxu1 %vm693_vm0, %v3885_v19  ;;  %v1851_v31 = vmax.f32 %v1827_v38, 0.0  ;;  %v1499_v5 = vadd.f32 %v3852_v54, %v1359_v62  ;;  %v1500_v54 = vadd.f32 %v3870_v29, %v1362_v50 }
 0x325   : > { %v1723_v53 = vpop.f32.mrf.mxu3 }
 0x326   : > { %v1776_v18 = vadd.f32 %v1723_v53, %v1638_v49  ;;  %v1875_v47 = vpack.c.bf16 %v1851_v31, %v1851_v31  ;;  %v1652_v24 = vpop.f32.mrf.mxu2  ;;  %v3933_v12 = vpop.f32.mrf.mxu1 }
 0x328   : > { %v1800_v25 = vmax.f32 %v1495_v60, %v1776_v18  ;;  %v1922_v56 = vunpack.c.l.b16 %v1875_v47 }
 0x32a   : > { %v1828_v33 = vadd.f32 %v3836_v39, %v1800_v25  ;;  %2940 = vmatmul.msk.bf16.gmra.mxu3 %vm1201_vm1, %v3680_v57  ;;  %v1354_v57 = vadd.f32 %v3754_v61, %v3650_v58  ;;  %v3931_v61 = vpop.f32.mrf.mxu0 }
 0x32c   : > { %v1852_v6 = vmax.f32 %v1828_v33, 0.0  ;;  %v1497_v8 = vadd.f32 %v3827_v37, %v1354_v57  ;;  %v1498_v37 = vadd.f32 %v3841_v9, %v1357_v41  ;;  %v1367_v41 = vadd.f32 %v3770_v4, %v3682_v21  ;;  %v4393_v21 = vld [vmem:[#allocation8_spill] sm:$0xff]  ;;  %v4394_v4 = vld [vmem:[#allocation19_spill] sm:$0xff] }
 0x32d   : > { %v1726_v16 = vpop.f32.mrf.mxu3 }
 0x32e   : > { %v1876_v3 = vpack.c.bf16 %v1852_v6, %v1852_v6  ;;  %v1777_v42 = vadd.f32 %v1726_v16, %v1641_v22  ;;  %v1655_v33 = vpop.f32.mrf.mxu2  ;;  %v3947_v22 = vpop.f32.mrf.mxu1 }
 0x330   : > { %v1923_v59 = vunpack.c.l.b16 %v1876_v3  ;;  %v1801_v10 = vmax.f32 %v1496_v46, %v1777_v42  ;;  %v1651_v46 = vadd.f32 %v1650_v36, %v3845_v11  ;;  %v1653_v11 = vadd.f32 %v1652_v24, %v3856_v15 }
 0x332   : > { %v3919_v44 = vpack.c.b16 %v1923_v59, %v1922_v56  ;;  %v1829_v7 = vadd.f32 %v3836_v39, %v1801_v10  ;;  %v3941_v30 = vpop.f32.mrf.mxu0 }
 0x334   : > { %2948 = vmatmul.msk.bf16.gmra.mxu0 %vm693_vm0, %v3919_v44  ;;  %2963 = vmatmul.msk.bf16.gmra.mxu1 %vm693_vm0, %v3919_v44  ;;  %v1853_v40 = vmax.f32 %v1829_v7, 0.0 }
 0x335   : > { %2977 = vmatmul.msk.bf16.vlgmr.msra.gmra.mxu2 %vm693_vm0, %v3919_v44  ;;  %v1728_v28 = vpop.f32.mrf.mxu3 }
 0x336   : > { %v1778_v58 = vadd.f32 %v1728_v28, %v1643_v23  ;;  %v1877_v32 = vpack.c.bf16 %v1853_v40, %v1853_v40  ;;  %v1657_v3 = vpop.f32.mrf.mxu2  ;;  %v3964_v59 = vpop.f32.mrf.mxu1 }
 0x338   : > { %v1802_v20 = vmax.f32 %v1497_v8, %v1778_v58  ;;  %v1924_v18 = vunpack.c.l.b16 %v1877_v32 }
 0x33a   : > { %v1830_v48 = vadd.f32 %v3836_v39, %v1802_v20  ;;  %v3961_v16 = vpop.f32.mrf.mxu0 }
 0x33c   : > { %v1854_v49 = vmax.f32 %v1830_v48, 0.0 }
 0x33d   : > { %v1731_v38 = vpop.f32.mrf.mxu3 }
 0x33e   : > { %v1878_v53 = vpack.c.bf16 %v1854_v49, %v1854_v49  ;;  %v1779_v60 = vadd.f32 %v1731_v38, %v1646_v55  ;;  %v1660_v40 = vpop.f32.mrf.mxu2  ;;  %v3982_v20 = vpop.f32.mrf.mxu1  ;;  %v1656_v55 = vadd.f32 %v1655_v33, %v3879_v26  ;;  %v1658_v26 = vadd.f32 %v1657_v3, %v3902_v52 }
 0x340   : > { %v1925_v31 = vunpack.c.l.b16 %v1878_v53  ;;  %v1803_v25 = vmax.f32 %v1498_v37, %v1779_v60  ;;  %v1502_v37 = vadd.f32 %v3912_v35, %v1367_v41 }
 0x342   : > { %v3945_v63 = vpack.c.b16 %v1925_v31, %v1924_v18  ;;  %v1831_v45 = vadd.f32 %v3836_v39, %v1803_v25  ;;  %v3977_v29 = vpop.f32.mrf.mxu0 }
 0x344   : > { %2949 = vmatmul.msk.bf16.gmra.mxu0 %vm693_vm0, %v3945_v63  ;;  %2964 = vmatmul.msk.bf16.gmra.mxu1 %vm693_vm0, %v3945_v63  ;;  %v1855_v47 = vmax.f32 %v1831_v45, 0.0  ;;  %v1369_v45 = vadd.f32 %v4394_v4, %v4393_v21 }
 0x345   : > { %2978 = vmatmul.msk.bf16.gmra.mxu2 %vm693_vm0, %v3945_v63  ;;  %v1733_v9 = vpop.f32.mrf.mxu3 }
 0x346   : > { %v1780_v0 = vadd.f32 %v1733_v9, %v1648_v17  ;;  %v1879_v42 = vpack.c.bf16 %v1855_v47, %v1855_v47  ;;  %v1662_v18 = vpop.f32.mrf.mxu2  ;;  %v3991_v17 = vpop.f32.mrf.mxu1 }
 0x348   : > { %v1804_v6 = vmax.f32 %v1499_v5, %v1780_v0  ;;  %v1926_v7 = vunpack.c.l.b16 %v1879_v42  ;;  %v1503_v5 = vadd.f32 %v3931_v61, %v1369_v45 }
 0x34a   : > { %v1832_v43 = vadd.f32 %v3836_v39, %v1804_v6  ;;  %v3989_v27 = vpop.f32.mrf.mxu0 }
 0x34c   : > { %v1856_v56 = vmax.f32 %v1832_v43, 0.0  ;;  %v4395_v43 = vld [vmem:[#allocation9_spill] sm:$0xff] }
 0x34d   : > { %v1736_v10 = vpop.f32.mrf.mxu3 }
 0x34e   : > { %v1880_v57 = vpack.c.bf16 %v1856_v56, %v1856_v56  ;;  %v1781_v23 = vadd.f32 %v1736_v10, %v1651_v46  ;;  %v1665_v52 = vpop.f32.mrf.mxu2  ;;  %v4396_v46 = vld [vmem:[#allocation20_spill] sm:$0xff]  ;;  %v4011_v56 = vpop.f32.mrf.mxu1  ;;  %v1661_v10 = vadd.f32 %v1660_v40, %v3915_v14 }
 0x34f   : > { %v1372_v3 = vadd.f32 %v4396_v46, %v4395_v43 }
 0x350   : > { %v1927_v28 = vunpack.c.l.b16 %v1880_v57  ;;  %v1805_v8 = vmax.f32 %v1500_v54, %v1781_v23 }
 0x351   : > { %v1504_v61 = vadd.f32 %v3941_v30, %v1372_v3 }
 0x352   : > { %v3969_v1 = vpack.c.b16 %v1927_v28, %v1926_v7  ;;  %v1833_v36 = vadd.f32 %v3836_v39, %v1805_v8  ;;  %v4006_v50 = vpop.f32.mrf.mxu0 }
 0x354   : > { %2950 = vmatmul.msk.bf16.gmra.mxu0 %vm693_vm0, %v3969_v1  ;;  %2965 = vmatmul.msk.bf16.gmra.mxu1 %vm693_vm0, %v3969_v1  ;;  %v1857_v15 = vmax.f32 %v1833_v36, 0.0  ;;  %v4397_v36 = vld [vmem:[#allocation10_spill] sm:$0xff] }
 0x355   : > { %2979 = vmatmul.msk.bf16.gmra.mxu2 %vm693_vm0, %v3969_v1  ;;  %v1738_v58 = vpop.f32.mrf.mxu3 }
 0x356   : > { %v1782_v2 = vadd.f32 %v1738_v58, %v1653_v11  ;;  %v1881_v32 = vpack.c.bf16 %v1857_v15, %v1857_v15  ;;  %v4398_v58 = vld [vmem:[#allocation21_spill] sm:$0xff]  ;;  %v1667_v14 = vpop.f32.mrf.mxu2  ;;  %v4027_v30 = vpop.f32.mrf.mxu1 }
 0x358   : > { %v1806_v24 = vmax.f32 %v1501_v51, %v1782_v2  ;;  %v1928_v31 = vunpack.c.l.b16 %v1881_v32  ;;  %v1374_v51 = vadd.f32 %v4398_v58, %v4397_v36 }
 0x35a   : > { %v1834_v48 = vadd.f32 %v3836_v39, %v1806_v24  ;;  %v4019_v15 = vpop.f32.mrf.mxu0  ;;  %v1663_v24 = vadd.f32 %v1662_v18, %v3933_v12 }
 0x35c   : > { %v1858_v49 = vmax.f32 %v1834_v48, 0.0  ;;  %v1505_v48 = vadd.f32 %v3961_v16, %v1374_v51 }
 0x35d   : > { %v1741_v38 = vpop.f32.mrf.mxu3 }
 0x35e   : > { %v1882_v53 = vpack.c.bf16 %v1858_v49, %v1858_v49  ;;  %v1783_v60 = vadd.f32 %v1741_v38, %v1656_v55  ;;  %v4399_v49 = vld [vmem:[#allocation11_spill] sm:$0xff]  ;;  %v4400_v38 = vld [vmem:[#allocation22_spill] sm:$0xff]  ;;  %v1670_v21 = vpop.f32.mrf.mxu2 }
 0x360   : > { %v1929_v25 = vunpack.c.l.b16 %v1882_v53  ;;  %v1807_v62 = vmax.f32 %v1502_v37, %v1783_v60  ;;  %v1377_v37 = vadd.f32 %v4400_v38, %v4399_v49  ;;  %v1666_v60 = vadd.f32 %v1665_v52, %v3947_v22  ;;  %v4406_v49 = vld [vmem:[#allocation25_spill] sm:$0xff] }
 0x361   : > { %v1668_v22 = vadd.f32 %v1667_v14, %v3964_v59 }
 0x362   : > { %v3995_v9 = vpack.c.b16 %v1929_v25, %v1928_v31  ;;  %v1835_v33 = vadd.f32 %v3836_v39, %v1807_v62  ;;  %v4036_v25 = vpop.f32.mrf.mxu0  ;;  %v1506_v4 = vadd.f32 %v3977_v29, %v1377_v37 }
 0x364   : > { %2951 = vmatmul.msk.bf16.gmra.mxu0 %vm693_vm0, %v3995_v9  ;;  %2966 = vmatmul.msk.bf16.gmra.mxu1 %vm693_vm0, %v3995_v9  ;;  %v1859_v47 = vmax.f32 %v1835_v33, 0.0 }
 0x365   : > { %2980 = vmatmul.msk.bf16.gmra.mxu2 %vm693_vm0, %v3995_v9  ;;  %v1743_v35 = vpop.f32.mrf.mxu3 }
 0x366   : > { %v1784_v0 = vadd.f32 %v1743_v35, %v1658_v26  ;;  %v1883_v54 = vpack.c.bf16 %v1859_v47, %v1859_v47  ;;  %v4039_v26 = vpop.f32.mrf.mxu1  ;;  %v4402_v47 = vld [vmem:[#allocation23_spill] sm:$0xff] }
 0x368   : > { %v1808_v6 = vmax.f32 %v1503_v5, %v1784_v0  ;;  %v1930_v8 = vunpack.c.l.b16 %v1883_v54  ;;  %v4401_v0 = vld [vmem:[#allocation12_spill] sm:$0xff] }
 0x36a   : > { %v1836_v42 = vadd.f32 %v3836_v39, %v1808_v6  ;;  %v1379_v6 = vadd.f32 %v4402_v47, %v4401_v0 }
 0x36c   : > { %v1860_v57 = vmax.f32 %v1836_v42, 0.0  ;;  %v1507_v46 = vadd.f32 %v3989_v27, %v1379_v6  ;;  %v1482_v42 = vpop.f32.mrf.mxu0 }
 0x36d   : > { %v1746_v23 = vpop.f32.mrf.mxu3 }
 0x36e   : > { %v1884_v7 = vpack.c.bf16 %v1860_v57, %v1860_v57  ;;  %v1785_v28 = vadd.f32 %v1746_v23, %v1661_v10  ;;  %v1672_v10 = vpop.f32.mrf.mxu2  ;;  %v4054_v59 = vpop.f32.mrf.mxu1  ;;  %v4403_v23 = vld [vmem:[#allocation13_spill] sm:$0xff] }
 0x370   : > { %v1931_v13 = vunpack.c.l.b16 %v1884_v7  ;;  %v1809_v11 = vmax.f32 %v1504_v61, %v1785_v28  ;;  %v4404_v61 = vld [vmem:[#allocation24_spill] sm:$0xff] }
 0x371   : > { %v1382_v7 = vadd.f32 %v4404_v61, %v4403_v23  ;;  %v4410_v23 = vld [vmem:[#allocation27_spill] sm:$0xff] }
 0x372   : > { %v4017_v2 = vpack.c.b16 %v1931_v13, %v1930_v8  ;;  %v1837_v40 = vadd.f32 %v3836_v39, %v1809_v11  ;;  %v1671_v8 = vadd.f32 %v1670_v21, %v3982_v20 }
 0x373   : > { %v1508_v58 = vadd.f32 %v4006_v50, %v1382_v7  ;;  %v1673_v50 = vadd.f32 %v1672_v10, %v3991_v17  ;;  %v4407_v17 = vld [vmem:[#allocation15_spill] sm:$0xff] }
 0x374   : > { %2952 = vmatmul.msk.bf16.gmra.mxu0 %vm693_vm0, %v4017_v2  ;;  %2967 = vmatmul.msk.bf16.gmra.mxu1 %vm693_vm0, %v4017_v2  ;;  %v1861_v32 = vmax.f32 %v1837_v40, 0.0 }
 0x375   : > { %2981 = vmatmul.msk.bf16.gmra.mxu2 %vm693_vm0, %v4017_v2  ;;  %v1748_v41 = vpop.f32.mrf.mxu3 }
 0x376   : > { %v1786_v55 = vadd.f32 %v1748_v41, %v1663_v24  ;;  %v1885_v18 = vpack.c.bf16 %v1861_v32, %v1861_v32  ;;  %v1485_v24 = vpop.f32.mrf.mxu0  ;;  %v1675_v32 = vpop.f32.mrf.mxu2 }
 0x378   : > { %v1810_v12 = vmax.f32 %v1505_v48, %v1786_v55  ;;  %v1932_v33 = vunpack.c.l.b16 %v1885_v18  ;;  %v3073_v48 = vld [vmem:[%s4364_s9] sm:$0xff] }
 0x379   : > { %2560 = vmatpush.bf16.msrb.mxu3 %v3073_v48 }
 0x37a   : > { %v1838_v53 = vadd.f32 %v3836_v39, %v1810_v12  ;;  %v4405_v12 = vld [vmem:[#allocation14_spill] sm:$0xff] }
 0x37b   : > { %v1384_v20 = vadd.f32 %v4406_v49, %v4405_v12 }
 0x37c   : > { %v1862_v31 = vmax.f32 %v1838_v53, 0.0 }
 0x37d   : > { %v1751_v62 = vpop.f32.mrf.mxu3 }
 0x37e   : > { %v1886_v45 = vpack.c.bf16 %v1862_v31, %v1862_v31  ;;  %v1787_v16 = vadd.f32 %v1751_v62, %v1666_v60  ;;  %v1509_v60 = vadd.f32 %v4019_v15, %v1384_v20  ;;  %v1487_v21 = vpop.f32.mrf.mxu0 }
 0x380   : > { %v1933_v35 = vunpack.c.l.b16 %v1886_v45  ;;  %v1811_v5 = vmax.f32 %v1506_v4, %v1787_v16  ;;  %v4408_v45 = vld [vmem:[#allocation26_spill] sm:$0xff] }
 0x381   : > { %v1387_v16 = vadd.f32 %v4408_v45, %v4407_v17  ;;  %v4413_v45 = vld [vmem:[#allocation18_spill] sm:$0xff] }
 0x382   : > { %v4043_v43 = vpack.c.b16 %v1933_v35, %v1932_v33  ;;  %v1839_v52 = vadd.f32 %v3836_v39, %v1811_v5  ;;  %v1676_v35 = vadd.f32 %v1675_v32, %v4011_v56  ;;  %v1677_v5 = vpop.f32.mrf.mxu2 }
 0x383   : > { %v1678_v56 = vadd.f32 %v1677_v5, %v4027_v30  ;;  %v4411_v30 = vld [vmem:[#allocation17_spill] sm:$0xff] }
 0x384   : > { %2953 = vmatmul.msk.bf16.gmra.mxu0 %vm693_vm0, %v4043_v43  ;;  %2968 = vmatmul.msk.bf16.gmra.mxu1 %vm693_vm0, %v4043_v43  ;;  %v1863_v54 = vmax.f32 %v1839_v52, 0.0 }
 0x385   : > { %2982 = vmatmul.msk.bf16.gmra.mxu2 %vm693_vm0, %v4043_v43  ;;  %v1753_v29 = vpop.f32.mrf.mxu3 }
 0x386   : > { %v1788_v3 = vadd.f32 %v1753_v29, %v1668_v22  ;;  %v1887_v13 = vpack.c.bf16 %v1863_v54, %v1863_v54  ;;  %v1510_v22 = vadd.f32 %v4036_v25, %v1387_v16  ;;  %v4414_v16 = vld [vmem:[#allocation29_spill] sm:$0xff] }
 0x388   : > { %v1812_v57 = vmax.f32 %v1507_v46, %v1788_v3  ;;  %v1934_v14 = vunpack.c.l.b16 %v1887_v13 }
 0x38a   : > { %v1840_v28 = vadd.f32 %v3836_v39, %v1812_v57  ;;  %v4409_v57 = vld [vmem:[#allocation16_spill] sm:$0xff]  ;;  %v1680_v13 = vpop.f32.mrf.mxu2 }
 0x38b   : > { %v1389_v61 = vadd.f32 %v4410_v23, %v4409_v57  ;;  %v1681_v32 = vadd.f32 %v1680_v13, %v4039_v26 }
 0x38c   : > { %v1864_v11 = vmax.f32 %v1840_v28, 0.0 }
 0x38d   : > { %v1756_v36 = vpop.f32.mrf.mxu3 }
 0x38e   : > { %v1888_v27 = vpack.c.bf16 %v1864_v11, %v1864_v11  ;;  %v1789_v51 = vadd.f32 %v1756_v36, %v1671_v8  ;;  %v1511_v11 = vadd.f32 %v1482_v42, %v1389_v61 }
 0x390   : > { %v1935_v40 = vunpack.c.l.b16 %v1888_v27  ;;  %v1813_v41 = vmax.f32 %v1508_v58, %v1789_v51 }
 0x391   : > { %v2068_v55 = vpop.f32.mrf.mxu1 }
 0x392   : > { %v4066_v38 = vpack.c.b16 %v1935_v40, %v1934_v14  ;;  %v1841_v37 = vadd.f32 %v3836_v39, %v1813_v41  ;;  %v4412_v40 = vld [vmem:[#allocation28_spill] sm:$0xff]  ;;  %v1682_v42 = vpop.f32.mrf.mxu2 }
 0x393   : > { %v1392_v41 = vadd.f32 %v4412_v40, %v4411_v30  ;;  %v1683_v26 = vadd.f32 %v1682_v42, %v4054_v59 }
 0x394   : > { %2954 = vmatmul.msk.bf16.gmra.mxu0 %vm693_vm0, %v4066_v38  ;;  %2969 = vmatmul.msk.bf16.gmra.mxu1 %vm693_vm0, %v4066_v38  ;;  %v1865_v31 = vmax.f32 %v1841_v37, 0.0 }
 0x395   : > { %2983 = vmatmul.msk.bf16.gmra.mxu2 %vm693_vm0, %v4066_v38  ;;  %v1758_v53 = vpop.f32.mrf.mxu3 }
 0x396   : > { %v1790_v18 = vadd.f32 %v1758_v53, %v1673_v50  ;;  %v1889_v0 = vpack.c.bf16 %v1865_v31, %v1865_v31  ;;  %v1512_v50 = vadd.f32 %v1485_v24, %v1392_v41 }
 0x398   : > { %v1814_v62 = vmax.f32 %v1509_v60, %v1790_v18  ;;  %v1936_v29 = vunpack.c.l.b16 %v1889_v0 }
 0x399   : > { %v2070_v4 = vpop.f32.mrf.mxu1 }
 0x39a   : > { %v1842_v33 = vadd.f32 %v3836_v39, %v1814_v62 }
 0x39c   : > { %v1866_v47 = vmax.f32 %v1842_v33, 0.0  ;;  %v1394_v33 = vadd.f32 %v4414_v16, %v4413_v45 }
 0x39d   : > { %v1761_v6 = vpop.f32.mrf.mxu3 }
 0x39e   : > { %v1890_v52 = vpack.c.bf16 %v1866_v47, %v1866_v47  ;;  %v1791_v15 = vadd.f32 %v1761_v6, %v1676_v35  ;;  %v1513_v0 = vadd.f32 %v1487_v21, %v1394_v33 }
 0x3a0   : > { %v1937_v46 = vunpack.c.l.b16 %v1890_v52  ;;  %v1815_v3 = vmax.f32 %v1510_v22, %v1791_v15 }
 0x3a1   : > { %v1995_v10 = vpop.f32.mrf.mxu0  ;;  %v2073_v54 = vpop.f32.mrf.mxu1 }
 0x3a2   : > { %v4084_v7 = vpack.c.b16 %v1937_v46, %v1936_v29  ;;  %v2069_v28 = vadd.f32 %v2068_v55, %v1995_v10  ;;  %v1843_v8 = vadd.f32 %v3836_v39, %v1815_v3 }
 0x3a4   : > { %2955 = vmatmul.msk.bf16.gmra.mxu0 %vm693_vm0, %v4084_v7  ;;  %2970 = vmatmul.msk.bf16.gmra.mxu1 %vm693_vm0, %v4084_v7  ;;  %v1867_v58 = vmax.f32 %v1843_v8, 0.0 }
 0x3a5   : > { %2984 = vmatmul.msk.bf16.gmra.mxu2 %vm693_vm0, %v4084_v7  ;;  %v1763_v25 = vpop.f32.mrf.mxu3 }
 0x3a6   : > { %v1792_v36 = vadd.f32 %v1763_v25, %v1678_v56  ;;  %v1891_v12 = vpack.c.bf16 %v1867_v58, %v1867_v58 }
 0x3a8   : > { %v1816_v27 = vmax.f32 %v1511_v11, %v1792_v36  ;;  %v1938_v60 = vunpack.c.l.b16 %v1891_v12 }
 0x3a9   : > { %v1997_v51 = vpop.f32.mrf.mxu0  ;;  %v2075_v14 = vpop.f32.mrf.mxu1 }
 0x3aa   : > { %v1844_v48 = vadd.f32 %v3836_v39, %v1816_v27  ;;  %v2071_v55 = vadd.f32 %v2070_v4, %v1997_v51 }
 0x3ac   : > { %v1868_v49 = vmax.f32 %v1844_v48, 0.0 }
 0x3ad   : > { %v1766_v20 = vpop.f32.mrf.mxu3 }
 0x3ae   : > { %v1892_v37 = vpack.c.bf16 %v1868_v49, %v1868_v49  ;;  %v1793_v53 = vadd.f32 %v1766_v20, %v1681_v32 }
 0x3b0   : > { %v1939_v18 = vunpack.c.l.b16 %v1892_v37  ;;  %v1817_v31 = vmax.f32 %v1512_v50, %v1793_v53 }
 0x3b1   : > { %v2000_v62 = vpop.f32.mrf.mxu0  ;;  %v2078_v17 = vpop.f32.mrf.mxu1 }
 0x3b2   : > { %v2074_v35 = vadd.f32 %v2073_v54, %v2000_v62  ;;  %v4100_v5 = vpack.c.b16 %v1939_v18, %v1938_v60  ;;  %v1845_v4 = vadd.f32 %v3836_v39, %v1817_v31 }
 0x3b4   : > { %2956 = vmatmul.msk.bf16.gmra.mxu0 %vm693_vm0, %v4100_v5  ;;  %3007 = vmatmul.msk.bf16.vlgmr.msrb.gmra.mxu1 %vm693_vm0, %v3860_v34  ;;  %v1869_v6 = vmax.f32 %v1845_v4, 0.0 }
 0x3b5   : > { %2985 = vmatmul.msk.bf16.gmra.mxu2 %vm693_vm0, %v4100_v5  ;;  %v1768_v24 = vpop.f32.mrf.mxu3 }
 0x3b6   : > { %v1794_v47 = vadd.f32 %v1768_v24, %v1683_v26  ;;  %v1893_v10 = vpack.c.bf16 %v1869_v6, %v1869_v6 }
 0x3b8   : > { %v1818_v22 = vmax.f32 %v1513_v0, %v1794_v47  ;;  %v2144_v52 = vpop.f32.mrf.mxu2  ;;  %v2123_v34 = vunpack.c.l.b16 %v1893_v10 }
 0x3b9   : > { %v4110_v15 = vadd.f32 %v2144_v52, %v2069_v28  ;;  %v2002_v59 = vpop.f32.mrf.mxu0  ;;  %v2080_v29 = vpop.f32.mrf.mxu1 }
 0x3ba   : > { %v1846_v46 = vadd.f32 %v3836_v39, %v1818_v22  ;;  %v2076_v3 = vadd.f32 %v2075_v14, %v2002_v59 }
 0x3bc   : > { %v1870_v54 = vmax.f32 %v1846_v46, 0.0 }
 0x3be   : > { %v1894_v57 = vpack.c.bf16 %v1870_v54, %v1870_v54 }
 0x3c0   : > { %v2124_v23 = vunpack.c.l.b16 %v1894_v57  ;;  %v2146_v61 = vpop.f32.mrf.mxu2 }
 0x3c1   : > { %v4113_v56 = vadd.f32 %v2146_v61, %v2071_v55  ;;  %v2005_v21 = vpop.f32.mrf.mxu0  ;;  %v2083_v8 = vpop.f32.mrf.mxu1 }
 0x3c2   : > { %v2079_v25 = vadd.f32 %v2078_v17, %v2005_v21  ;;  %v4115_v13 = vpack.c.b16 %v2124_v23, %v2123_v34 }
 0x3c4   : > { %2993 = vmatmul.msk.bf16.vlgmr.msrb.gmra.mxu0 %vm693_vm0, %v3885_v19  ;;  %3008 = vmatmul.msk.bf16.gmra.mxu1 %vm693_vm0, %v3885_v19 }
 0x3c5   : > { %2986 = vmatmul.msk.bf16.gmra.mxu2 %vm693_vm0, %v4115_v13 }
 0x3c8   : > { %v2149_v39 = vpop.f32.mrf.mxu2 }
 0x3c9   : > { %v4123_v28 = vadd.f32 %v2149_v39, %v2074_v35  ;;  %v2007_v11 = vpop.f32.mrf.mxu0  ;;  %v2085_v36 = vpop.f32.mrf.mxu1 }
 0x3ca   : > { %v2081_v58 = vadd.f32 %v2080_v29, %v2007_v11 }
 0x3d0   : > { %v2151_v27 = vpop.f32.mrf.mxu2 }
 0x3d1   : > { %v4125_v51 = vadd.f32 %v2151_v27, %v2076_v3  ;;  %v2010_v14 = vpop.f32.mrf.mxu0  ;;  %v2088_v30 = vpop.f32.mrf.mxu1 }
 0x3d2   : > { %v2084_v40 = vadd.f32 %v2083_v8, %v2010_v14 }
 0x3d4   : > { %2994 = vmatmul.msk.bf16.gmra.mxu0 %vm693_vm0, %v3919_v44  ;;  %3009 = vmatmul.msk.bf16.gmra.mxu1 %vm693_vm0, %v3919_v44 }
 0x3d5   : > { %3023 = vmatmul.msk.bf16.vlgmr.msrb.gmra.mxu2 %vm693_vm0, %v3919_v44 }
 0x3d8   : > { %v2154_v19 = vpop.f32.mrf.mxu2 }
 0x3d9   : > { %v4133_v41 = vadd.f32 %v2154_v19, %v2079_v25  ;;  %v2012_v48 = vpop.f32.mrf.mxu0  ;;  %v2090_v55 = vpop.f32.mrf.mxu1 }
 0x3da   : > { %v2086_v32 = vadd.f32 %v2085_v36, %v2012_v48 }
 0x3e0   : > { %v2156_v12 = vpop.f32.mrf.mxu2 }
 0x3e1   : > { %v4135_v49 = vadd.f32 %v2156_v12, %v2081_v58  ;;  %v2015_v20 = vpop.f32.mrf.mxu0  ;;  %v2093_v50 = vpop.f32.mrf.mxu1 }
 0x3e2   : > { %v2089_v37 = vadd.f32 %v2088_v30, %v2015_v20 }
 0x3e4   : > { %2995 = vmatmul.msk.bf16.gmra.mxu0 %vm693_vm0, %v3945_v63  ;;  %3010 = vmatmul.msk.bf16.gmra.mxu1 %vm693_vm0, %v3945_v63 }
 0x3e5   : > { %3024 = vmatmul.msk.bf16.gmra.mxu2 %vm693_vm0, %v3945_v63 }
 0x3e8   : > { %v2159_v44 = vpop.f32.mrf.mxu2 }
 0x3e9   : > { %v4143_v53 = vadd.f32 %v2159_v44, %v2084_v40  ;;  %v2017_v42 = vpop.f32.mrf.mxu0  ;;  %v2095_v60 = vpop.f32.mrf.mxu1 }
 0x3ea   : > { %v2091_v18 = vadd.f32 %v2090_v55, %v2017_v42 }
 0x3f0   : > { %v2161_v31 = vpop.f32.mrf.mxu2 }
 0x3f1   : > { %v4145_v62 = vadd.f32 %v2161_v31, %v2086_v32  ;;  %v2020_v17 = vpop.f32.mrf.mxu0  ;;  %v2098_v45 = vpop.f32.mrf.mxu1 }
 0x3f2   : > { %v2094_v16 = vadd.f32 %v2093_v50, %v2020_v17 }
 0x3f4   : > { %2996 = vmatmul.msk.bf16.gmra.mxu0 %vm693_vm0, %v3969_v1  ;;  %3011 = vmatmul.msk.bf16.gmra.mxu1 %vm693_vm0, %v3969_v1 }
 0x3f5   : > { %3025 = vmatmul.msk.bf16.gmra.mxu2 %vm693_vm0, %v3969_v1 }
 0x3f8   : > { %v2164_v63 = vpop.f32.mrf.mxu2 }
 0x3f9   : > { %v4153_v33 = vadd.f32 %v2164_v63, %v2089_v37  ;;  %v2022_v35 = vpop.f32.mrf.mxu0  ;;  %v2100_v26 = vpop.f32.mrf.mxu1 }
 0x3fa   : > { %v2096_v4 = vadd.f32 %v2095_v60, %v2022_v35 }
 0x400   : > { %v2166_v24 = vpop.f32.mrf.mxu2 }
 0x401   : > { %v4155_v0 = vadd.f32 %v2166_v24, %v2091_v18  ;;  %v2025_v47 = vpop.f32.mrf.mxu0  ;;  %v2103_v6 = vpop.f32.mrf.mxu1 }
 0x402   : > { %v2099_v22 = vadd.f32 %v2098_v45, %v2025_v47 }
 0x404   : > { %2997 = vmatmul.msk.bf16.gmra.mxu0 %vm693_vm0, %v3995_v9  ;;  %3012 = vmatmul.msk.bf16.gmra.mxu1 %vm693_vm0, %v3995_v9 }
 0x405   : > { %3026 = vmatmul.msk.bf16.gmra.mxu2 %vm693_vm0, %v3995_v9 }
 0x408   : > { %v2169_v1 = vpop.f32.mrf.mxu2 }
 0x409   : > { %v4163_v52 = vadd.f32 %v2169_v1, %v2094_v16  ;;  %v2027_v59 = vpop.f32.mrf.mxu0  ;;  %v2105_v29 = vpop.f32.mrf.mxu1 }
 0x40a   : > { %v2101_v46 = vadd.f32 %v2100_v26, %v2027_v59  ;;  %v4215_v59 = vld [vmem:[%s4363_s8] ss:$0 sm:$0xff] }
 0x410   : > { %v2171_v3 = vpop.f32.mrf.mxu2 }
 0x411   : > { %v4165_v10 = vadd.f32 %v2171_v3, %v2096_v4  ;;  %v2030_v54 = vpop.f32.mrf.mxu0  ;;  %v2108_v57 = vpop.f32.mrf.mxu1 }
 0x412   : > { %v2104_v34 = vadd.f32 %v2103_v6, %v2030_v54 }
 0x414   : > { %2998 = vmatmul.msk.bf16.gmra.mxu0 %vm693_vm0, %v4017_v2  ;;  %3013 = vmatmul.msk.bf16.gmra.mxu1 %vm693_vm0, %v4017_v2 }
 0x415   : > { %3027 = vmatmul.msk.bf16.gmra.mxu2 %vm693_vm0, %v4017_v2 }
 0x418   : > { %v2174_v9 = vpop.f32.mrf.mxu2 }
 0x419   : > { %v4173_v23 = vadd.f32 %v2174_v9, %v2099_v22  ;;  %v2032_v61 = vpop.f32.mrf.mxu0  ;;  %v2110_v21 = vpop.f32.mrf.mxu1 }
 0x41a   : > { %v2106_v8 = vadd.f32 %v2105_v29, %v2032_v61 }
 0x420   : > { %v2176_v25 = vpop.f32.mrf.mxu2 }
 0x421   : > { %v4175_v39 = vadd.f32 %v2176_v25, %v2101_v46  ;;  %v2035_v11 = vpop.f32.mrf.mxu0  ;;  %v2113_v36 = vpop.f32.mrf.mxu1 }
 0x422   : > { %v2109_v58 = vadd.f32 %v2108_v57, %v2035_v11 }
 0x424   : > { %2999 = vmatmul.msk.bf16.gmra.mxu0 %vm693_vm0, %v4043_v43  ;;  %3014 = vmatmul.msk.bf16.gmra.mxu1 %vm693_vm0, %v4043_v43 }
 0x425   : > { %3028 = vmatmul.msk.bf16.gmra.mxu2 %vm693_vm0, %v4043_v43 }
 0x428   : > { %v2179_v2 = vpop.f32.mrf.mxu2 }
 0x429   : > { %v4183_v27 = vadd.f32 %v2179_v2, %v2104_v34  ;;  %v2037_v14 = vpop.f32.mrf.mxu0  ;;  %v2115_v30 = vpop.f32.mrf.mxu1 }
 0x42a   : > { %v2111_v40 = vadd.f32 %v2110_v21, %v2037_v14 }
 0x430   : > { %v2181_v19 = vpop.f32.mrf.mxu2 }
 0x431   : > { %v4185_v48 = vadd.f32 %v2181_v19, %v2106_v8  ;;  %v2040_v55 = vpop.f32.mrf.mxu0  ;;  %v2299_v32 = vpop.f32.mrf.mxu1 }
 0x432   : > { %v2114_v12 = vadd.f32 %v2113_v36, %v2040_v55 }
 0x434   : > { %3000 = vmatmul.msk.bf16.gmra.mxu0 %vm693_vm0, %v4066_v38  ;;  %3015 = vmatmul.msk.bf16.gmra.mxu1 %vm693_vm0, %v4066_v38 }
 0x435   : > { %3029 = vmatmul.msk.bf16.gmra.mxu2 %vm693_vm0, %v4066_v38 }
 0x438   : > { %v2184_v43 = vpop.f32.mrf.mxu2 }
 0x439   : > { %v4193_v20 = vadd.f32 %v2184_v43, %v2109_v58  ;;  %v2042_v50 = vpop.f32.mrf.mxu0  ;;  %v2301_v44 = vpop.f32.mrf.mxu1 }
 0x43a   : > { %v2116_v37 = vadd.f32 %v2115_v30, %v2042_v50 }
 0x440   : > { %v2186_v42 = vpop.f32.mrf.mxu2 }
 0x441   : > { %v4195_v60 = vadd.f32 %v2186_v42, %v2111_v40  ;;  %v2234_v18 = vpop.f32.mrf.mxu0  ;;  %v2304_v31 = vpop.f32.mrf.mxu1 }
 0x442   : > { %v2300_v47 = vadd.f32 %v2299_v32, %v2234_v18 }
 0x444   : > { %3001 = vmatmul.msk.bf16.gmra.mxu0 %vm693_vm0, %v4084_v7  ;;  %3016 = vmatmul.msk.bf16.gmra.mxu1 %vm693_vm0, %v4084_v7 }
 0x445   : > { %3030 = vmatmul.msk.bf16.gmra.mxu2 %vm693_vm0, %v4084_v7 }
 0x448   : > { %v2189_v38 = vpop.f32.mrf.mxu2 }
 0x449   : > { %v4203_v17 = vadd.f32 %v2189_v38, %v2114_v12  ;;  %v2236_v45 = vpop.f32.mrf.mxu0  ;;  %v2306_v16 = vpop.f32.mrf.mxu1 }
 0x44a   : > { %v2302_v22 = vadd.f32 %v2301_v44, %v2236_v45 }
 0x450   : > { %v2191_v63 = vpop.f32.mrf.mxu2 }
 0x451   : > { %v4205_v35 = vadd.f32 %v2191_v63, %v2116_v37  ;;  %v2239_v26 = vpop.f32.mrf.mxu0  ;;  %v2309_v4 = vpop.f32.mrf.mxu1 }
 0x452   : > { %v2305_v21 = vadd.f32 %v2304_v31, %v2239_v26 }
 0x454   : > { %3002 = vmatmul.msk.bf16.gmra.mxu0 %vm693_vm0, %v4100_v5 }
 0x455   : > { %3031 = vmatmul.msk.bf16.gmra.mxu2 %vm693_vm0, %v4100_v5 }
 0x458   : > { %v2367_v24 = vpop.f32.mrf.mxu2 }
 0x459   : > { %v2241_v6 = vpop.f32.mrf.mxu0  ;;  %v2417_v7 = vadd.f32 %v2367_v24, %v2300_v47  ;;  %v2311_v54 = vpop.f32.mrf.mxu1 }
 0x45a   : > { %v2307_v58 = vadd.f32 %v2306_v16, %v2241_v6 }
 0x45b   : > { %v2437_v1 = vmax.f32 %v4110_v15, %v2417_v7 }
 0x45d   : > { %v2461_v57 = vadd.f32 %v4215_v59, %v2437_v1 }
 0x45f   : > { %v2481_v9 = vmax.f32 %v2461_v57, 0.0 }
 0x460   : > { %v2369_v29 = vpop.f32.mrf.mxu2 }
 0x461   : > { %v2418_v46 = vadd.f32 %v2369_v29, %v2302_v22  ;;  %v2244_v3 = vpop.f32.mrf.mxu0  ;;  %v2314_v36 = vpop.f32.mrf.mxu1 }
 0x462   : > { %v2310_v50 = vadd.f32 %v2309_v4, %v2244_v3 }
 0x463   : > { %v2438_v5 = vmax.f32 %v4113_v56, %v2418_v46 }
 0x465   : > { %v2462_v34 = vadd.f32 %v4215_v59, %v2438_v5  ;;  %3032 = vmatmul.msk.bf16.gmra.mxu2 %vm693_vm0, %v4115_v13 }
 0x467   : > { %v2482_v15 = vmax.f32 %v2462_v34, 0.0 }
 0x468   : > { %v2372_v61 = vpop.f32.mrf.mxu2 }
 0x469   : > { %v2501_v8 = vpack.c.bf16 %v2482_v15, %v2481_v9  ;;  %v2246_v25 = vpop.f32.mrf.mxu0  ;;  %v2419_v11 = vadd.f32 %v2372_v61, %v2305_v21  ;;  %v2316_v55 = vpop.f32.mrf.mxu1 }
 0x46b   : > { %3037 = vmatmul.msk.bf16.vlgmr.msrb.gmra.mxu3 %vm693_vm0, %v2501_v8  ;;  %v2439_v2 = vmax.f32 %v4123_v28, %v2419_v11  ;;  %v2312_v28 = vadd.f32 %v2311_v54, %v2246_v25 }
 0x46d   : > { %v2463_v40 = vadd.f32 %v4215_v59, %v2439_v2 }
 0x46f   : > { %v2483_v32 = vmax.f32 %v2463_v40, 0.0 }
 0x470   : > { %v2374_v14 = vpop.f32.mrf.mxu2 }
 0x471   : > { %v2420_v56 = vadd.f32 %v2374_v14, %v2307_v58  ;;  %v2249_v30 = vpop.f32.mrf.mxu0  ;;  %v2319_v31 = vpop.f32.mrf.mxu1 }
 0x472   : > { %v2315_v6 = vadd.f32 %v2314_v36, %v2249_v30 }
 0x473   : > { %v2440_v13 = vmax.f32 %v4125_v51, %v2420_v56 }
 0x475   : > { %v2464_v19 = vadd.f32 %v4215_v59, %v2440_v13 }
 0x477   : > { %v2484_v12 = vmax.f32 %v2464_v19, 0.0 }
 0x478   : > { %v2377_v43 = vpop.f32.mrf.mxu2 }
 0x479   : > { %v2502_v37 = vpack.c.bf16 %v2484_v12, %v2483_v32  ;;  %v2251_v44 = vpop.f32.mrf.mxu0  ;;  %v2421_v42 = vadd.f32 %v2377_v43, %v2310_v50  ;;  %v2321_v1 = vpop.f32.mrf.mxu1 }
 0x47b   : > { %3038 = vmatmul.msk.bf16.gmra.mxu3 %vm693_vm0, %v2502_v37  ;;  %v2441_v18 = vmax.f32 %v4133_v41, %v2421_v42  ;;  %v2317_v41 = vadd.f32 %v2316_v55, %v2251_v44 }
 0x47d   : > { %v2465_v51 = vadd.f32 %v4215_v59, %v2441_v18 }
 0x47f   : > { %v2485_v24 = vmax.f32 %v2465_v51, 0.0 }
 0x480   : > { %v2379_v38 = vpop.f32.mrf.mxu2 }
 0x481   : > { %v2422_v45 = vadd.f32 %v2379_v38, %v2312_v28  ;;  %v2254_v16 = vpop.f32.mrf.mxu0  ;;  %v2324_v34 = vpop.f32.mrf.mxu1 }
 0x482   : > { %v2320_v8 = vadd.f32 %v2319_v31, %v2254_v16 }
 0x483   : > { %v2442_v63 = vmax.f32 %v4135_v49, %v2422_v45 }
 0x485   : > { %v2466_v26 = vadd.f32 %v4215_v59, %v2442_v63 }
 0x487   : > { %v2486_v4 = vmax.f32 %v2466_v26, 0.0 }
 0x488   : > { %v2382_v47 = vpop.f32.mrf.mxu2 }
 0x489   : > { %v2503_v7 = vpack.c.bf16 %v2486_v4, %v2485_v24  ;;  %v2256_v22 = vpop.f32.mrf.mxu0  ;;  %v2423_v29 = vadd.f32 %v2382_v47, %v2315_v6 }
 0x48a   : > { %v2322_v58 = vadd.f32 %v2321_v1, %v2256_v22 }
 0x48b   : > { %3039 = vmatmul.msk.bf16.gmra.mxu3 %vm693_vm0, %v2503_v7  ;;  %v2443_v46 = vmax.f32 %v4143_v53, %v2423_v29  ;;  %v2326_v53 = vpop.f32.mrf.mxu1 }
 0x48d   : > { %v2467_v49 = vadd.f32 %v4215_v59, %v2443_v46 }
 0x48f   : > { %v2487_v15 = vmax.f32 %v2467_v49, 0.0 }
 0x490   : > { %v2384_v3 = vpop.f32.mrf.mxu2 }
 0x491   : > { %v2424_v54 = vadd.f32 %v2384_v3, %v2317_v41  ;;  %v2259_v57 = vpop.f32.mrf.mxu0 }
 0x492   : > { %v2325_v43 = vadd.f32 %v2324_v34, %v2259_v57 }
 0x493   : > { %v2444_v5 = vmax.f32 %v4145_v62, %v2424_v54  ;;  %v2329_v32 = vpop.f32.mrf.mxu1 }
 0x495   : > { %v2468_v9 = vadd.f32 %v4215_v59, %v2444_v5 }
 0x497   : > { %v2488_v61 = vmax.f32 %v2468_v9, 0.0 }
 0x498   : > { %v2387_v21 = vpop.f32.mrf.mxu2 }
 0x499   : > { %v2504_v25 = vpack.c.bf16 %v2488_v61, %v2487_v15  ;;  %v2425_v11 = vadd.f32 %v2387_v21, %v2320_v8  ;;  %v2261_v36 = vpop.f32.mrf.mxu0 }
 0x49a   : > { %v2327_v44 = vadd.f32 %v2326_v53, %v2261_v36 }
 0x49b   : > { %3040 = vmatmul.msk.bf16.gmra.mxu3 %vm693_vm0, %v2504_v25  ;;  %v2445_v2 = vmax.f32 %v4153_v33, %v2425_v11  ;;  %v2331_v31 = vpop.f32.mrf.mxu1 }
 0x49d   : > { %v2469_v62 = vadd.f32 %v4215_v59, %v2445_v2 }
 0x49f   : > { %v2489_v19 = vmax.f32 %v2469_v62, 0.0 }
 0x4a0   : > { %v2389_v14 = vpop.f32.mrf.mxu2 }
 0x4a1   : > { %v2426_v56 = vadd.f32 %v2389_v14, %v2322_v58  ;;  %v2264_v13 = vpop.f32.mrf.mxu0 }
 0x4a2   : > { %v2330_v26 = vadd.f32 %v2329_v32, %v2264_v13 }
 0x4a3   : > { %v2446_v30 = vmax.f32 %v4155_v0, %v2426_v56 }
 0x4a5   : > { %v2470_v40 = vadd.f32 %v4215_v59, %v2446_v30 }
 0x4a7   : > { %v2490_v55 = vmax.f32 %v2470_v40, 0.0 }
 0x4a8   : > { %v2392_v12 = vpop.f32.mrf.mxu2 }
 0x4a9   : > { %v2505_v50 = vpack.c.bf16 %v2490_v55, %v2489_v19  ;;  %v2427_v37 = vadd.f32 %v2392_v12, %v2325_v43  ;;  %v2266_v42 = vpop.f32.mrf.mxu0 }
 0x4aa   : > { %v2332_v6 = vadd.f32 %v2331_v31, %v2266_v42 }
 0x4ab   : > { %3041 = vmatmul.msk.bf16.gmra.mxu3 %vm693_vm0, %v2505_v50  ;;  %v2447_v33 = vmax.f32 %v4163_v52, %v2427_v37  ;;  %v2334_v52 = vpop.f32.mrf.mxu1 }
 0x4ad   : > { %v2471_v0 = vadd.f32 %v4215_v59, %v2447_v33 }
 0x4af   : > { %v2491_v16 = vmax.f32 %v2471_v0, 0.0 }
 0x4b0   : > { %v2394_v28 = vpop.f32.mrf.mxu2 }
 0x4b1   : > { %v2428_v18 = vadd.f32 %v2394_v28, %v2327_v44  ;;  %v2269_v4 = vpop.f32.mrf.mxu0 }
 0x4b2   : > { %v2335_v5 = vadd.f32 %v2334_v52, %v2269_v4 }
 0x4b3   : > { %v2448_v38 = vmax.f32 %v4165_v10, %v2428_v18  ;;  %v2336_v3 = vpop.f32.mrf.mxu1 }
 0x4b5   : > { %v2472_v45 = vadd.f32 %v4215_v59, %v2448_v38 }
 0x4b7   : > { %v2492_v51 = vmax.f32 %v2472_v45, 0.0 }
 0x4b8   : > { %v2397_v63 = vpop.f32.mrf.mxu2 }
 0x4b9   : > { %v2506_v24 = vpack.c.bf16 %v2492_v51, %v2491_v16  ;;  %v2429_v47 = vadd.f32 %v2397_v63, %v2330_v26  ;;  %v2271_v41 = vpop.f32.mrf.mxu0 }
 0x4bb   : > { %3042 = vmatmul.msk.bf16.gmra.mxu3 %vm693_vm0, %v2506_v24  ;;  %v2449_v7 = vmax.f32 %v4173_v23, %v2429_v47  ;;  %v2337_v23 = vadd.f32 %v2336_v3, %v2271_v41  ;;  %v2339_v21 = vpop.f32.mrf.mxu1 }
 0x4bd   : > { %v2473_v29 = vadd.f32 %v4215_v59, %v2449_v7 }
 0x4bf   : > { %v2493_v54 = vmax.f32 %v2473_v29, 0.0 }
 0x4c0   : > { %v2399_v22 = vpop.f32.mrf.mxu2 }
 0x4c1   : > { %v2430_v1 = vadd.f32 %v2399_v22, %v2332_v6  ;;  %v2274_v15 = vpop.f32.mrf.mxu0 }
 0x4c2   : > { %v2340_v56 = vadd.f32 %v2339_v21, %v2274_v15 }
 0x4c3   : > { %v2450_v10 = vmax.f32 %v4175_v39, %v2430_v1  ;;  %v2341_v30 = vpop.f32.mrf.mxu1 }
 0x4c5   : > { %v2474_v46 = vadd.f32 %v4215_v59, %v2450_v10 }
 0x4c7   : > { %v2494_v57 = vmax.f32 %v2474_v46, 0.0 }
 0x4c8   : > { %v2402_v49 = vpop.f32.mrf.mxu2 }
 0x4c9   : > { %v2507_v34 = vpack.c.bf16 %v2494_v57, %v2493_v54  ;;  %v2431_v9 = vadd.f32 %v2402_v49, %v2335_v5  ;;  %v2276_v2 = vpop.f32.mrf.mxu0 }
 0x4cb   : > { %3043 = vmatmul.msk.bf16.gmra.mxu3 %vm693_vm0, %v2507_v34  ;;  %v2451_v61 = vmax.f32 %v4183_v27, %v2431_v9  ;;  %v2342_v27 = vadd.f32 %v2341_v30, %v2276_v2  ;;  %v2344_v43 = vpop.f32.mrf.mxu1 }
 0x4cd   : > { %v2475_v39 = vadd.f32 %v4215_v59, %v2451_v61 }
 0x4cf   : > { %v2495_v53 = vmax.f32 %v2475_v39, 0.0 }
 0x4d0   : > { %v2404_v8 = vpop.f32.mrf.mxu2 }
 0x4d1   : > { %v2432_v25 = vadd.f32 %v2404_v8, %v2337_v23  ;;  %v2279_v32 = vpop.f32.mrf.mxu0 }
 0x4d2   : > { %v2345_v42 = vadd.f32 %v2344_v43, %v2279_v32 }
 0x4d3   : > { %v2452_v11 = vmax.f32 %v4185_v48, %v2432_v25  ;;  %v2346_v0 = vpop.f32.mrf.mxu1 }
 0x4d5   : > { %v2476_v36 = vadd.f32 %v4215_v59, %v2452_v11 }
 0x4d7   : > { %v2496_v58 = vmax.f32 %v2476_v36, 0.0 }
 0x4d8   : > { %v2407_v14 = vpop.f32.mrf.mxu2 }
 0x4d9   : > { %v2508_v62 = vpack.c.bf16 %v2496_v58, %v2495_v53  ;;  %v2433_v40 = vadd.f32 %v2407_v14, %v2340_v56  ;;  %v2281_v31 = vpop.f32.mrf.mxu0 }
 0x4da   : > { %v2347_v38 = vadd.f32 %v2346_v0, %v2281_v31 }
 0x4db   : > { %3044 = vmatmul.msk.bf16.gmra.mxu3 %vm693_vm0, %v2508_v62  ;;  %v2453_v13 = vmax.f32 %v4193_v20, %v2433_v40  ;;  %v4267_v20 = vld [vmem:[%s4365_s10] ss:$0 sm:$0xff] }
 0x4dd   : > { %v2477_v48 = vadd.f32 %v4215_v59, %v2453_v13 }
 0x4df   : > { %v2497_v37 = vmax.f32 %v2477_v48, 0.0 }
 0x4e0   : > { %v2409_v19 = vpop.f32.mrf.mxu2 }
 0x4e1   : > { %v2434_v55 = vadd.f32 %v2409_v19, %v2342_v27 }
 0x4e3   : > { %v2454_v12 = vmax.f32 %v4195_v60, %v2434_v55 }
 0x4e5   : > { %v2478_v50 = vadd.f32 %v4215_v59, %v2454_v12 }
 0x4e7   : > { %v2498_v44 = vmax.f32 %v2478_v50, 0.0 }
 0x4e8   : > { %v2412_v33 = vpop.f32.mrf.mxu2 }
 0x4e9   : > { %v2509_v28 = vpack.c.bf16 %v2498_v44, %v2497_v37  ;;  %v2435_v18 = vadd.f32 %v2412_v33, %v2345_v42 }
 0x4eb   : > { %3045 = vmatmul.msk.bf16.gmra.mxu3 %vm693_vm0, %v2509_v28  ;;  %v2455_v45 = vmax.f32 %v4203_v17, %v2435_v18 }
 0x4ed   : > { %v2479_v26 = vadd.f32 %v4215_v59, %v2455_v45 }
 0x4ee   : > { %v2562_v60 = vpop.f32.mrf.mxu3 }
 0x4ef   : > { %v2563_v16 = vadd.f32 %v4267_v20, %v2562_v60  ;;  %v2499_v17 = vmax.f32 %v2479_v26, 0.0 }
 0x4f0   : > { %v2414_v51 = vpop.f32.mrf.mxu2 }
 0x4f1   : > { %2612 = vst [vmem:[%s4271_s15] sm:$0xff] %v2563_v16  ;;  %v2436_v63 = vadd.f32 %v2414_v51, %v2347_v38 }
 0x4f3   : > { %v2456_v24 = vmax.f32 %v4205_v35, %v2436_v63 }
 0x4f5   : > { %v2480_v4 = vadd.f32 %v4215_v59, %v2456_v24 }
 0x4f6   : > { %v2564_v47 = vpop.f32.mrf.mxu3 }
 0x4f7   : > { %v2500_v52 = vmax.f32 %v2480_v4, 0.0  ;;  %v2565_v6 = vadd.f32 %v4267_v20, %v2564_v47 }
 0x4f9   : > { %v2510_v7 = vpack.c.bf16 %v2500_v52, %v2499_v17  ;;  %2613 = vst [vmem:[%s4271_s15 + $0x8] sm:$0xff] %v2565_v6 }
 0x4fb   : > { %3046 = vmatmul.msk.bf16.gmra.mxu3 %vm693_vm0, %v2510_v7 }
 0x4fe   : > { %v2567_v22 = vpop.f32.mrf.mxu3 }
 0x4ff   : > { %v2568_v1 = vadd.f32 %v4267_v20, %v2567_v22 }
 0x501   : > { %2614 = vst [vmem:[%s4271_s15 + $0x10] sm:$0xff] %v2568_v1 }
 0x506   : > { %v2569_v35 = vpop.f32.mrf.mxu3 }
 0x507   : > { %v2570_v59 = vadd.f32 %v4267_v20, %v2569_v35 }
 0x509   : > { %2615 = vst [vmem:[%s4271_s15 + $0x18] sm:$0xff] %v2570_v59 }
 0x50e   : > { %v2572_v29 = vpop.f32.mrf.mxu3 }
 0x50f   : > { %v2573_v10 = vadd.f32 %v4267_v20, %v2572_v29 }
 0x511   : > { %2616 = vst [vmem:[%s4271_s15 + $0x20] sm:$0xff] %v2573_v10 }
 0x516   : > { %v2574_v41 = vpop.f32.mrf.mxu3 }
 0x517   : > { %v2575_v46 = vadd.f32 %v4267_v20, %v2574_v41 }
 0x519   : > { %2617 = vst [vmem:[%s4271_s15 + $0x28] sm:$0xff] %v2575_v46 }
 0x51e   : > { %v2577_v3 = vpop.f32.mrf.mxu3 }
 0x51f   : > { %v2578_v54 = vadd.f32 %v4267_v20, %v2577_v3 }
 0x521   : > { %2618 = vst [vmem:[%s4271_s15 + $0x30] sm:$0xff] %v2578_v54 }
 0x526   : > { %v2579_v57 = vpop.f32.mrf.mxu3 }
 0x527   : > { %v2580_v49 = vadd.f32 %v4267_v20, %v2579_v57 }
 0x529   : > { %2619 = vst [vmem:[%s4271_s15 + $0x38] sm:$0xff] %v2580_v49 }
 0x52e   : > { %v2582_v5 = vpop.f32.mrf.mxu3 }
 0x52f   : > { %v2583_v34 = vadd.f32 %v4267_v20, %v2582_v5 }
 0x531   : > { %2620 = vst [vmem:[%s4271_s15 + $0x40] sm:$0xff] %v2583_v34 }
 0x536   : > { %v2584_v9 = vpop.f32.mrf.mxu3 }
 0x537   : > { %v2585_v15 = vadd.f32 %v4267_v20, %v2584_v9 }
 0x539   : > { %2621 = vst [vmem:[%s4271_s15 + $0x48] sm:$0xff] %v2585_v15 }
 0x53e   : > { %v2587_v23 = vpop.f32.mrf.mxu3 }
 0x53f   : > { %v2588_v61 = vadd.f32 %v4267_v20, %v2587_v23 }
 0x541   : > { %2622 = vst [vmem:[%s4271_s15 + $0x50] sm:$0xff] %v2588_v61 }
 0x546   : > { %v2589_v21 = vpop.f32.mrf.mxu3 }
 0x547   : > { %v2590_v8 = vadd.f32 %v4267_v20, %v2589_v21 }
 0x549   : > { %2623 = vst [vmem:[%s4271_s15 + $0x58] sm:$0xff] %v2590_v8 }
 0x54e   : > { %v2592_v25 = vpop.f32.mrf.mxu3 }
 0x54f   : > { %v2593_v39 = vadd.f32 %v4267_v20, %v2592_v25 }
 0x551   : > { %2624 = vst [vmem:[%s4271_s15 + $0x60] sm:$0xff] %v2593_v39 }
 0x556   : > { %v2594_v11 = vpop.f32.mrf.mxu3 }
 0x557   : > { %v2595_v36 = vadd.f32 %v4267_v20, %v2594_v11 }
 0x559   : > { %2625 = vst [vmem:[%s4271_s15 + $0x68] sm:$0xff] %v2595_v36 }
 0x55e   : > { %v2597_v53 = vpop.f32.mrf.mxu3 }
 0x55f   : > { %v2598_v58 = vadd.f32 %v4267_v20, %v2597_v53 }
 0x561   : > { %2626 = vst [vmem:[%s4271_s15 + $0x70] sm:$0xff] %v2598_v58 }
 0x566   : > { %v2599_v2 = vpop.f32.mrf.mxu3 }
 0x567   : > { %v2600_v14 = vadd.f32 %v4267_v20, %v2599_v2 }
 0x569   : > { %2627 = vst [vmem:[%s4271_s15 + $0x78] sm:$0xff] %v2600_v14 }
 0x56e   : > { %v2602_v56 = vpop.f32.mrf.mxu3 }
 0x56f   : > { %v2603_v62 = vadd.f32 %v4267_v20, %v2602_v56 }
 0x571   : > { %2628 = vst [vmem:[%s4271_s15 + $0x80] sm:$0xff] %v2603_v62 }
 0x576   : > { %v2604_v30 = vpop.f32.mrf.mxu3 }
 0x577   : > { %v2605_v40 = vadd.f32 %v4267_v20, %v2604_v30 }
 0x579   : > { %2629 = vst [vmem:[%s4271_s15 + $0x88] sm:$0xff] %v2605_v40 }
 0x57e   : > { %v2607_v27 = vpop.f32.mrf.mxu3 }
 0x57f   : > { %v2608_v13 = vadd.f32 %v4267_v20, %v2607_v27 }
 0x581   : > { %2630 = vst [vmem:[%s4271_s15 + $0x90] sm:$0xff] %v2608_v13 }
 0x586   : > { %v2609_v19 = vpop.f32.mrf.mxu3 }
 0x587   : > { %v2610_v55 = vadd.f32 %v4267_v20, %v2609_v19 }
 0x589   : > { %2631 = vst [vmem:[%s4271_s15 + $0x98] sm:$0xff] %v2610_v55 }
 0x58a   : > { %s3074_s30 = sshll.u32 %s2738_s21, 4  ;;  %s2655_s12 = sshll.u32 %s4271_s15, 4  ;;  %s2656_s12 = int_to_ptr.vmem [resolvable:$true] %s2655_s12 }
 0x58b   : > { %s2644_s22 = scalar_lea.hbm %s4366_s11, %s3074_s30  ;;  %s3168_s13 = smov 256  }
 0x58c   : > { %s2657_s24 = sshll.u32 %s2644_s22, 4  ;;  %3076 = sst [smem:[#allocation6]] (%p3273_p6), %s3168_s13  ;;  %s2658_s24 = int_to_ptr.hbm [resolvable:$true] %s2657_s24 }
 0x58d   : > { %s3169_s25 = smov 512   ;;  %s3170_s0 = smov 2  }
 0x58e   : > { %3077 = sst [smem:[#allocation6 + $0x1]] (%p3273_p6), %s3169_s25  ;;  %s3171_s21 = smov 128  }
 0x58f   : > { %3078 = sst [smem:[#allocation6 + $0x2]] (%p3273_p6), %s3170_s0  ;;  %s3172_s15 = smov 8  }
 0x590   : > { %3079 = sst [smem:[#allocation6 + $0x3]] (%p3273_p6), %s3171_s21  ;;  %s3173_s30 = smov [#allocation5]  }
 0x591   : > { %3080 = sst [smem:[#allocation6 + $0x4]] (%p3273_p6), %s3171_s21  ;;  %s3174_s14 = smov 0  }
 0x592   : > { %3081 = sst [smem:[#allocation6 + $0x5]] (%p3273_p6), %s3172_s15 }
 0x593   : > { %3082 = dma.general (%p3273_p6), %s2656_s12, 2560, %s2658_s24, %s2633_s29, %s3173_s30, [#allocation6], %s3174_s14, 0  }
 0x594 PF: > { %s2685_s16 = sand.u32 1, %s3154_s17   ;;  %p3085_p13 = pnand %p2741_p9, %p3277_p8 }
 0x595   : > { %s2686_s0 = scalar_lea.sflag [#allocation4], %s2685_s16 }
 0x596   : > { %p3086_p0 = pneg %p3085_p13 }
 0x598   : > { %3149 = dma.done.wait (%p3086_p0), %s2686_s0, 2560  }
 0x599   : > { %3151 = vsyncadd (%p3086_p0), %s2686_s0, 4294964736  ;;  %p21_p1 = scmp.ge.s32.totalorder %s3258_s23, 4   ;;  %s4415_s17 = smov %s3158_s18 }
 0x59a   : > { %s4416_s18 = smov %s3162_s19  ;;  %s4417_s19 = smov %s3271_s26 }
 0x59b   : > { %s4418_s20 = smov %s3258_s23  ;;  %23 = sbr.rel (!%p21_p1) target bundleno = 5 (0x5), region = 157 }
 0x5a0   :  { %2692 = vsyncpa [#allocation4], 1 }
 0x5a1   :  { %2694 = vsyncpa [#allocation4 + $0x1], 1 }

// kernel: tpu_custom_call.1
= control target key start
LH: loop header
LB: loop body
LE: loop exit
PB: predicated region body
PF: predicated region fallthrough
CT: control target
= control target key end

     0   :  { %s4355_s0 = inlined_call_operand.vmem [shape: f32[16,32,16], index: 0, kind: input, shape index: {}]   ;;  %s4356_s1 = inlined_call_operand.vmem [shape: bf16[3,16,32], index: 1, kind: input, shape index: {}]   ;;  %s4357_s2 = inlined_call_operand.vmem [shape: f32[1,32], index: 2, kind: input, shape index: {}]   ;;  %s4358_s3 = inlined_call_operand.vmem [shape: bf16[3,32,16], index: 3, kind: input, shape index: {}]   ;;  %s4359_s4 = inlined_call_operand.vmem [shape: bf16[3,32,16], index: 4, kind: input, shape index: {}]   ;;  %s4360_s5 = inlined_call_operand.vmem [shape: f32[1,16], index: 5, kind: input, shape index: {}]   ;;  %s4361_s6 = inlined_call_operand.vmem [shape: bf16[3,16,16], index: 6, kind: input, shape index: {}]   ;;  %s4362_s7 = inlined_call_operand.vmem [shape: bf16[3,16,16], index: 7, kind: input, shape index: {}]   ;;  %s4363_s8 = inlined_call_operand.vmem [shape: f32[1,16], index: 8, kind: input, shape index: {}]   ;;  %s4364_s9 = inlined_call_operand.vmem [shape: bf16[16,128], index: 9, kind: input, shape index: {}]   ;;  %s4365_s10 = inlined_call_operand.vmem [shape: f32[1,128], index: 10, kind: input, shape index: {}]   ;;  %s4366_s11 = inlined_call_operand.hbm [shape: f32[10,32,128], index: 11, kind: output, shape index: {}]  }
   0x1   :  { %4367 = sst [smem:[#allocation30_spill]] %s4355_s0 }
   0x2   :  { %16 = vsyncpa [#allocation4], 0 }
   0x3   :  { %18 = vsyncpa [#allocation4 + $0x1], 0  ;;  %s3235_s17 = smov 0   ;;  %s3237_s18 = smov 0  }
   0x4   :  { %s3239_s19 = smov 0   ;;  %s3241_s20 = smov 0  }
   0x5 LB: > { %s2738_s21 = sadd.s32 4294967295, %s3166_s20   ;;  %s2739_s22 = sadd.s32 4294967294, %s3166_s20   ;;  %s3166_s20 = sphi %s3241_s20, %s4418_s20   ;;  %s3162_s19 = sphi %s3239_s19, %s4417_s19   ;;  %s3158_s18 = sphi %s3237_s18, %s4416_s18   ;;  %s3154_s17 = sphi %s3235_s17, %s4415_s17  }
   0x6   : > { %s3258_s23 = sadd.s32 1, %s3166_s20   ;;  %s31_s24 = sadd.s32 1, %s3162_s19 }
   0x7   : > { %s28_s25 = ssub.s32 %s3166_s20, %s3258_s23  ;;  %p38_p0 = scmp.ne.s32.totalorder %s3162_s19, %s3158_s18 }
   0x8   : > { %p29_p1 = scmp.eq.s32.totalorder %s28_s25, 0  ;;  %p39_p2 = scmp.eq.s32.totalorder %s3166_s20, 0 }
   0x9   : > { %p278_p3 = scmp.eq.s32.totalorder %s2738_s21, 1  ;;  %p283_p4 = scmp.ne.s32.totalorder %s3158_s18, %s3154_s17 }
   0xa   : > { %s3271_s26 = scalar_select %p29_p1, %s3162_s19, %s31_s24  }
   0xb   : > { %p40_p5 = por %p39_p2, %p38_p0  ;;  %p3273_p6 = por %p278_p3, %p38_p0 }
   0xc   : > { %p284_p7 = scmp.eq.s32.totalorder %s2739_s22, 1  ;;  %p2741_p9 = scmp.ge.s32.totalorder %s3166_s20, 2 }
   0xe   : > { %p3277_p8 = por %p284_p7, %p283_p4  ;;  %330 = sbr.rel (%p2741_p9) target bundleno = 61 (0x3d), region = 56 }
  0x13   : > { %333 = sbr.rel (!%p40_p5) target bundleno = 61 (0x3d), region = 60  ;;  %s335_s29 = sand.u32 (%p40_p5), 1, %s3162_s19  }
  0x14   : > { %s3051_s30 = sshll.u32 (%p40_p5), %s3166_s20, 4  ;;  %s2742_s12 = sshll.u32 (%p40_p5), %s335_s29, 8 }
  0x15   : > { %s4370_s0 = sld [smem:[#allocation30_spill]] (%p40_p5)  ;;  %s3294_s16 = scalar_lea.vmem (%p40_p5), [#allocation2], %s2742_s12 }
  0x1b   : > { %s3289_s15 = scalar_lea.vmem %s4370_s0, %s3051_s30 }
  0x1c   : > { %v431_v0 = vld [vmem:[%s3289_s15] sm:$0xff]  ;;  %v433_v1 = vld [vmem:[%s3289_s15 + $0x8] sm:$0xff] }
  0x1d   : > { %v435_v2 = vld [vmem:[%s3289_s15 + $0x20] sm:$0xff]  ;;  %432 = vst [vmem:[%s3294_s16] sm:$0xff] %v431_v0  ;;  %v437_v3 = vld [vmem:[%s3289_s15 + $0x28] sm:$0xff] }
  0x1e   : > { %434 = vst [vmem:[%s3294_s16 + $0x8] sm:$0xff] %v433_v1  ;;  %v439_v4 = vld [vmem:[%s3289_s15 + $0x40] sm:$0xff]  ;;  %v441_v5 = vld [vmem:[%s3289_s15 + $0x48] sm:$0xff] }
  0x1f   : > { %436 = vst [vmem:[%s3294_s16 + $0x10] sm:$0xff] %v435_v2  ;;  %v443_v6 = vld [vmem:[%s3289_s15 + $0x60] sm:$0xff]  ;;  %v445_v7 = vld [vmem:[%s3289_s15 + $0x68] sm:$0xff] }
  0x20   : > { %438 = vst [vmem:[%s3294_s16 + $0x18] sm:$0xff] %v437_v3  ;;  %v447_v8 = vld [vmem:[%s3289_s15 + $0x80] sm:$0xff]  ;;  %v449_v9 = vld [vmem:[%s3289_s15 + $0x88] sm:$0xff] }
  0x21   : > { %440 = vst [vmem:[%s3294_s16 + $0x20] sm:$0xff] %v439_v4  ;;  %v451_v10 = vld [vmem:[%s3289_s15 + $0xa0] sm:$0xff]  ;;  %v453_v11 = vld [vmem:[%s3289_s15 + $0xa8] sm:$0xff] }
  0x22   : > { %442 = vst [vmem:[%s3294_s16 + $0x28] sm:$0xff] %v441_v5  ;;  %v455_v12 = vld [vmem:[%s3289_s15 + $0xc0] sm:$0xff]  ;;  %v457_v13 = vld [vmem:[%s3289_s15 + $0xc8] sm:$0xff] }
  0x23   : > { %444 = vst [vmem:[%s3294_s16 + $0x30] sm:$0xff] %v443_v6  ;;  %v459_v14 = vld [vmem:[%s3289_s15 + $0xe0] sm:$0xff]  ;;  %v461_v15 = vld [vmem:[%s3289_s15 + $0xe8] sm:$0xff] }
  0x24   : > { %446 = vst [vmem:[%s3294_s16 + $0x38] sm:$0xff] %v445_v7  ;;  %v463_v16 = vld [vmem:[%s3289_s15 + $0x100] sm:$0xff]  ;;  %v465_v17 = vld [vmem:[%s3289_s15 + $0x108] sm:$0xff] }
  0x25   : > { %448 = vst [vmem:[%s3294_s16 + $0x40] sm:$0xff] %v447_v8  ;;  %v467_v18 = vld [vmem:[%s3289_s15 + $0x120] sm:$0xff]  ;;  %v469_v19 = vld [vmem:[%s3289_s15 + $0x128] sm:$0xff] }
  0x26   : > { %450 = vst [vmem:[%s3294_s16 + $0x48] sm:$0xff] %v449_v9  ;;  %v471_v20 = vld [vmem:[%s3289_s15 + $0x140] sm:$0xff]  ;;  %v473_v21 = vld [vmem:[%s3289_s15 + $0x148] sm:$0xff] }
  0x27   : > { %452 = vst [vmem:[%s3294_s16 + $0x50] sm:$0xff] %v451_v10  ;;  %v475_v22 = vld [vmem:[%s3289_s15 + $0x160] sm:$0xff]  ;;  %v477_v23 = vld [vmem:[%s3289_s15 + $0x168] sm:$0xff] }
  0x28   : > { %454 = vst [vmem:[%s3294_s16 + $0x58] sm:$0xff] %v453_v11  ;;  %v479_v24 = vld [vmem:[%s3289_s15 + $0x180] sm:$0xff]  ;;  %v481_v25 = vld [vmem:[%s3289_s15 + $0x188] sm:$0xff] }
  0x29   : > { %456 = vst [vmem:[%s3294_s16 + $0x60] sm:$0xff] %v455_v12  ;;  %v483_v26 = vld [vmem:[%s3289_s15 + $0x1a0] sm:$0xff]  ;;  %v485_v27 = vld [vmem:[%s3289_s15 + $0x1a8] sm:$0xff] }
  0x2a   : > { %458 = vst [vmem:[%s3294_s16 + $0x68] sm:$0xff] %v457_v13  ;;  %v487_v28 = vld [vmem:[%s3289_s15 + $0x1c0] sm:$0xff]  ;;  %v489_v29 = vld [vmem:[%s3289_s15 + $0x1c8] sm:$0xff] }
  0x2b   : > { %460 = vst [vmem:[%s3294_s16 + $0x70] sm:$0xff] %v459_v14  ;;  %v491_v30 = vld [vmem:[%s3289_s15 + $0x1e0] sm:$0xff]  ;;  %v493_v31 = vld [vmem:[%s3289_s15 + $0x1e8] sm:$0xff] }
  0x2c   : > { %462 = vst [vmem:[%s3294_s16 + $0x78] sm:$0xff] %v461_v15 }
  0x2d   : > { %464 = vst [vmem:[%s3294_s16 + $0x80] sm:$0xff] %v463_v16 }
  0x2e   : > { %466 = vst [vmem:[%s3294_s16 + $0x88] sm:$0xff] %v465_v17 }
  0x2f   : > { %468 = vst [vmem:[%s3294_s16 + $0x90] sm:$0xff] %v467_v18 }
  0x30   : > { %470 = vst [vmem:[%s3294_s16 + $0x98] sm:$0xff] %v469_v19 }
  0x31   : > { %472 = vst [vmem:[%s3294_s16 + $0xa0] sm:$0xff] %v471_v20 }
  0x32   : > { %474 = vst [vmem:[%s3294_s16 + $0xa8] sm:$0xff] %v473_v21 }
  0x33   : > { %476 = vst [vmem:[%s3294_s16 + $0xb0] sm:$0xff] %v475_v22 }
  0x34   : > { %478 = vst [vmem:[%s3294_s16 + $0xb8] sm:$0xff] %v477_v23 }
  0x35   : > { %480 = vst [vmem:[%s3294_s16 + $0xc0] sm:$0xff] %v479_v24 }
  0x36   : > { %482 = vst [vmem:[%s3294_s16 + $0xc8] sm:$0xff] %v481_v25 }
  0x37   : > { %484 = vst [vmem:[%s3294_s16 + $0xd0] sm:$0xff] %v483_v26 }
  0x38   : > { %486 = vst [vmem:[%s3294_s16 + $0xd8] sm:$0xff] %v485_v27 }
  0x39   : > { %488 = vst [vmem:[%s3294_s16 + $0xe0] sm:$0xff] %v487_v28 }
  0x3a   : > { %490 = vst [vmem:[%s3294_s16 + $0xe8] sm:$0xff] %v489_v29 }
  0x3b   : > { %492 = vst [vmem:[%s3294_s16 + $0xf0] sm:$0xff] %v491_v30 }
  0x3c   : > { %494 = vst [vmem:[%s3294_s16 + $0xf8] sm:$0xff] %v493_v31 }
  0x3d PF: > { %p2745_p10 = scmp.ge.s32.totalorder %s3166_s20, 1  ;;  %p499_p11 = scmp.lt.s32.totalorder %s3166_s20, 3 }
  0x3f   : > { %p500_p12 = pnand %p2745_p10, %p499_p11 }
  0x41   : > { %503 = sbr.rel (%p500_p12) target bundleno = 1428 (0x594), region = 98 }
  0x46   : > { %v3053_v32 = vld [vmem:[%s4356_s1 + $0x8] sm:$0xff]  ;;  %v3052_v33 = vld [vmem:[%s4356_s1] sm:$0xff]  ;;  %v3054_v34 = vld [vmem:[%s4356_s1 + $0x10] sm:$0xff]  ;;  %s3369_s13 = sand.u32 1, %s3158_s18   ;;  %vm693_vm0 = vcmask 130048   ;;  %vm1201_vm1 = vcmask 261120  }
  0x47   : > { %s2746_s14 = sshll.u32 %s3369_s13, 8  ;;  %743 = vmatpush.bf16.msra.mxu0 %v3053_v32  ;;  %836 = vmatpush.bf16.msra.mxu1 %v3052_v33  ;;  %s3075_s22 = smul.u32 160, %s3369_s13 }
  0x48   : > { %932 = vmatpush.bf16.msra.mxu2 %v3054_v34  ;;  %s3372_s15 = scalar_lea.vmem [#allocation2], %s2746_s14  ;;  %s2633_s29 = scalar_lea.sflag [#allocation4], %s3369_s13 }
  0x49   : > { %v550_v35 = vld [vmem:[%s3372_s15 + $0x10] sm:$0xff]  ;;  %v551_v36 = vld [vmem:[%s3372_s15 + $0x18] sm:$0xff]  ;;  %v548_v37 = vld [vmem:[%s3372_s15] sm:$0xff] }
  0x4a   : > { %v582_v38 = vpack.c.bf16 %v550_v35, %v550_v35  ;;  %v583_v39 = vpack.c.bf16 %v551_v36, %v551_v36  ;;  %v549_v40 = vld [vmem:[%s3372_s15 + $0x8] sm:$0xff]  ;;  %v580_v41 = vpack.c.bf16 %v548_v37, %v548_v37  ;;  %v552_v42 = vld [vmem:[%s3372_s15 + $0x20] sm:$0xff]  ;;  %v554_v56 = vld [vmem:[%s3372_s15 + $0x30] sm:$0xff] }
  0x4b   : > { %v553_v43 = vld [vmem:[%s3372_s15 + $0x28] sm:$0xff]  ;;  %v581_v44 = vpack.c.bf16 %v549_v40, %v549_v40  ;;  %v584_v45 = vpack.c.bf16 %v552_v42, %v552_v42  ;;  %v555_v57 = vld [vmem:[%s3372_s15 + $0x38] sm:$0xff]  ;;  %v586_v58 = vpack.c.bf16 %v554_v56, %v554_v56  ;;  %v556_v63 = vld [vmem:[%s3372_s15 + $0x40] sm:$0xff] }
  0x4c   : > { %v585_v46 = vpack.c.bf16 %v553_v43, %v553_v43  ;;  %v645_v47 = vunpack.c.l.b16 %v582_v38  ;;  %v646_v48 = vunpack.c.l.b16 %v583_v39  ;;  %v817_v49 = vunpack.c.l.b16 %v580_v41  ;;  %v557_v0 = vld [vmem:[%s3372_s15 + $0x48] sm:$0xff]  ;;  %v558_v6 = vld [vmem:[%s3372_s15 + $0x50] sm:$0xff]  ;;  %v559_v7 = vld [vmem:[%s3372_s15 + $0x58] sm:$0xff] }
  0x4d   : > { %v818_v50 = vunpack.c.l.b16 %v581_v44  ;;  %v647_v51 = vunpack.c.l.b16 %v584_v45  ;;  %v587_v59 = vpack.c.bf16 %v555_v57, %v555_v57  ;;  %v649_v60 = vunpack.c.l.b16 %v586_v58  ;;  %v560_v13 = vld [vmem:[%s3372_s15 + $0x60] sm:$0xff]  ;;  %v561_v14 = vld [vmem:[%s3372_s15 + $0x68] sm:$0xff]  ;;  %v562_v20 = vld [vmem:[%s3372_s15 + $0x70] sm:$0xff] }
  0x4e   : > { %v648_v52 = vunpack.c.l.b16 %v585_v46  ;;  %v673_v53 = vpack.c.b16 %v646_v48, %v645_v47  ;;  %v588_v1 = vpack.c.bf16 %v556_v63, %v556_v63  ;;  %v589_v2 = vpack.c.bf16 %v557_v0, %v557_v0  ;;  %v563_v21 = vld [vmem:[%s3372_s15 + $0x78] sm:$0xff]  ;;  %v564_v27 = vld [vmem:[%s3372_s15 + $0x80] sm:$0xff]  ;;  %v565_v28 = vld [vmem:[%s3372_s15 + $0x88] sm:$0xff] }
  0x4f   : > { %v819_v54 = vpack.c.b16 %v818_v50, %v817_v49  ;;  %v650_v61 = vunpack.c.l.b16 %v587_v59  ;;  %v590_v8 = vpack.c.bf16 %v558_v6, %v558_v6  ;;  %v591_v9 = vpack.c.bf16 %v559_v7, %v559_v7  ;;  %v566_v34 = vld [vmem:[%s3372_s15 + $0x90] sm:$0xff]  ;;  %v567_v35 = vld [vmem:[%s3372_s15 + $0x98] sm:$0xff]  ;;  %v568_v41 = vld [vmem:[%s3372_s15 + $0xa0] sm:$0xff] }
  0x50   : > { %v674_v55 = vpack.c.b16 %v648_v52, %v647_v51  ;;  %2753 = vmatmul.msk.bf16.vlgmr.msra.gmra.mxu0 %vm693_vm0, %v673_v53  ;;  %v651_v3 = vunpack.c.l.b16 %v588_v1  ;;  %v652_v4 = vunpack.c.l.b16 %v589_v2  ;;  %v592_v15 = vpack.c.bf16 %v560_v13, %v560_v13  ;;  %v569_v42 = vld [vmem:[%s3372_s15 + $0xa8] sm:$0xff]  ;;  %v3058_v51 = vld [vmem:[%s4358_s3 + $0x18] sm:$0xff]  ;;  %v570_v52 = vld [vmem:[%s3372_s15 + $0xb0] sm:$0xff] }
  0x51   : > { %2771 = vmatmul.msk.bf16.vlgmr.msra.gmra.mxu1 %vm693_vm0, %v819_v54  ;;  %v675_v62 = vpack.c.b16 %v650_v61, %v649_v60  ;;  %v653_v10 = vunpack.c.l.b16 %v590_v8  ;;  %v654_v11 = vunpack.c.l.b16 %v591_v9  ;;  %v593_v16 = vpack.c.bf16 %v561_v14, %v561_v14  ;;  %1244 = vmatpush.bf16.msra.mxu3 %v3058_v51  ;;  %v3437_v57 = vld [vmem:[%s4357_s2] ss:$0 sm:$0xff]  ;;  %v3056_v7 = vld [vmem:[%s4358_s3 + $0x8] sm:$0xff] }
  0x52   : > { %2791 = vmatmul.msk.bf16.vlgmr.msra.gmra.mxu2 %vm693_vm0, %v674_v55  ;;  %v676_v5 = vpack.c.b16 %v652_v4, %v651_v3  ;;  %v655_v17 = vunpack.c.l.b16 %v592_v15  ;;  %v594_v22 = vpack.c.bf16 %v562_v20, %v562_v20  ;;  %v595_v23 = vpack.c.bf16 %v563_v21, %v563_v21  ;;  %v572_v13 = vld [vmem:[%s3372_s15 + $0xc0] sm:$0xff]  ;;  %v573_v14 = vld [vmem:[%s3372_s15 + $0xc8] sm:$0xff] }
  0x53   : > { %v677_v12 = vpack.c.b16 %v654_v11, %v653_v10  ;;  %v656_v18 = vunpack.c.l.b16 %v593_v16  ;;  %v596_v29 = vpack.c.bf16 %v564_v27, %v564_v27  ;;  %v597_v30 = vpack.c.bf16 %v565_v28, %v565_v28 }
  0x54   : > { %v657_v24 = vunpack.c.l.b16 %v594_v22  ;;  %v658_v25 = vunpack.c.l.b16 %v595_v23  ;;  %v598_v36 = vpack.c.bf16 %v566_v34, %v566_v34  ;;  %v599_v37 = vpack.c.bf16 %v567_v35, %v567_v35 }
  0x55   : > { %v678_v19 = vpack.c.b16 %v656_v18, %v655_v17  ;;  %v659_v31 = vunpack.c.l.b16 %v596_v29  ;;  %v660_v32 = vunpack.c.l.b16 %v597_v30  ;;  %v600_v43 = vpack.c.bf16 %v568_v41, %v568_v41 }
  0x56   : > { %v679_v26 = vpack.c.b16 %v658_v25, %v657_v24  ;;  %v661_v38 = vunpack.c.l.b16 %v598_v36  ;;  %v662_v39 = vunpack.c.l.b16 %v599_v37  ;;  %v601_v44 = vpack.c.bf16 %v569_v42, %v569_v42 }
  0x57   : > { %v680_v33 = vpack.c.b16 %v660_v32, %v659_v31  ;;  %v663_v45 = vunpack.c.l.b16 %v600_v43  ;;  %v602_v59 = vpack.c.bf16 %v570_v52, %v570_v52  ;;  %v604_v17 = vpack.c.bf16 %v572_v13, %v572_v13 }
  0x58   : > { %v681_v40 = vpack.c.b16 %v662_v39, %v661_v38  ;;  %v664_v46 = vunpack.c.l.b16 %v601_v44  ;;  %v605_v22 = vpack.c.bf16 %v573_v14, %v573_v14  ;;  %v574_v39 = vld [vmem:[%s3372_s15 + $0xd0] sm:$0xff] }
  0x59   : > { %v665_v0 = vunpack.c.l.b16 %v602_v59  ;;  %v606_v43 = vpack.c.bf16 %v574_v39, %v574_v39 }
  0x5a   : > { %v3420_v48 = vpack.c.b16 %v664_v46, %v663_v45  ;;  %v668_v27 = vunpack.c.l.b16 %v605_v22  ;;  %v3059_v22 = vld [vmem:[%s4358_s3 + $0x20] sm:$0xff] }
  0x60   : > { %2754 = vmatmul.msk.bf16.gmra.mxu0 %vm693_vm0, %v674_v55 }
  0x61   : > { %2772 = vmatmul.msk.bf16.gmra.mxu1 %vm693_vm0, %v673_v53  ;;  %v571_v53 = vld [vmem:[%s3372_s15 + $0xb8] sm:$0xff] }
  0x62   : > { %2792 = vmatmul.msk.bf16.gmra.mxu2 %vm693_vm0, %v675_v62  ;;  %v603_v60 = vpack.c.bf16 %v571_v53, %v571_v53 }
  0x64   : > { %v666_v1 = vunpack.c.l.b16 %v603_v60 }
  0x66   : > { %v3440_v6 = vpack.c.b16 %v666_v1, %v665_v0 }
  0x70   : > { %2755 = vmatmul.msk.bf16.gmra.mxu0 %vm693_vm0, %v675_v62 }
  0x71   : > { %2773 = vmatmul.msk.bf16.gmra.mxu1 %vm693_vm0, %v674_v55  ;;  %v3057_v55 = vld [vmem:[%s4358_s3 + $0x10] sm:$0xff] }
  0x72   : > { %2793 = vmatmul.msk.bf16.gmra.mxu2 %vm693_vm0, %v676_v5  ;;  %1245 = vmatpush.bf16.msra.mxu3 %v3057_v55 }
  0x76   : > { %1333 = vmatpush.bf16.msrb.mxu3 %v3056_v7 }
  0x80   : > { %2756 = vmatmul.msk.bf16.gmra.mxu0 %vm693_vm0, %v676_v5 }
  0x81   : > { %2774 = vmatmul.msk.bf16.gmra.mxu1 %vm693_vm0, %v675_v62 }
  0x82   : > { %2794 = vmatmul.msk.bf16.gmra.mxu2 %vm693_vm0, %v677_v12 }
  0x90   : > { %2757 = vmatmul.msk.bf16.gmra.mxu0 %vm693_vm0, %v677_v12 }
  0x91   : > { %2775 = vmatmul.msk.bf16.gmra.mxu1 %vm693_vm0, %v676_v5 }
  0x92   : > { %2795 = vmatmul.msk.bf16.gmra.mxu2 %vm693_vm0, %v678_v19 }
  0xa0   : > { %2758 = vmatmul.msk.bf16.gmra.mxu0 %vm693_vm0, %v678_v19 }
  0xa1   : > { %2776 = vmatmul.msk.bf16.gmra.mxu1 %vm693_vm0, %v677_v12 }
  0xa2   : > { %2796 = vmatmul.msk.bf16.gmra.mxu2 %vm693_vm0, %v679_v26 }
  0xb0   : > { %2759 = vmatmul.msk.bf16.gmra.mxu0 %vm693_vm0, %v679_v26 }
  0xb1   : > { %2777 = vmatmul.msk.bf16.gmra.mxu1 %vm693_vm0, %v678_v19 }
  0xb2   : > { %2797 = vmatmul.msk.bf16.gmra.mxu2 %vm693_vm0, %v680_v33 }
  0xc0   : > { %2760 = vmatmul.msk.bf16.gmra.mxu0 %vm693_vm0, %v680_v33 }
  0xc1   : > { %2778 = vmatmul.msk.bf16.gmra.mxu1 %vm693_vm0, %v679_v26  ;;  %v667_v26 = vunpack.c.l.b16 %v604_v17 }
  0xc2   : > { %2798 = vmatmul.msk.bf16.gmra.mxu2 %vm693_vm0, %v681_v40 }
  0xcd   : > { %v745_v47 = vpop.f32.mrf.mxu0 }
  0xce   : > { %v838_v49 = vpop.f32.mrf.mxu1 }
  0xcf   : > { %v839_v50 = vadd.f32 %v838_v49, %v745_v47 }
  0xd0   : > { %2761 = vmatmul.msk.bf16.gmra.mxu0 %vm693_vm0, %v681_v40 }
  0xd1   : > { %2779 = vmatmul.msk.bf16.gmra.mxu1 %vm693_vm0, %v680_v33  ;;  %v3456_v33 = vpack.c.b16 %v668_v27, %v667_v26 }
  0xd2   : > { %2799 = vmatmul.msk.bf16.gmra.mxu2 %vm693_vm0, %v3420_v48 }
  0xd5   : > { %v934_v54 = vpop.f32.mrf.mxu2  ;;  %v747_v58 = vpop.f32.mrf.mxu0 }
  0xd6   : > { %v1004_v56 = vadd.f32 %v934_v54, %v839_v50  ;;  %v840_v61 = vpop.f32.mrf.mxu1 }
  0xd7   : > { %v841_v62 = vadd.f32 %v840_v61, %v747_v58 }
  0xd8   : > { %v1036_v63 = vadd.f32 %v3437_v57, %v1004_v56 }
  0xda   : > { %v1064_v3 = vmax.f32 %v1036_v63, 0.0 }
  0xdc   : > { %v1092_v10 = vpack.c.bf16 %v1064_v3, %v1064_v3  ;;  %v577_v3 = vld [vmem:[%s3372_s15 + $0xe8] sm:$0xff] }
  0xdd   : > { %v936_v2 = vpop.f32.mrf.mxu2  ;;  %v750_v5 = vpop.f32.mrf.mxu0 }
  0xde   : > { %v1005_v4 = vadd.f32 %v936_v2, %v841_v62  ;;  %v843_v8 = vpop.f32.mrf.mxu1  ;;  %v1309_v18 = vunpack.c.l.b16 %v1092_v10  ;;  %v576_v2 = vld [vmem:[%s3372_s15 + $0xe0] sm:$0xff] }
  0xdf   : > { %v844_v12 = vadd.f32 %v843_v8, %v750_v5  ;;  %v608_v7 = vpack.c.bf16 %v576_v2, %v576_v2 }
  0xe0   : > { %v1037_v9 = vadd.f32 %v3437_v57, %v1005_v4  ;;  %2762 = vmatmul.msk.bf16.gmra.mxu0 %vm693_vm0, %v3420_v48 }
  0xe1   : > { %2780 = vmatmul.msk.bf16.gmra.mxu1 %vm693_vm0, %v681_v40  ;;  %v575_v40 = vld [vmem:[%s3372_s15 + $0xd8] sm:$0xff] }
  0xe2   : > { %v1065_v11 = vmax.f32 %v1037_v9, 0.0  ;;  %2800 = vmatmul.msk.bf16.gmra.mxu2 %vm693_vm0, %v3440_v6  ;;  %v607_v49 = vpack.c.bf16 %v575_v40, %v575_v40 }
  0xe4   : > { %v1093_v15 = vpack.c.bf16 %v1065_v11, %v1065_v11  ;;  %v670_v53 = vunpack.c.l.b16 %v607_v49 }
  0xe5   : > { %v939_v16 = vpop.f32.mrf.mxu2  ;;  %v752_v21 = vpop.f32.mrf.mxu0 }
  0xe6   : > { %v1310_v19 = vunpack.c.l.b16 %v1093_v15  ;;  %v1006_v20 = vadd.f32 %v939_v16, %v844_v12  ;;  %v845_v23 = vpop.f32.mrf.mxu1  ;;  %v609_v12 = vpack.c.bf16 %v577_v3, %v577_v3  ;;  %v3064_v15 = vld [vmem:[%s4359_s4 + $0x18] sm:$0xff]  ;;  %v3062_v16 = vld [vmem:[%s4359_s4 + $0x8] sm:$0xff] }
  0xe7   : > { %v846_v28 = vadd.f32 %v845_v23, %v752_v21  ;;  %1541 = vmatpush.bf16.msrb.mxu1 %v3064_v15  ;;  %1622 = vmatpush.bf16.msrb.mxu2 %v3062_v16  ;;  %v3063_v23 = vld [vmem:[%s4359_s4 + $0x10] sm:$0xff] }
  0xe8   : > { %v3453_v24 = vpack.c.b16 %v1310_v19, %v1309_v18  ;;  %v1038_v25 = vadd.f32 %v3437_v57, %v1006_v20  ;;  %v671_v18 = vunpack.c.l.b16 %v608_v7  ;;  %v672_v19 = vunpack.c.l.b16 %v609_v12 }
  0xea   : > { %v1066_v30 = vmax.f32 %v1038_v25, 0.0  ;;  %v3061_v25 = vld [vmem:[%s4359_s4] sm:$0xff] }
  0xeb   : > { %1542 = vmatpush.bf16.msrb.mxu1 %v3063_v23  ;;  %1623 = vmatpush.bf16.msrb.mxu2 %v3061_v25 }
  0xec   : > { %v1094_v36 = vpack.c.bf16 %v1066_v30, %v1066_v30 }
  0xed   : > { %v941_v29 = vpop.f32.mrf.mxu2  ;;  %v755_v32 = vpop.f32.mrf.mxu0 }
  0xee   : > { %v1007_v31 = vadd.f32 %v941_v29, %v846_v28  ;;  %v848_v34 = vpop.f32.mrf.mxu1  ;;  %v1153_v44 = vunpack.c.l.b16 %v1094_v36  ;;  %v686_v29 = vpack.c.b16 %v672_v19, %v671_v18  ;;  %v578_v36 = vld [vmem:[%s3372_s15 + $0xf0] sm:$0xff] }
  0xef   : > { %v849_v38 = vadd.f32 %v848_v34, %v755_v32  ;;  %v610_v40 = vpack.c.bf16 %v578_v36, %v578_v36 }
  0xf0   : > { %v1039_v35 = vadd.f32 %v3437_v57, %v1007_v31  ;;  %2763 = vmatmul.msk.bf16.gmra.mxu0 %vm693_vm0, %v3440_v6 }
  0xf1   : > { %2781 = vmatmul.msk.bf16.gmra.mxu1 %vm693_vm0, %v3420_v48  ;;  %v669_v48 = vunpack.c.l.b16 %v606_v43 }
  0xf2   : > { %v1067_v37 = vmax.f32 %v1039_v35, 0.0  ;;  %2801 = vmatmul.msk.bf16.gmra.mxu2 %vm693_vm0, %v3456_v33 }
  0xf3   : > { %v3472_v60 = vpack.c.b16 %v670_v53, %v669_v48 }
  0xf4   : > { %v1095_v41 = vpack.c.bf16 %v1067_v37, %v1067_v37  ;;  %v579_v37 = vld [vmem:[%s3372_s15 + $0xf8] sm:$0xff]  ;;  %s4271_s15 = scalar_lea.vmem [#allocation3], %s3075_s22 }
  0xf5   : > { %v944_v42 = vpop.f32.mrf.mxu2  ;;  %v757_v47 = vpop.f32.mrf.mxu0 }
  0xf6   : > { %v1154_v45 = vunpack.c.l.b16 %v1095_v41  ;;  %v1008_v46 = vadd.f32 %v944_v42, %v849_v38  ;;  %v850_v50 = vpop.f32.mrf.mxu1 }
  0xf7   : > { %v851_v54 = vadd.f32 %v850_v50, %v757_v47 }
  0xf8   : > { %v3467_v51 = vpack.c.b16 %v1154_v45, %v1153_v44  ;;  %v1040_v52 = vadd.f32 %v3437_v57, %v1008_v46  ;;  %v611_v45 = vpack.c.bf16 %v579_v37, %v579_v37 }
  0xfa   : > { %2817 = vmatmul.msk.bf16.vlgmr.msra.gmra.mxu3 %vm1201_vm1, %v3467_v51  ;;  %v1068_v56 = vmax.f32 %v1040_v52, 0.0  ;;  %v914_v50 = vunpack.c.l.b16 %v611_v45 }
  0xfc   : > { %v1096_v63 = vpack.c.bf16 %v1068_v56, %v1068_v56 }
  0xfd   : > { %v946_v55 = vpop.f32.mrf.mxu2  ;;  %v760_v59 = vpop.f32.mrf.mxu0 }
  0xfe   : > { %v1009_v58 = vadd.f32 %v946_v55, %v851_v54  ;;  %v853_v61 = vpop.f32.mrf.mxu1  ;;  %v1155_v8 = vunpack.c.l.b16 %v1096_v63 }
  0xff   : > { %v854_v1 = vadd.f32 %v853_v61, %v760_v59 }
 0x100   : > { %v1041_v62 = vadd.f32 %v3437_v57, %v1009_v58  ;;  %2764 = vmatmul.msk.bf16.gmra.mxu0 %vm693_vm0, %v3456_v33 }
 0x101   : > { %2782 = vmatmul.msk.bf16.gmra.mxu1 %vm693_vm0, %v3440_v6  ;;  %v3060_v6 = vld [vmem:[%s4358_s3 + $0x28] sm:$0xff] }
 0x102   : > { %v1069_v0 = vmax.f32 %v1041_v62, 0.0  ;;  %2802 = vmatmul.msk.bf16.gmra.mxu2 %vm693_vm0, %v3472_v60  ;;  %1427 = vmatpush.bf16.msrb.mxu0 %v3060_v6 }
 0x104   : > { %v1097_v4 = vpack.c.bf16 %v1069_v0, %v1069_v0 }
 0x105   : > { %v949_v5 = vpop.f32.mrf.mxu2  ;;  %v762_v11 = vpop.f32.mrf.mxu0 }
 0x106   : > { %v1156_v9 = vunpack.c.l.b16 %v1097_v4  ;;  %v1010_v10 = vadd.f32 %v949_v5, %v854_v1  ;;  %v855_v13 = vpop.f32.mrf.mxu1  ;;  %1428 = vmatpush.bf16.msrb.mxu0 %v3059_v22 }
 0x107   : > { %v856_v20 = vadd.f32 %v855_v13, %v762_v11 }
 0x108   : > { %v3483_v14 = vpack.c.b16 %v1156_v9, %v1155_v8  ;;  %v1042_v17 = vadd.f32 %v3437_v57, %v1010_v10 }
 0x10a   : > { %2818 = vmatmul.msk.bf16.gmra.mxu3 %vm1201_vm1, %v3483_v14  ;;  %v1070_v26 = vmax.f32 %v1042_v17, 0.0 }
 0x10c   : > { %v1098_v32 = vpack.c.bf16 %v1070_v26, %v1070_v26 }
 0x10d   : > { %v951_v21 = vpop.f32.mrf.mxu2  ;;  %v765_v28 = vpop.f32.mrf.mxu0 }
 0x10e   : > { %v1011_v27 = vadd.f32 %v951_v21, %v856_v20  ;;  %v858_v30 = vpop.f32.mrf.mxu1  ;;  %v1157_v41 = vunpack.c.l.b16 %v1098_v32 }
 0x10f   : > { %v859_v35 = vadd.f32 %v858_v30, %v765_v28 }
 0x110   : > { %v1043_v31 = vadd.f32 %v3437_v57, %v1011_v27  ;;  %2765 = vmatmul.msk.bf16.gmra.mxu0 %vm693_vm0, %v3472_v60 }
 0x111   : > { %2783 = vmatmul.msk.bf16.gmra.mxu1 %vm693_vm0, %v3456_v33  ;;  %v913_v33 = vunpack.c.l.b16 %v610_v40 }
 0x112   : > { %v1071_v34 = vmax.f32 %v1043_v31, 0.0  ;;  %2803 = vmatmul.msk.bf16.gmra.mxu2 %vm693_vm0, %v686_v29 }
 0x113   : > { %v915_v56 = vpack.c.b16 %v914_v50, %v913_v33 }
 0x114   : > { %v1099_v38 = vpack.c.bf16 %v1071_v34, %v1071_v34 }
 0x115   : > { %v954_v39 = vpop.f32.mrf.mxu2  ;;  %v767_v44 = vpop.f32.mrf.mxu0 }
 0x116   : > { %v1158_v42 = vunpack.c.l.b16 %v1099_v38  ;;  %v1012_v43 = vadd.f32 %v954_v39, %v859_v35  ;;  %v860_v46 = vpop.f32.mrf.mxu1  ;;  %v3055_v35 = vld [vmem:[%s4358_s3] sm:$0xff] }
 0x117   : > { %v861_v52 = vadd.f32 %v860_v46, %v767_v44  ;;  %1334 = vmatpush.bf16.msrb.mxu3 %v3055_v35 }
 0x118   : > { %v3514_v47 = vpack.c.b16 %v1158_v42, %v1157_v41  ;;  %v1044_v49 = vadd.f32 %v3437_v57, %v1012_v43 }
 0x11a   : > { %2819 = vmatmul.msk.bf16.gmra.mxu3 %vm1201_vm1, %v3514_v47  ;;  %v1072_v53 = vmax.f32 %v1044_v49, 0.0 }
 0x11c   : > { %v1100_v61 = vpack.c.bf16 %v1072_v53, %v1072_v53 }
 0x11d   : > { %v956_v48 = vpop.f32.mrf.mxu2  ;;  %v770_v55 = vpop.f32.mrf.mxu0 }
 0x11e   : > { %v1013_v54 = vadd.f32 %v956_v48, %v861_v52  ;;  %v863_v58 = vpop.f32.mrf.mxu1  ;;  %v1159_v2 = vunpack.c.l.b16 %v1100_v61 }
 0x11f   : > { %v864_v63 = vadd.f32 %v863_v58, %v770_v55 }
 0x120   : > { %v1045_v59 = vadd.f32 %v3437_v57, %v1013_v54  ;;  %2766 = vmatmul.msk.bf16.gmra.mxu0 %vm693_vm0, %v686_v29 }
 0x121   : > { %2784 = vmatmul.msk.bf16.gmra.mxu1 %vm693_vm0, %v3472_v60 }
 0x122   : > { %v1073_v62 = vmax.f32 %v1045_v59, 0.0  ;;  %2804 = vmatmul.msk.bf16.gmra.mxu2 %vm693_vm0, %v915_v56 }
 0x124   : > { %v1101_v0 = vpack.c.bf16 %v1073_v62, %v1073_v62 }
 0x125   : > { %v959_v1 = vpop.f32.mrf.mxu2  ;;  %v772_v5 = vpop.f32.mrf.mxu0 }
 0x126   : > { %v1160_v3 = vunpack.c.l.b16 %v1101_v0  ;;  %v1014_v4 = vadd.f32 %v959_v1, %v864_v63  ;;  %v865_v7 = vpop.f32.mrf.mxu1 }
 0x127   : > { %v866_v10 = vadd.f32 %v865_v7, %v772_v5 }
 0x128   : > { %v3524_v8 = vpack.c.b16 %v1160_v3, %v1159_v2  ;;  %v1046_v9 = vadd.f32 %v3437_v57, %v1014_v4 }
 0x12a   : > { %2820 = vmatmul.msk.bf16.gmra.mxu3 %vm1201_vm1, %v3524_v8  ;;  %v1074_v12 = vmax.f32 %v1046_v9, 0.0 }
 0x12c   : > { %v1102_v16 = vpack.c.bf16 %v1074_v12, %v1074_v12 }
 0x12d   : > { %v961_v11 = vpop.f32.mrf.mxu2  ;;  %v775_v13 = vpop.f32.mrf.mxu0 }
 0x12e   : > { %v1015_v60 = vadd.f32 %v961_v11, %v866_v10  ;;  %v868_v6 = vpop.f32.mrf.mxu1  ;;  %v1161_v21 = vunpack.c.l.b16 %v1102_v16 }
 0x12f   : > { %v869_v18 = vadd.f32 %v868_v6, %v775_v13 }
 0x130   : > { %v1047_v15 = vadd.f32 %v3437_v57, %v1015_v60  ;;  %2861 = vmatmul.msk.bf16.vlgmr.msrb.gmra.mxu0 %vm1201_vm1, %v3483_v14 }
 0x131   : > { %2885 = vmatmul.msk.bf16.vlgmr.msrb.gmra.mxu1 %vm1201_vm1, %v3467_v51 }
 0x132   : > { %v1075_v17 = vmax.f32 %v1047_v15, 0.0  ;;  %2905 = vmatmul.msk.bf16.vlgmr.msrb.gmra.mxu2 %vm1201_vm1, %v3453_v24 }
 0x134   : > { %v1103_v19 = vpack.c.bf16 %v1075_v17, %v1075_v17 }
 0x135   : > { %v964_v20 = vpop.f32.mrf.mxu2  ;;  %v777_v25 = vpop.f32.mrf.mxu0 }
 0x136   : > { %v1162_v22 = vunpack.c.l.b16 %v1103_v19  ;;  %v1016_v23 = vadd.f32 %v964_v20, %v869_v18  ;;  %v870_v26 = vpop.f32.mrf.mxu1 }
 0x137   : > { %v871_v29 = vadd.f32 %v870_v26, %v777_v25 }
 0x138   : > { %v3536_v27 = vpack.c.b16 %v1162_v22, %v1161_v21  ;;  %v1048_v28 = vadd.f32 %v3437_v57, %v1016_v23 }
 0x13a   : > { %2821 = vmatmul.msk.bf16.gmra.mxu3 %vm1201_vm1, %v3536_v27  ;;  %v1076_v31 = vmax.f32 %v1048_v28, 0.0 }
 0x13c   : > { %v1104_v38 = vpack.c.bf16 %v1076_v31, %v1076_v31 }
 0x13d   : > { %v966_v30 = vpop.f32.mrf.mxu2  ;;  %v780_v34 = vpop.f32.mrf.mxu0 }
 0x13e   : > { %v1017_v32 = vadd.f32 %v966_v30, %v871_v29  ;;  %v873_v36 = vpop.f32.mrf.mxu1  ;;  %v1163_v43 = vunpack.c.l.b16 %v1104_v38 }
 0x13f   : > { %v874_v40 = vadd.f32 %v873_v36, %v780_v34 }
 0x140   : > { %v1049_v37 = vadd.f32 %v3437_v57, %v1017_v32  ;;  %2862 = vmatmul.msk.bf16.gmra.mxu0 %vm1201_vm1, %v3514_v47 }
 0x141   : > { %2886 = vmatmul.msk.bf16.gmra.mxu1 %vm1201_vm1, %v3483_v14 }
 0x142   : > { %v1077_v39 = vmax.f32 %v1049_v37, 0.0  ;;  %2906 = vmatmul.msk.bf16.gmra.mxu2 %vm1201_vm1, %v3467_v51 }
 0x144   : > { %v1105_v41 = vpack.c.bf16 %v1077_v39, %v1077_v39 }
 0x145   : > { %v969_v42 = vpop.f32.mrf.mxu2  ;;  %v782_v46 = vpop.f32.mrf.mxu0 }
 0x146   : > { %v1164_v44 = vunpack.c.l.b16 %v1105_v41  ;;  %v1018_v45 = vadd.f32 %v969_v42, %v874_v40  ;;  %v875_v49 = vpop.f32.mrf.mxu1 }
 0x147   : > { %v876_v52 = vadd.f32 %v875_v49, %v782_v46 }
 0x148   : > { %v3551_v33 = vpack.c.b16 %v1164_v44, %v1163_v43  ;;  %v1050_v50 = vadd.f32 %v3437_v57, %v1018_v45 }
 0x14a   : > { %2822 = vmatmul.msk.bf16.gmra.mxu3 %vm1201_vm1, %v3551_v33  ;;  %v1078_v53 = vmax.f32 %v1050_v50, 0.0 }
 0x14c   : > { %v1106_v59 = vpack.c.bf16 %v1078_v53, %v1078_v53 }
 0x14d   : > { %v971_v48 = vpop.f32.mrf.mxu2  ;;  %v785_v55 = vpop.f32.mrf.mxu0 }
 0x14e   : > { %v1019_v54 = vadd.f32 %v971_v48, %v876_v52  ;;  %v878_v56 = vpop.f32.mrf.mxu1  ;;  %v1165_v1 = vunpack.c.l.b16 %v1106_v59 }
 0x14f   : > { %v879_v62 = vadd.f32 %v878_v56, %v785_v55 }
 0x150   : > { %v1051_v58 = vadd.f32 %v3437_v57, %v1019_v54  ;;  %2863 = vmatmul.msk.bf16.gmra.mxu0 %vm1201_vm1, %v3524_v8 }
 0x151   : > { %2887 = vmatmul.msk.bf16.gmra.mxu1 %vm1201_vm1, %v3514_v47 }
 0x152   : > { %v1079_v61 = vmax.f32 %v1051_v58, 0.0  ;;  %2907 = vmatmul.msk.bf16.gmra.mxu2 %vm1201_vm1, %v3483_v14 }
 0x154   : > { %v1107_v63 = vpack.c.bf16 %v1079_v61, %v1079_v61 }
 0x155   : > { %v974_v0 = vpop.f32.mrf.mxu2  ;;  %v787_v4 = vpop.f32.mrf.mxu0 }
 0x156   : > { %v1166_v2 = vunpack.c.l.b16 %v1107_v63  ;;  %v1020_v3 = vadd.f32 %v974_v0, %v879_v62  ;;  %v880_v5 = vpop.f32.mrf.mxu1 }
 0x157   : > { %v881_v10 = vadd.f32 %v880_v5, %v787_v4 }
 0x158   : > { %v3563_v7 = vpack.c.b16 %v1166_v2, %v1165_v1  ;;  %v1052_v9 = vadd.f32 %v3437_v57, %v1020_v3 }
 0x15a   : > { %2823 = vmatmul.msk.bf16.gmra.mxu3 %vm1201_vm1, %v3563_v7  ;;  %v1080_v12 = vmax.f32 %v1052_v9, 0.0 }
 0x15c   : > { %v1108_v16 = vpack.c.bf16 %v1080_v12, %v1080_v12 }
 0x15d   : > { %v976_v11 = vpop.f32.mrf.mxu2  ;;  %v790_v13 = vpop.f32.mrf.mxu0 }
 0x15e   : > { %v1021_v60 = vadd.f32 %v976_v11, %v881_v10  ;;  %v883_v6 = vpop.f32.mrf.mxu1  ;;  %v1167_v21 = vunpack.c.l.b16 %v1108_v16 }
 0x15f   : > { %v884_v18 = vadd.f32 %v883_v6, %v790_v13 }
 0x160   : > { %v1053_v15 = vadd.f32 %v3437_v57, %v1021_v60  ;;  %2864 = vmatmul.msk.bf16.gmra.mxu0 %vm1201_vm1, %v3536_v27 }
 0x161   : > { %2888 = vmatmul.msk.bf16.gmra.mxu1 %vm1201_vm1, %v3524_v8 }
 0x162   : > { %v1081_v17 = vmax.f32 %v1053_v15, 0.0  ;;  %2908 = vmatmul.msk.bf16.gmra.mxu2 %vm1201_vm1, %v3514_v47 }
 0x164   : > { %v1109_v19 = vpack.c.bf16 %v1081_v17, %v1081_v17 }
 0x165   : > { %v979_v20 = vpop.f32.mrf.mxu2  ;;  %v792_v25 = vpop.f32.mrf.mxu0 }
 0x166   : > { %v1168_v22 = vunpack.c.l.b16 %v1109_v19  ;;  %v1022_v23 = vadd.f32 %v979_v20, %v884_v18  ;;  %v885_v26 = vpop.f32.mrf.mxu1 }
 0x167   : > { %v886_v30 = vadd.f32 %v885_v26, %v792_v25 }
 0x168   : > { %v3575_v28 = vpack.c.b16 %v1168_v22, %v1167_v21  ;;  %v1054_v29 = vadd.f32 %v3437_v57, %v1022_v23 }
 0x16a   : > { %2824 = vmatmul.msk.bf16.gmra.mxu3 %vm1201_vm1, %v3575_v28  ;;  %v1082_v32 = vmax.f32 %v1054_v29, 0.0 }
 0x16c   : > { %v1110_v38 = vpack.c.bf16 %v1082_v32, %v1082_v32 }
 0x16d   : > { %v981_v31 = vpop.f32.mrf.mxu2  ;;  %v795_v35 = vpop.f32.mrf.mxu0 }
 0x16e   : > { %v1023_v34 = vadd.f32 %v981_v31, %v886_v30  ;;  %v888_v36 = vpop.f32.mrf.mxu1  ;;  %v1169_v43 = vunpack.c.l.b16 %v1110_v38  ;;  %v3066_v38 = vld [vmem:[%s4359_s4 + $0x28] sm:$0xff] }
 0x16f   : > { %v889_v40 = vadd.f32 %v888_v36, %v795_v35  ;;  %1708 = vmatpush.bf16.msra.mxu3 %v3066_v38 }
 0x170   : > { %v1055_v37 = vadd.f32 %v3437_v57, %v1023_v34  ;;  %2865 = vmatmul.msk.bf16.gmra.mxu0 %vm1201_vm1, %v3551_v33 }
 0x171   : > { %2889 = vmatmul.msk.bf16.gmra.mxu1 %vm1201_vm1, %v3536_v27 }
 0x172   : > { %v1083_v39 = vmax.f32 %v1055_v37, 0.0  ;;  %2909 = vmatmul.msk.bf16.gmra.mxu2 %vm1201_vm1, %v3524_v8 }
 0x174   : > { %v1111_v41 = vpack.c.bf16 %v1083_v39, %v1083_v39 }
 0x175   : > { %v984_v42 = vpop.f32.mrf.mxu2  ;;  %v797_v46 = vpop.f32.mrf.mxu0 }
 0x176   : > { %v1170_v44 = vunpack.c.l.b16 %v1111_v41  ;;  %v1024_v45 = vadd.f32 %v984_v42, %v889_v40  ;;  %v890_v49 = vpop.f32.mrf.mxu1 }
 0x177   : > { %v891_v48 = vadd.f32 %v890_v49, %v797_v46 }
 0x178   : > { %v3587_v50 = vpack.c.b16 %v1170_v44, %v1169_v43  ;;  %v1056_v52 = vadd.f32 %v3437_v57, %v1024_v45 }
 0x17a   : > { %2825 = vmatmul.msk.bf16.gmra.mxu3 %vm1201_vm1, %v3587_v50  ;;  %v1084_v55 = vmax.f32 %v1056_v52, 0.0 }
 0x17c   : > { %v1112_v62 = vpack.c.bf16 %v1084_v55, %v1084_v55 }
 0x17d   : > { %v986_v53 = vpop.f32.mrf.mxu2  ;;  %v3592_v54 = vpop.f32.mrf.mxu3 }
 0x17e   : > { %v1025_v56 = vadd.f32 %v986_v53, %v891_v48  ;;  %v800_v58 = vpop.f32.mrf.mxu0  ;;  %v893_v59 = vpop.f32.mrf.mxu1  ;;  %v1171_v4 = vunpack.c.l.b16 %v1112_v62 }
 0x17f   : > { %v894_v0 = vadd.f32 %v893_v59, %v800_v58 }
 0x180   : > { %v1057_v61 = vadd.f32 %v3437_v57, %v1025_v56  ;;  %2866 = vmatmul.msk.bf16.gmra.mxu0 %vm1201_vm1, %v3563_v7 }
 0x181   : > { %2890 = vmatmul.msk.bf16.gmra.mxu1 %vm1201_vm1, %v3551_v33 }
 0x182   : > { %v1085_v63 = vmax.f32 %v1057_v61, 0.0  ;;  %2910 = vmatmul.msk.bf16.gmra.mxu2 %vm1201_vm1, %v3536_v27 }
 0x184   : > { %v1113_v1 = vpack.c.bf16 %v1085_v63, %v1085_v63 }
 0x185   : > { %v989_v2 = vpop.f32.mrf.mxu2  ;;  %v3601_v3 = vpop.f32.mrf.mxu3 }
 0x186   : > { %v1172_v5 = vunpack.c.l.b16 %v1113_v1  ;;  %v1026_v9 = vadd.f32 %v989_v2, %v894_v0  ;;  %v802_v10 = vpop.f32.mrf.mxu0  ;;  %v895_v11 = vpop.f32.mrf.mxu1 }
 0x187   : > { %v896_v13 = vadd.f32 %v895_v11, %v802_v10 }
 0x188   : > { %v3603_v12 = vpack.c.b16 %v1172_v5, %v1171_v4  ;;  %v1058_v60 = vadd.f32 %v3437_v57, %v1026_v9 }
 0x18a   : > { %2826 = vmatmul.msk.bf16.gmra.mxu3 %vm1201_vm1, %v3603_v12  ;;  %v1086_v16 = vmax.f32 %v1058_v60, 0.0 }
 0x18c   : > { %v1114_v21 = vpack.c.bf16 %v1086_v16, %v1086_v16 }
 0x18d   : > { %v991_v6 = vpop.f32.mrf.mxu2  ;;  %v3608_v15 = vpop.f32.mrf.mxu3 }
 0x18e   : > { %v1027_v17 = vadd.f32 %v991_v6, %v896_v13  ;;  %v805_v18 = vpop.f32.mrf.mxu0  ;;  %v898_v19 = vpop.f32.mrf.mxu1  ;;  %v1173_v30 = vunpack.c.l.b16 %v1114_v21 }
 0x18f   : > { %v899_v23 = vadd.f32 %v898_v19, %v805_v18 }
 0x190   : > { %v1059_v20 = vadd.f32 %v3437_v57, %v1027_v17  ;;  %2867 = vmatmul.msk.bf16.gmra.mxu0 %vm1201_vm1, %v3575_v28 }
 0x191   : > { %2891 = vmatmul.msk.bf16.gmra.mxu1 %vm1201_vm1, %v3563_v7 }
 0x192   : > { %v1087_v22 = vmax.f32 %v1059_v20, 0.0  ;;  %2911 = vmatmul.msk.bf16.gmra.mxu2 %vm1201_vm1, %v3551_v33 }
 0x194   : > { %v1115_v25 = vpack.c.bf16 %v1087_v22, %v1087_v22 }
 0x195   : > { %v994_v26 = vpop.f32.mrf.mxu2  ;;  %v3617_v29 = vpop.f32.mrf.mxu3 }
 0x196   : > { %v1174_v31 = vunpack.c.l.b16 %v1115_v25  ;;  %v1028_v32 = vadd.f32 %v994_v26, %v899_v23  ;;  %v807_v35 = vpop.f32.mrf.mxu0  ;;  %v900_v36 = vpop.f32.mrf.mxu1  ;;  %v3065_v26 = vld [vmem:[%s4359_s4 + $0x20] sm:$0xff] }
 0x197   : > { %v901_v39 = vadd.f32 %v900_v36, %v807_v35  ;;  %1709 = vmatpush.bf16.msra.mxu3 %v3065_v26 }
 0x198   : > { %v3619_v34 = vpack.c.b16 %v1174_v31, %v1173_v30  ;;  %v1060_v37 = vadd.f32 %v3437_v57, %v1028_v32 }
 0x19a   : > { %2827 = vmatmul.msk.bf16.gmra.mxu3 %vm1201_vm1, %v3619_v34  ;;  %v1088_v42 = vmax.f32 %v1060_v37, 0.0 }
 0x19c   : > { %v1116_v45 = vpack.c.bf16 %v1088_v42, %v1088_v42 }
 0x19d   : > { %v996_v40 = vpop.f32.mrf.mxu2  ;;  %v3627_v41 = vpop.f32.mrf.mxu3 }
 0x19e   : > { %v1029_v43 = vadd.f32 %v996_v40, %v901_v39  ;;  %v1175_v48 = vunpack.c.l.b16 %v1116_v45  ;;  %v810_v59 = vpop.f32.mrf.mxu0  ;;  %v903_v61 = vpop.f32.mrf.mxu1 }
 0x19f   : > { %v904_v2 = vadd.f32 %v903_v61, %v810_v59 }
 0x1a0   : > { %v1061_v44 = vadd.f32 %v3437_v57, %v1029_v43  ;;  %2868 = vmatmul.msk.bf16.gmra.mxu0 %vm1201_vm1, %v3587_v50 }
 0x1a1   : > { %2892 = vmatmul.msk.bf16.gmra.mxu1 %vm1201_vm1, %v3575_v28 }
 0x1a2   : > { %v1089_v46 = vmax.f32 %v1061_v44, 0.0  ;;  %2912 = vmatmul.msk.bf16.gmra.mxu2 %vm1201_vm1, %v3563_v7  ;;  %v3069_v44 = vld [vmem:[%s4361_s6 + $0x10] sm:$0xff] }
 0x1a3   : > { %2142 = vmatpush.bf16.msra.mxu2 %v3069_v44 }
 0x1a4   : > { %v1117_v49 = vpack.c.bf16 %v1089_v46, %v1089_v46  ;;  %v3068_v46 = vld [vmem:[%s4361_s6 + $0x8] sm:$0xff] }
 0x1a5   : > { %v3636_v52 = vpop.f32.mrf.mxu3  ;;  %v999_v63 = vpop.f32.mrf.mxu2  ;;  %1993 = vmatpush.bf16.msra.mxu0 %v3068_v46 }
 0x1a6   : > { %v1176_v53 = vunpack.c.l.b16 %v1117_v49  ;;  %v812_v0 = vpop.f32.mrf.mxu0  ;;  %v905_v1 = vpop.f32.mrf.mxu1  ;;  %v3067_v49 = vld [vmem:[%s4361_s6] sm:$0xff] }
 0x1a7   : > { %v906_v4 = vadd.f32 %v905_v1, %v812_v0  ;;  %2066 = vmatpush.bf16.msra.mxu1 %v3067_v49 }
 0x1a8   : > { %v3638_v55 = vpack.c.b16 %v1176_v53, %v1175_v48 }
 0x1aa   : > { %2828 = vmatmul.msk.bf16.gmra.mxu3 %vm1201_vm1, %v3638_v55 }
 0x1ad   : > { %v3642_v56 = vpop.f32.mrf.mxu3  ;;  %v1001_v9 = vpop.f32.mrf.mxu2 }
 0x1ae   : > { %v1031_v10 = vadd.f32 %v1001_v9, %v906_v4  ;;  %v1544_v9 = vpop.f32.mrf.mxu1 }
 0x1b0   : > { %2869 = vmatmul.msk.bf16.gmra.mxu0 %vm1201_vm1, %v3603_v12  ;;  %v1063_v60 = vadd.f32 %v3437_v57, %v1031_v10 }
 0x1b1   : > { %2893 = vmatmul.msk.bf16.gmra.mxu1 %vm1201_vm1, %v3587_v50 }
 0x1b2   : > { %2913 = vmatmul.msk.bf16.gmra.mxu2 %vm1201_vm1, %v3575_v28  ;;  %v1091_v16 = vmax.f32 %v1063_v60, 0.0 }
 0x1b4   : > { %v1119_v18 = vpack.c.bf16 %v1091_v16, %v1091_v16 }
 0x1b5   : > { %v3650_v58 = vpop.f32.mrf.mxu3 }
 0x1b6   : > { %v1404_v20 = vunpack.c.l.b16 %v1119_v18 }
 0x1ba   : > { %2837 = vmatmul.msk.bf16.vlgmr.msrb.gmra.mxu3 %vm1201_vm1, %v3453_v24  ;;  %v1030_v24 = vadd.f32 %v999_v63, %v904_v2 }
 0x1bc   : > { %v1062_v11 = vadd.f32 %v3437_v57, %v1030_v24 }
 0x1bd   : > { %v3654_v62 = vpop.f32.mrf.mxu3 }
 0x1be   : > { %v1090_v6 = vmax.f32 %v1062_v11, 0.0  ;;  %v1430_v11 = vpop.f32.mrf.mxu0 }
 0x1c0   : > { %2870 = vmatmul.msk.bf16.gmra.mxu0 %vm1201_vm1, %v3619_v34  ;;  %v1118_v17 = vpack.c.bf16 %v1090_v6, %v1090_v6 }
 0x1c1   : > { %2894 = vmatmul.msk.bf16.gmra.mxu1 %vm1201_vm1, %v3603_v12 }
 0x1c2   : > { %2914 = vmatmul.msk.bf16.gmra.mxu2 %vm1201_vm1, %v3587_v50  ;;  %v1403_v19 = vunpack.c.l.b16 %v1118_v17 }
 0x1c4   : > { %v3680_v57 = vpack.c.b16 %v1404_v20, %v1403_v19  ;;  %v1625_v19 = vpop.f32.mrf.mxu2 }
 0x1c5   : > { %v3662_v5 = vpop.f32.mrf.mxu3 }
 0x1ca   : > { %2838 = vmatmul.msk.bf16.gmra.mxu3 %vm1201_vm1, %v3467_v51 }
 0x1cc   : > { %v1627_v44 = vpop.f32.mrf.mxu2 }
 0x1cd   : > { %v3668_v13 = vpop.f32.mrf.mxu3 }
 0x1d0   : > { %2871 = vmatmul.msk.bf16.gmra.mxu0 %vm1201_vm1, %v3638_v55 }
 0x1d1   : > { %2895 = vmatmul.msk.bf16.gmra.mxu1 %vm1201_vm1, %v3619_v34 }
 0x1d2   : > { %2915 = vmatmul.msk.bf16.gmra.mxu2 %vm1201_vm1, %v3603_v12 }
 0x1d5   : > { %v3676_v51 = vpop.f32.mrf.mxu3 }
 0x1da   : > { %2839 = vmatmul.msk.bf16.gmra.mxu3 %vm1201_vm1, %v3483_v14 }
 0x1dd   : > { %v3682_v21 = vpop.f32.mrf.mxu3 }
 0x1e0   : > { %2872 = vmatmul.msk.bf16.gmra.mxu0 %vm1201_vm1, %v3680_v57 }
 0x1e1   : > { %2896 = vmatmul.msk.bf16.gmra.mxu1 %vm1201_vm1, %v3638_v55 }
 0x1e2   : > { %2916 = vmatmul.msk.bf16.gmra.mxu2 %vm1201_vm1, %v3619_v34 }
 0x1e5   : > { %v3690_v22 = vpop.f32.mrf.mxu3 }
 0x1e6   : > { %4371 = vst [vmem:[#allocation8_spill] sm:$0xff] %v3690_v22 }
 0x1ea   : > { %2840 = vmatmul.msk.bf16.gmra.mxu3 %vm1201_vm1, %v3514_v47 }
 0x1ed   : > { %v3694_v23 = vpop.f32.mrf.mxu3 }
 0x1ee   : > { %4372 = vst [vmem:[#allocation9_spill] sm:$0xff] %v3694_v23 }
 0x1f5   : > { %v3696_v25 = vpop.f32.mrf.mxu3 }
 0x1f6   : > { %4373 = vst [vmem:[#allocation10_spill] sm:$0xff] %v3696_v25 }
 0x1fa   : > { %2841 = vmatmul.msk.bf16.gmra.mxu3 %vm1201_vm1, %v3524_v8 }
 0x1fd   : > { %v3703_v30 = vpop.f32.mrf.mxu3 }
 0x1fe   : > { %4374 = vst [vmem:[#allocation11_spill] sm:$0xff] %v3703_v30 }
 0x205   : > { %v3705_v31 = vpop.f32.mrf.mxu3 }
 0x206   : > { %4375 = vst [vmem:[#allocation12_spill] sm:$0xff] %v3705_v31 }
 0x20a   : > { %2842 = vmatmul.msk.bf16.gmra.mxu3 %vm1201_vm1, %v3536_v27 }
 0x20d   : > { %v3709_v32 = vpop.f32.mrf.mxu3 }
 0x20e   : > { %4376 = vst [vmem:[#allocation13_spill] sm:$0xff] %v3709_v32 }
 0x215   : > { %v3711_v35 = vpop.f32.mrf.mxu3 }
 0x216   : > { %4377 = vst [vmem:[#allocation14_spill] sm:$0xff] %v3711_v35 }
 0x21a   : > { %2843 = vmatmul.msk.bf16.gmra.mxu3 %vm1201_vm1, %v3551_v33 }
 0x21d   : > { %v3715_v36 = vpop.f32.mrf.mxu3 }
 0x21e   : > { %4378 = vst [vmem:[#allocation15_spill] sm:$0xff] %v3715_v36 }
 0x225   : > { %v3717_v37 = vpop.f32.mrf.mxu3 }
 0x226   : > { %4379 = vst [vmem:[#allocation16_spill] sm:$0xff] %v3717_v37 }
 0x22a   : > { %2844 = vmatmul.msk.bf16.gmra.mxu3 %vm1201_vm1, %v3563_v7 }
 0x22d   : > { %v3721_v38 = vpop.f32.mrf.mxu3 }
 0x22e   : > { %4380 = vst [vmem:[#allocation17_spill] sm:$0xff] %v3721_v38  ;;  %v1630_v38 = vpop.f32.mrf.mxu2 }
 0x235   : > { %v3723_v39 = vpop.f32.mrf.mxu3 }
 0x236   : > { %4381 = vst [vmem:[#allocation18_spill] sm:$0xff] %v3723_v39  ;;  %v1632_v35 = vpop.f32.mrf.mxu2 }
 0x23a   : > { %2845 = vmatmul.msk.bf16.gmra.mxu3 %vm1201_vm1, %v3575_v28 }
 0x23d   : > { %v1336_v40 = vpop.f32.mrf.mxu3 }
 0x23e   : > { %v1635_v32 = vpop.f32.mrf.mxu2  ;;  %v1337_v31 = vadd.f32 %v1336_v40, %v3592_v54 }
 0x245   : > { %v3727_v42 = vpop.f32.mrf.mxu3 }
 0x246   : > { %v3829_v30 = vpop.f32.mrf.mxu2  ;;  %v1339_v54 = vadd.f32 %v3727_v42, %v3601_v3 }
 0x24a   : > { %2846 = vmatmul.msk.bf16.gmra.mxu3 %vm1201_vm1, %v3587_v50 }
 0x24d   : > { %v3731_v43 = vpop.f32.mrf.mxu3 }
 0x24e   : > { %v3843_v23 = vpop.f32.mrf.mxu2 }
 0x255   : > { %v3736_v45 = vpop.f32.mrf.mxu3 }
 0x25a   : > { %2847 = vmatmul.msk.bf16.gmra.mxu3 %vm1201_vm1, %v3603_v12 }
 0x25d   : > { %v3746_v48 = vpop.f32.mrf.mxu3 }
 0x265   : > { %v3748_v53 = vpop.f32.mrf.mxu3 }
 0x26a   : > { %2848 = vmatmul.msk.bf16.gmra.mxu3 %vm1201_vm1, %v3619_v34 }
 0x26d   : > { %v3752_v59 = vpop.f32.mrf.mxu3 }
 0x275   : > { %v3754_v61 = vpop.f32.mrf.mxu3 }
 0x27a   : > { %2929 = vmatmul.msk.bf16.vlgmr.msra.gmra.mxu3 %vm1201_vm1, %v3483_v14  ;;  %v1546_v14 = vpop.f32.mrf.mxu1 }
 0x27d   : > { %v3758_v63 = vpop.f32.mrf.mxu3 }
 0x282   : > { %v1549_v60 = vpop.f32.mrf.mxu1 }
 0x283   : > { %v1631_v3 = vadd.f32 %v1630_v38, %v1549_v60 }
 0x285   : > { %v3760_v0 = vpop.f32.mrf.mxu3 }
 0x28a   : > { %2930 = vmatmul.msk.bf16.gmra.mxu3 %vm1201_vm1, %v3514_v47  ;;  %v3784_v16 = vpop.f32.mrf.mxu1 }
 0x28b   : > { %v1633_v38 = vadd.f32 %v1632_v35, %v3784_v16  ;;  %v1347_v35 = vadd.f32 %v3746_v48, %v3627_v41  ;;  %v1349_v48 = vadd.f32 %v3748_v53, %v3636_v52 }
 0x28d   : > { %v3764_v1 = vpop.f32.mrf.mxu3 }
 0x295   : > { %v3766_v2 = vpop.f32.mrf.mxu3 }
 0x29a   : > { %2931 = vmatmul.msk.bf16.gmra.mxu3 %vm1201_vm1, %v3524_v8  ;;  %v1432_v8 = vpop.f32.mrf.mxu0 }
 0x29d   : > { %v3770_v4 = vpop.f32.mrf.mxu3 }
 0x2a2   : > { %v1435_v18 = vpop.f32.mrf.mxu0 }
 0x2a5   : > { %v3772_v24 = vpop.f32.mrf.mxu3 }
 0x2a6   : > { %4382 = vst [vmem:[#allocation19_spill] sm:$0xff] %v3772_v24  ;;  %v1491_v24 = vadd.f32 %v1432_v8, %v1339_v54 }
 0x2aa   : > { %2932 = vmatmul.msk.bf16.gmra.mxu3 %vm1201_vm1, %v3536_v27  ;;  %v3790_v27 = vpop.f32.mrf.mxu1  ;;  %v3794_v26 = vpop.f32.mrf.mxu0 }
 0x2ad   : > { %v3776_v10 = vpop.f32.mrf.mxu3 }
 0x2ae   : > { %4383 = vst [vmem:[#allocation20_spill] sm:$0xff] %v3776_v10 }
 0x2b2   : > { %v3802_v49 = vpop.f32.mrf.mxu0 }
 0x2b5   : > { %v3778_v47 = vpop.f32.mrf.mxu3 }
 0x2b6   : > { %4384 = vst [vmem:[#allocation21_spill] sm:$0xff] %v3778_v47  ;;  %v1490_v47 = vadd.f32 %v1430_v11, %v1337_v31 }
 0x2ba   : > { %2933 = vmatmul.msk.bf16.gmra.mxu3 %vm1201_vm1, %v3551_v33  ;;  %v3796_v33 = vpop.f32.mrf.mxu1  ;;  %v3810_v36 = vpop.f32.mrf.mxu0 }
 0x2bd   : > { %v3782_v6 = vpop.f32.mrf.mxu3 }
 0x2be   : > { %4385 = vst [vmem:[#allocation22_spill] sm:$0xff] %v3782_v6  ;;  %v1626_v6 = vadd.f32 %v1625_v19, %v1544_v9 }
 0x2c5   : > { %v3786_v17 = vpop.f32.mrf.mxu3 }
 0x2c6   : > { %4386 = vst [vmem:[#allocation23_spill] sm:$0xff] %v3786_v17 }
 0x2ca   : > { %2934 = vmatmul.msk.bf16.gmra.mxu3 %vm1201_vm1, %v3563_v7  ;;  %v3806_v7 = vpop.f32.mrf.mxu1 }
 0x2cd   : > { %v3792_v20 = vpop.f32.mrf.mxu3 }
 0x2ce   : > { %4387 = vst [vmem:[#allocation24_spill] sm:$0xff] %v3792_v20 }
 0x2d2   : > { %v3812_v20 = vpop.f32.mrf.mxu1 }
 0x2d5   : > { %v3798_v46 = vpop.f32.mrf.mxu3 }
 0x2d6   : > { %4388 = vst [vmem:[#allocation25_spill] sm:$0xff] %v3798_v46 }
 0x2da   : > { %2935 = vmatmul.msk.bf16.gmra.mxu3 %vm1201_vm1, %v3575_v28  ;;  %v3818_v28 = vpop.f32.mrf.mxu0  ;;  %v3820_v17 = vpop.f32.mrf.mxu1 }
 0x2dd   : > { %v3804_v39 = vpop.f32.mrf.mxu3 }
 0x2de   : > { %4389 = vst [vmem:[#allocation26_spill] sm:$0xff] %v3804_v39 }
 0x2e5   : > { %v3808_v37 = vpop.f32.mrf.mxu3 }
 0x2e6   : > { %4390 = vst [vmem:[#allocation27_spill] sm:$0xff] %v3808_v37  ;;  %v3827_v37 = vpop.f32.mrf.mxu0 }
 0x2ea   : > { %2936 = vmatmul.msk.bf16.gmra.mxu3 %vm1201_vm1, %v3587_v50  ;;  %v3831_v50 = vpop.f32.mrf.mxu1 }
 0x2ed   : > { %v3816_v46 = vpop.f32.mrf.mxu3 }
 0x2ee   : > { %4391 = vst [vmem:[#allocation28_spill] sm:$0xff] %v3816_v46  ;;  %v3841_v9 = vpop.f32.mrf.mxu0 }
 0x2f2   : > { %v3845_v11 = vpop.f32.mrf.mxu1 }
 0x2f5   : > { %v3822_v39 = vpop.f32.mrf.mxu3 }
 0x2f6   : > { %4392 = vst [vmem:[#allocation29_spill] sm:$0xff] %v3822_v39  ;;  %v3836_v39 = vld [vmem:[%s4360_s5] ss:$0 sm:$0xff]  ;;  %v3852_v54 = vpop.f32.mrf.mxu0 }
 0x2fa   : > { %2937 = vmatmul.msk.bf16.gmra.mxu3 %vm1201_vm1, %v3603_v12  ;;  %v1628_v12 = vadd.f32 %v1627_v44, %v1546_v14 }
 0x2fd   : > { %v1711_v46 = vpop.f32.mrf.mxu3 }
 0x2fe   : > { %v1771_v25 = vadd.f32 %v1711_v46, %v1626_v6  ;;  %v1342_v6 = vadd.f32 %v3731_v43, %v3608_v15  ;;  %v3856_v15 = vpop.f32.mrf.mxu1  ;;  %v1344_v43 = vadd.f32 %v3736_v45, %v3617_v29  ;;  %v3870_v29 = vpop.f32.mrf.mxu0 }
 0x300   : > { %v1795_v10 = vmax.f32 %v1490_v47, %v1771_v25  ;;  %v1492_v44 = vadd.f32 %v1435_v18, %v1342_v6  ;;  %v3072_v6 = vld [vmem:[%s4362_s7 + $0x10] sm:$0xff] }
 0x301   : > { %2365 = vmatpush.bf16.msrb.mxu2 %v3072_v6 }
 0x302   : > { %v1823_v40 = vadd.f32 %v3836_v39, %v1795_v10 }
 0x304   : > { %v1847_v25 = vmax.f32 %v1823_v40, 0.0 }
 0x305   : > { %v1713_v19 = vpop.f32.mrf.mxu3 }
 0x306   : > { %v1772_v31 = vadd.f32 %v1713_v19, %v1628_v12  ;;  %v1871_v42 = vpack.c.bf16 %v1847_v25, %v1847_v25  ;;  %v3854_v12 = vpop.f32.mrf.mxu2 }
 0x308   : > { %v1796_v47 = vmax.f32 %v1491_v24, %v1772_v31  ;;  %v2047_v24 = vunpack.c.l.b16 %v1871_v42  ;;  %v1493_v31 = vadd.f32 %v3794_v26, %v1344_v43  ;;  %v3879_v26 = vpop.f32.mrf.mxu1 }
 0x30a   : > { %v1824_v46 = vadd.f32 %v3836_v39, %v1796_v47  ;;  %2938 = vmatmul.msk.bf16.gmra.mxu3 %vm1201_vm1, %v3619_v34 }
 0x30c   : > { %v1848_v14 = vmax.f32 %v1824_v46, 0.0  ;;  %v1636_v46 = vadd.f32 %v1635_v32, %v3790_v27  ;;  %v3070_v32 = vld [vmem:[%s4362_s7] sm:$0xff]  ;;  %v3893_v27 = vpop.f32.mrf.mxu0 }
 0x30d   : > { %v1716_v10 = vpop.f32.mrf.mxu3  ;;  %2297 = vmatpush.bf16.msrb.mxu1 %v3070_v32 }
 0x30e   : > { %v1872_v22 = vpack.c.bf16 %v1848_v14, %v1848_v14  ;;  %v1773_v8 = vadd.f32 %v1716_v10, %v1631_v3  ;;  %v3872_v45 = vpop.f32.mrf.mxu2  ;;  %v1494_v10 = vadd.f32 %v3802_v49, %v1347_v35  ;;  %v1638_v49 = vadd.f32 %v3829_v30, %v3796_v33 }
 0x30f   : > { %v1352_v30 = vadd.f32 %v3752_v59, %v3642_v56 }
 0x310   : > { %v2048_v40 = vunpack.c.l.b16 %v1872_v22  ;;  %v1797_v19 = vmax.f32 %v1492_v44, %v1773_v8  ;;  %v3902_v52 = vpop.f32.mrf.mxu1 }
 0x312   : > { %v3860_v34 = vpack.c.b16 %v2048_v40, %v2047_v24  ;;  %v1825_v60 = vadd.f32 %v3836_v39, %v1797_v19 }
 0x314   : > { %2961 = vmatmul.msk.bf16.vlgmr.msra.gmra.mxu1 %vm693_vm0, %v3860_v34  ;;  %v1849_v22 = vmax.f32 %v1825_v60, 0.0  ;;  %v1495_v60 = vadd.f32 %v3810_v36, %v1349_v48  ;;  %v3912_v35 = vpop.f32.mrf.mxu0 }
 0x315   : > { %v1718_v18 = vpop.f32.mrf.mxu3 }
 0x316   : > { %v1774_v25 = vadd.f32 %v1718_v18, %v1633_v38  ;;  %v1873_v3 = vpack.c.bf16 %v1849_v22, %v1849_v22  ;;  %v1647_v43 = vpop.f32.mrf.mxu2  ;;  %v1641_v22 = vadd.f32 %v3843_v23, %v3806_v7  ;;  %v1643_v23 = vadd.f32 %v3854_v12, %v3812_v20 }
 0x318   : > { %v1798_v47 = vmax.f32 %v1493_v31, %v1774_v25  ;;  %v1920_v24 = vunpack.c.l.b16 %v1873_v3 }
 0x31a   : > { %v1826_v16 = vadd.f32 %v3836_v39, %v1798_v47  ;;  %2939 = vmatmul.msk.bf16.gmra.mxu3 %vm1201_vm1, %v3638_v55  ;;  %v3071_v55 = vld [vmem:[%s4362_s7 + $0x8] sm:$0xff] }
 0x31b   : > { %2232 = vmatpush.bf16.msrb.mxu0 %v3071_v55  ;;  %v1646_v55 = vadd.f32 %v3872_v45, %v3820_v17  ;;  %v1648_v17 = vadd.f32 %v1647_v43, %v3831_v50  ;;  %v1362_v50 = vadd.f32 %v3764_v1, %v3668_v13  ;;  %v1364_v13 = vadd.f32 %v3766_v2, %v3676_v51 }
 0x31c   : > { %v1850_v42 = vmax.f32 %v1826_v16, 0.0 }
 0x31d   : > { %v1721_v14 = vpop.f32.mrf.mxu3  ;;  %v1501_v51 = vadd.f32 %v3893_v27, %v1364_v13 }
 0x31e   : > { %v1874_v44 = vpack.c.bf16 %v1850_v42, %v1850_v42  ;;  %v1775_v8 = vadd.f32 %v1721_v14, %v1636_v46  ;;  %v1650_v36 = vpop.f32.mrf.mxu2  ;;  %v1496_v46 = vadd.f32 %v3818_v28, %v1352_v30  ;;  %v3915_v14 = vpop.f32.mrf.mxu1 }
 0x320   : > { %v1921_v40 = vunpack.c.l.b16 %v1874_v44  ;;  %v1799_v41 = vmax.f32 %v1494_v10, %v1775_v8 }
 0x322   : > { %v3885_v19 = vpack.c.b16 %v1921_v40, %v1920_v24  ;;  %v1827_v38 = vadd.f32 %v3836_v39, %v1799_v41  ;;  %v1357_v41 = vadd.f32 %v3758_v63, %v3654_v62  ;;  %v1359_v62 = vadd.f32 %v3760_v0, %v3662_v5 }
 0x324   : > { %2947 = vmatmul.msk.bf16.vlgmr.msra.gmra.mxu0 %vm693_vm0, %v3885_v19  ;;  %2962 = vmatmul.msk.bf16.gmra.mxu1 %vm693_vm0, %v3885_v19  ;;  %v1851_v31 = vmax.f32 %v1827_v38, 0.0  ;;  %v1499_v5 = vadd.f32 %v3852_v54, %v1359_v62  ;;  %v1500_v54 = vadd.f32 %v3870_v29, %v1362_v50 }
 0x325   : > { %v1723_v53 = vpop.f32.mrf.mxu3 }
 0x326   : > { %v1776_v18 = vadd.f32 %v1723_v53, %v1638_v49  ;;  %v1875_v47 = vpack.c.bf16 %v1851_v31, %v1851_v31  ;;  %v1652_v24 = vpop.f32.mrf.mxu2  ;;  %v3933_v12 = vpop.f32.mrf.mxu1 }
 0x328   : > { %v1800_v25 = vmax.f32 %v1495_v60, %v1776_v18  ;;  %v1922_v56 = vunpack.c.l.b16 %v1875_v47 }
 0x32a   : > { %v1828_v33 = vadd.f32 %v3836_v39, %v1800_v25  ;;  %2940 = vmatmul.msk.bf16.gmra.mxu3 %vm1201_vm1, %v3680_v57  ;;  %v1354_v57 = vadd.f32 %v3754_v61, %v3650_v58  ;;  %v3931_v61 = vpop.f32.mrf.mxu0 }
 0x32c   : > { %v1852_v6 = vmax.f32 %v1828_v33, 0.0  ;;  %v1497_v8 = vadd.f32 %v3827_v37, %v1354_v57  ;;  %v1498_v37 = vadd.f32 %v3841_v9, %v1357_v41  ;;  %v1367_v41 = vadd.f32 %v3770_v4, %v3682_v21  ;;  %v4393_v21 = vld [vmem:[#allocation8_spill] sm:$0xff]  ;;  %v4394_v4 = vld [vmem:[#allocation19_spill] sm:$0xff] }
 0x32d   : > { %v1726_v16 = vpop.f32.mrf.mxu3 }
 0x32e   : > { %v1876_v3 = vpack.c.bf16 %v1852_v6, %v1852_v6  ;;  %v1777_v42 = vadd.f32 %v1726_v16, %v1641_v22  ;;  %v1655_v33 = vpop.f32.mrf.mxu2  ;;  %v3947_v22 = vpop.f32.mrf.mxu1 }
 0x330   : > { %v1923_v59 = vunpack.c.l.b16 %v1876_v3  ;;  %v1801_v10 = vmax.f32 %v1496_v46, %v1777_v42  ;;  %v1651_v46 = vadd.f32 %v1650_v36, %v3845_v11  ;;  %v1653_v11 = vadd.f32 %v1652_v24, %v3856_v15 }
 0x332   : > { %v3919_v44 = vpack.c.b16 %v1923_v59, %v1922_v56  ;;  %v1829_v7 = vadd.f32 %v3836_v39, %v1801_v10  ;;  %v3941_v30 = vpop.f32.mrf.mxu0 }
 0x334   : > { %2948 = vmatmul.msk.bf16.gmra.mxu0 %vm693_vm0, %v3919_v44  ;;  %2963 = vmatmul.msk.bf16.gmra.mxu1 %vm693_vm0, %v3919_v44  ;;  %v1853_v40 = vmax.f32 %v1829_v7, 0.0 }
 0x335   : > { %2977 = vmatmul.msk.bf16.vlgmr.msra.gmra.mxu2 %vm693_vm0, %v3919_v44  ;;  %v1728_v28 = vpop.f32.mrf.mxu3 }
 0x336   : > { %v1778_v58 = vadd.f32 %v1728_v28, %v1643_v23  ;;  %v1877_v32 = vpack.c.bf16 %v1853_v40, %v1853_v40  ;;  %v1657_v3 = vpop.f32.mrf.mxu2  ;;  %v3964_v59 = vpop.f32.mrf.mxu1 }
 0x338   : > { %v1802_v20 = vmax.f32 %v1497_v8, %v1778_v58  ;;  %v1924_v18 = vunpack.c.l.b16 %v1877_v32 }
 0x33a   : > { %v1830_v48 = vadd.f32 %v3836_v39, %v1802_v20  ;;  %v3961_v16 = vpop.f32.mrf.mxu0 }
 0x33c   : > { %v1854_v49 = vmax.f32 %v1830_v48, 0.0 }
 0x33d   : > { %v1731_v38 = vpop.f32.mrf.mxu3 }
 0x33e   : > { %v1878_v53 = vpack.c.bf16 %v1854_v49, %v1854_v49  ;;  %v1779_v60 = vadd.f32 %v1731_v38, %v1646_v55  ;;  %v1660_v40 = vpop.f32.mrf.mxu2  ;;  %v3982_v20 = vpop.f32.mrf.mxu1  ;;  %v1656_v55 = vadd.f32 %v1655_v33, %v3879_v26  ;;  %v1658_v26 = vadd.f32 %v1657_v3, %v3902_v52 }
 0x340   : > { %v1925_v31 = vunpack.c.l.b16 %v1878_v53  ;;  %v1803_v25 = vmax.f32 %v1498_v37, %v1779_v60  ;;  %v1502_v37 = vadd.f32 %v3912_v35, %v1367_v41 }
 0x342   : > { %v3945_v63 = vpack.c.b16 %v1925_v31, %v1924_v18  ;;  %v1831_v45 = vadd.f32 %v3836_v39, %v1803_v25  ;;  %v3977_v29 = vpop.f32.mrf.mxu0 }
 0x344   : > { %2949 = vmatmul.msk.bf16.gmra.mxu0 %vm693_vm0, %v3945_v63  ;;  %2964 = vmatmul.msk.bf16.gmra.mxu1 %vm693_vm0, %v3945_v63  ;;  %v1855_v47 = vmax.f32 %v1831_v45, 0.0  ;;  %v1369_v45 = vadd.f32 %v4394_v4, %v4393_v21 }
 0x345   : > { %2978 = vmatmul.msk.bf16.gmra.mxu2 %vm693_vm0, %v3945_v63  ;;  %v1733_v9 = vpop.f32.mrf.mxu3 }
 0x346   : > { %v1780_v0 = vadd.f32 %v1733_v9, %v1648_v17  ;;  %v1879_v42 = vpack.c.bf16 %v1855_v47, %v1855_v47  ;;  %v1662_v18 = vpop.f32.mrf.mxu2  ;;  %v3991_v17 = vpop.f32.mrf.mxu1 }
 0x348   : > { %v1804_v6 = vmax.f32 %v1499_v5, %v1780_v0  ;;  %v1926_v7 = vunpack.c.l.b16 %v1879_v42  ;;  %v1503_v5 = vadd.f32 %v3931_v61, %v1369_v45 }
 0x34a   : > { %v1832_v43 = vadd.f32 %v3836_v39, %v1804_v6  ;;  %v3989_v27 = vpop.f32.mrf.mxu0 }
 0x34c   : > { %v1856_v56 = vmax.f32 %v1832_v43, 0.0  ;;  %v4395_v43 = vld [vmem:[#allocation9_spill] sm:$0xff] }
 0x34d   : > { %v1736_v10 = vpop.f32.mrf.mxu3 }
 0x34e   : > { %v1880_v57 = vpack.c.bf16 %v1856_v56, %v1856_v56  ;;  %v1781_v23 = vadd.f32 %v1736_v10, %v1651_v46  ;;  %v1665_v52 = vpop.f32.mrf.mxu2  ;;  %v4396_v46 = vld [vmem:[#allocation20_spill] sm:$0xff]  ;;  %v4011_v56 = vpop.f32.mrf.mxu1  ;;  %v1661_v10 = vadd.f32 %v1660_v40, %v3915_v14 }
 0x34f   : > { %v1372_v3 = vadd.f32 %v4396_v46, %v4395_v43 }
 0x350   : > { %v1927_v28 = vunpack.c.l.b16 %v1880_v57  ;;  %v1805_v8 = vmax.f32 %v1500_v54, %v1781_v23 }
 0x351   : > { %v1504_v61 = vadd.f32 %v3941_v30, %v1372_v3 }
 0x352   : > { %v3969_v1 = vpack.c.b16 %v1927_v28, %v1926_v7  ;;  %v1833_v36 = vadd.f32 %v3836_v39, %v1805_v8  ;;  %v4006_v50 = vpop.f32.mrf.mxu0 }
 0x354   : > { %2950 = vmatmul.msk.bf16.gmra.mxu0 %vm693_vm0, %v3969_v1  ;;  %2965 = vmatmul.msk.bf16.gmra.mxu1 %vm693_vm0, %v3969_v1  ;;  %v1857_v15 = vmax.f32 %v1833_v36, 0.0  ;;  %v4397_v36 = vld [vmem:[#allocation10_spill] sm:$0xff] }
 0x355   : > { %2979 = vmatmul.msk.bf16.gmra.mxu2 %vm693_vm0, %v3969_v1  ;;  %v1738_v58 = vpop.f32.mrf.mxu3 }
 0x356   : > { %v1782_v2 = vadd.f32 %v1738_v58, %v1653_v11  ;;  %v1881_v32 = vpack.c.bf16 %v1857_v15, %v1857_v15  ;;  %v4398_v58 = vld [vmem:[#allocation21_spill] sm:$0xff]  ;;  %v1667_v14 = vpop.f32.mrf.mxu2  ;;  %v4027_v30 = vpop.f32.mrf.mxu1 }
 0x358   : > { %v1806_v24 = vmax.f32 %v1501_v51, %v1782_v2  ;;  %v1928_v31 = vunpack.c.l.b16 %v1881_v32  ;;  %v1374_v51 = vadd.f32 %v4398_v58, %v4397_v36 }
 0x35a   : > { %v1834_v48 = vadd.f32 %v3836_v39, %v1806_v24  ;;  %v4019_v15 = vpop.f32.mrf.mxu0  ;;  %v1663_v24 = vadd.f32 %v1662_v18, %v3933_v12 }
 0x35c   : > { %v1858_v49 = vmax.f32 %v1834_v48, 0.0  ;;  %v1505_v48 = vadd.f32 %v3961_v16, %v1374_v51 }
 0x35d   : > { %v1741_v38 = vpop.f32.mrf.mxu3 }
 0x35e   : > { %v1882_v53 = vpack.c.bf16 %v1858_v49, %v1858_v49  ;;  %v1783_v60 = vadd.f32 %v1741_v38, %v1656_v55  ;;  %v4399_v49 = vld [vmem:[#allocation11_spill] sm:$0xff]  ;;  %v4400_v38 = vld [vmem:[#allocation22_spill] sm:$0xff]  ;;  %v1670_v21 = vpop.f32.mrf.mxu2 }
 0x360   : > { %v1929_v25 = vunpack.c.l.b16 %v1882_v53  ;;  %v1807_v62 = vmax.f32 %v1502_v37, %v1783_v60  ;;  %v1377_v37 = vadd.f32 %v4400_v38, %v4399_v49  ;;  %v1666_v60 = vadd.f32 %v1665_v52, %v3947_v22  ;;  %v4406_v49 = vld [vmem:[#allocation25_spill] sm:$0xff] }
 0x361   : > { %v1668_v22 = vadd.f32 %v1667_v14, %v3964_v59 }
 0x362   : > { %v3995_v9 = vpack.c.b16 %v1929_v25, %v1928_v31  ;;  %v1835_v33 = vadd.f32 %v3836_v39, %v1807_v62  ;;  %v4036_v25 = vpop.f32.mrf.mxu0  ;;  %v1506_v4 = vadd.f32 %v3977_v29, %v1377_v37 }
 0x364   : > { %2951 = vmatmul.msk.bf16.gmra.mxu0 %vm693_vm0, %v3995_v9  ;;  %2966 = vmatmul.msk.bf16.gmra.mxu1 %vm693_vm0, %v3995_v9  ;;  %v1859_v47 = vmax.f32 %v1835_v33, 0.0 }
 0x365   : > { %2980 = vmatmul.msk.bf16.gmra.mxu2 %vm693_vm0, %v3995_v9  ;;  %v1743_v35 = vpop.f32.mrf.mxu3 }
 0x366   : > { %v1784_v0 = vadd.f32 %v1743_v35, %v1658_v26  ;;  %v1883_v54 = vpack.c.bf16 %v1859_v47, %v1859_v47  ;;  %v4039_v26 = vpop.f32.mrf.mxu1  ;;  %v4402_v47 = vld [vmem:[#allocation23_spill] sm:$0xff] }
 0x368   : > { %v1808_v6 = vmax.f32 %v1503_v5, %v1784_v0  ;;  %v1930_v8 = vunpack.c.l.b16 %v1883_v54  ;;  %v4401_v0 = vld [vmem:[#allocation12_spill] sm:$0xff] }
 0x36a   : > { %v1836_v42 = vadd.f32 %v3836_v39, %v1808_v6  ;;  %v1379_v6 = vadd.f32 %v4402_v47, %v4401_v0 }
 0x36c   : > { %v1860_v57 = vmax.f32 %v1836_v42, 0.0  ;;  %v1507_v46 = vadd.f32 %v3989_v27, %v1379_v6  ;;  %v1482_v42 = vpop.f32.mrf.mxu0 }
 0x36d   : > { %v1746_v23 = vpop.f32.mrf.mxu3 }
 0x36e   : > { %v1884_v7 = vpack.c.bf16 %v1860_v57, %v1860_v57  ;;  %v1785_v28 = vadd.f32 %v1746_v23, %v1661_v10  ;;  %v1672_v10 = vpop.f32.mrf.mxu2  ;;  %v4054_v59 = vpop.f32.mrf.mxu1  ;;  %v4403_v23 = vld [vmem:[#allocation13_spill] sm:$0xff] }
 0x370   : > { %v1931_v13 = vunpack.c.l.b16 %v1884_v7  ;;  %v1809_v11 = vmax.f32 %v1504_v61, %v1785_v28  ;;  %v4404_v61 = vld [vmem:[#allocation24_spill] sm:$0xff] }
 0x371   : > { %v1382_v7 = vadd.f32 %v4404_v61, %v4403_v23  ;;  %v4410_v23 = vld [vmem:[#allocation27_spill] sm:$0xff] }
 0x372   : > { %v4017_v2 = vpack.c.b16 %v1931_v13, %v1930_v8  ;;  %v1837_v40 = vadd.f32 %v3836_v39, %v1809_v11  ;;  %v1671_v8 = vadd.f32 %v1670_v21, %v3982_v20 }
 0x373   : > { %v1508_v58 = vadd.f32 %v4006_v50, %v1382_v7  ;;  %v1673_v50 = vadd.f32 %v1672_v10, %v3991_v17  ;;  %v4407_v17 = vld [vmem:[#allocation15_spill] sm:$0xff] }
 0x374   : > { %2952 = vmatmul.msk.bf16.gmra.mxu0 %vm693_vm0, %v4017_v2  ;;  %2967 = vmatmul.msk.bf16.gmra.mxu1 %vm693_vm0, %v4017_v2  ;;  %v1861_v32 = vmax.f32 %v1837_v40, 0.0 }
 0x375   : > { %2981 = vmatmul.msk.bf16.gmra.mxu2 %vm693_vm0, %v4017_v2  ;;  %v1748_v41 = vpop.f32.mrf.mxu3 }
 0x376   : > { %v1786_v55 = vadd.f32 %v1748_v41, %v1663_v24  ;;  %v1885_v18 = vpack.c.bf16 %v1861_v32, %v1861_v32  ;;  %v1485_v24 = vpop.f32.mrf.mxu0  ;;  %v1675_v32 = vpop.f32.mrf.mxu2 }
 0x378   : > { %v1810_v12 = vmax.f32 %v1505_v48, %v1786_v55  ;;  %v1932_v33 = vunpack.c.l.b16 %v1885_v18  ;;  %v3073_v48 = vld [vmem:[%s4364_s9] sm:$0xff] }
 0x379   : > { %2560 = vmatpush.bf16.msrb.mxu3 %v3073_v48 }
 0x37a   : > { %v1838_v53 = vadd.f32 %v3836_v39, %v1810_v12  ;;  %v4405_v12 = vld [vmem:[#allocation14_spill] sm:$0xff] }
 0x37b   : > { %v1384_v20 = vadd.f32 %v4406_v49, %v4405_v12 }
 0x37c   : > { %v1862_v31 = vmax.f32 %v1838_v53, 0.0 }
 0x37d   : > { %v1751_v62 = vpop.f32.mrf.mxu3 }
 0x37e   : > { %v1886_v45 = vpack.c.bf16 %v1862_v31, %v1862_v31  ;;  %v1787_v16 = vadd.f32 %v1751_v62, %v1666_v60  ;;  %v1509_v60 = vadd.f32 %v4019_v15, %v1384_v20  ;;  %v1487_v21 = vpop.f32.mrf.mxu0 }
 0x380   : > { %v1933_v35 = vunpack.c.l.b16 %v1886_v45  ;;  %v1811_v5 = vmax.f32 %v1506_v4, %v1787_v16  ;;  %v4408_v45 = vld [vmem:[#allocation26_spill] sm:$0xff] }
 0x381   : > { %v1387_v16 = vadd.f32 %v4408_v45, %v4407_v17  ;;  %v4413_v45 = vld [vmem:[#allocation18_spill] sm:$0xff] }
 0x382   : > { %v4043_v43 = vpack.c.b16 %v1933_v35, %v1932_v33  ;;  %v1839_v52 = vadd.f32 %v3836_v39, %v1811_v5  ;;  %v1676_v35 = vadd.f32 %v1675_v32, %v4011_v56  ;;  %v1677_v5 = vpop.f32.mrf.mxu2 }
 0x383   : > { %v1678_v56 = vadd.f32 %v1677_v5, %v4027_v30  ;;  %v4411_v30 = vld [vmem:[#allocation17_spill] sm:$0xff] }
 0x384   : > { %2953 = vmatmul.msk.bf16.gmra.mxu0 %vm693_vm0, %v4043_v43  ;;  %2968 = vmatmul.msk.bf16.gmra.mxu1 %vm693_vm0, %v4043_v43  ;;  %v1863_v54 = vmax.f32 %v1839_v52, 0.0 }
 0x385   : > { %2982 = vmatmul.msk.bf16.gmra.mxu2 %vm693_vm0, %v4043_v43  ;;  %v1753_v29 = vpop.f32.mrf.mxu3 }
 0x386   : > { %v1788_v3 = vadd.f32 %v1753_v29, %v1668_v22  ;;  %v1887_v13 = vpack.c.bf16 %v1863_v54, %v1863_v54  ;;  %v1510_v22 = vadd.f32 %v4036_v25, %v1387_v16  ;;  %v4414_v16 = vld [vmem:[#allocation29_spill] sm:$0xff] }
 0x388   : > { %v1812_v57 = vmax.f32 %v1507_v46, %v1788_v3  ;;  %v1934_v14 = vunpack.c.l.b16 %v1887_v13 }
 0x38a   : > { %v1840_v28 = vadd.f32 %v3836_v39, %v1812_v57  ;;  %v4409_v57 = vld [vmem:[#allocation16_spill] sm:$0xff]  ;;  %v1680_v13 = vpop.f32.mrf.mxu2 }
 0x38b   : > { %v1389_v61 = vadd.f32 %v4410_v23, %v4409_v57  ;;  %v1681_v32 = vadd.f32 %v1680_v13, %v4039_v26 }
 0x38c   : > { %v1864_v11 = vmax.f32 %v1840_v28, 0.0 }
 0x38d   : > { %v1756_v36 = vpop.f32.mrf.mxu3 }
 0x38e   : > { %v1888_v27 = vpack.c.bf16 %v1864_v11, %v1864_v11  ;;  %v1789_v51 = vadd.f32 %v1756_v36, %v1671_v8  ;;  %v1511_v11 = vadd.f32 %v1482_v42, %v1389_v61 }
 0x390   : > { %v1935_v40 = vunpack.c.l.b16 %v1888_v27  ;;  %v1813_v41 = vmax.f32 %v1508_v58, %v1789_v51 }
 0x391   : > { %v2068_v55 = vpop.f32.mrf.mxu1 }
 0x392   : > { %v4066_v38 = vpack.c.b16 %v1935_v40, %v1934_v14  ;;  %v1841_v37 = vadd.f32 %v3836_v39, %v1813_v41  ;;  %v4412_v40 = vld [vmem:[#allocation28_spill] sm:$0xff]  ;;  %v1682_v42 = vpop.f32.mrf.mxu2 }
 0x393   : > { %v1392_v41 = vadd.f32 %v4412_v40, %v4411_v30  ;;  %v1683_v26 = vadd.f32 %v1682_v42, %v4054_v59 }
 0x394   : > { %2954 = vmatmul.msk.bf16.gmra.mxu0 %vm693_vm0, %v4066_v38  ;;  %2969 = vmatmul.msk.bf16.gmra.mxu1 %vm693_vm0, %v4066_v38  ;;  %v1865_v31 = vmax.f32 %v1841_v37, 0.0 }
 0x395   : > { %2983 = vmatmul.msk.bf16.gmra.mxu2 %vm693_vm0, %v4066_v38  ;;  %v1758_v53 = vpop.f32.mrf.mxu3 }
 0x396   : > { %v1790_v18 = vadd.f32 %v1758_v53, %v1673_v50  ;;  %v1889_v0 = vpack.c.bf16 %v1865_v31, %v1865_v31  ;;  %v1512_v50 = vadd.f32 %v1485_v24, %v1392_v41 }
 0x398   : > { %v1814_v62 = vmax.f32 %v1509_v60, %v1790_v18  ;;  %v1936_v29 = vunpack.c.l.b16 %v1889_v0 }
 0x399   : > { %v2070_v4 = vpop.f32.mrf.mxu1 }
 0x39a   : > { %v1842_v33 = vadd.f32 %v3836_v39, %v1814_v62 }
 0x39c   : > { %v1866_v47 = vmax.f32 %v1842_v33, 0.0  ;;  %v1394_v33 = vadd.f32 %v4414_v16, %v4413_v45 }
 0x39d   : > { %v1761_v6 = vpop.f32.mrf.mxu3 }
 0x39e   : > { %v1890_v52 = vpack.c.bf16 %v1866_v47, %v1866_v47  ;;  %v1791_v15 = vadd.f32 %v1761_v6, %v1676_v35  ;;  %v1513_v0 = vadd.f32 %v1487_v21, %v1394_v33 }
 0x3a0   : > { %v1937_v46 = vunpack.c.l.b16 %v1890_v52  ;;  %v1815_v3 = vmax.f32 %v1510_v22, %v1791_v15 }
 0x3a1   : > { %v1995_v10 = vpop.f32.mrf.mxu0  ;;  %v2073_v54 = vpop.f32.mrf.mxu1 }
 0x3a2   : > { %v4084_v7 = vpack.c.b16 %v1937_v46, %v1936_v29  ;;  %v2069_v28 = vadd.f32 %v2068_v55, %v1995_v10  ;;  %v1843_v8 = vadd.f32 %v3836_v39, %v1815_v3 }
 0x3a4   : > { %2955 = vmatmul.msk.bf16.gmra.mxu0 %vm693_vm0, %v4084_v7  ;;  %2970 = vmatmul.msk.bf16.gmra.mxu1 %vm693_vm0, %v4084_v7  ;;  %v1867_v58 = vmax.f32 %v1843_v8, 0.0 }
 0x3a5   : > { %2984 = vmatmul.msk.bf16.gmra.mxu2 %vm693_vm0, %v4084_v7  ;;  %v1763_v25 = vpop.f32.mrf.mxu3 }
 0x3a6   : > { %v1792_v36 = vadd.f32 %v1763_v25, %v1678_v56  ;;  %v1891_v12 = vpack.c.bf16 %v1867_v58, %v1867_v58 }
 0x3a8   : > { %v1816_v27 = vmax.f32 %v1511_v11, %v1792_v36  ;;  %v1938_v60 = vunpack.c.l.b16 %v1891_v12 }
 0x3a9   : > { %v1997_v51 = vpop.f32.mrf.mxu0  ;;  %v2075_v14 = vpop.f32.mrf.mxu1 }
 0x3aa   : > { %v1844_v48 = vadd.f32 %v3836_v39, %v1816_v27  ;;  %v2071_v55 = vadd.f32 %v2070_v4, %v1997_v51 }
 0x3ac   : > { %v1868_v49 = vmax.f32 %v1844_v48, 0.0 }
 0x3ad   : > { %v1766_v20 = vpop.f32.mrf.mxu3 }
 0x3ae   : > { %v1892_v37 = vpack.c.bf16 %v1868_v49, %v1868_v49  ;;  %v1793_v53 = vadd.f32 %v1766_v20, %v1681_v32 }
 0x3b0   : > { %v1939_v18 = vunpack.c.l.b16 %v1892_v37  ;;  %v1817_v31 = vmax.f32 %v1512_v50, %v1793_v53 }
 0x3b1   : > { %v2000_v62 = vpop.f32.mrf.mxu0  ;;  %v2078_v17 = vpop.f32.mrf.mxu1 }
 0x3b2   : > { %v2074_v35 = vadd.f32 %v2073_v54, %v2000_v62  ;;  %v4100_v5 = vpack.c.b16 %v1939_v18, %v1938_v60  ;;  %v1845_v4 = vadd.f32 %v3836_v39, %v1817_v31 }
 0x3b4   : > { %2956 = vmatmul.msk.bf16.gmra.mxu0 %vm693_vm0, %v4100_v5  ;;  %3007 = vmatmul.msk.bf16.vlgmr.msrb.gmra.mxu1 %vm693_vm0, %v3860_v34  ;;  %v1869_v6 = vmax.f32 %v1845_v4, 0.0 }
 0x3b5   : > { %2985 = vmatmul.msk.bf16.gmra.mxu2 %vm693_vm0, %v4100_v5  ;;  %v1768_v24 = vpop.f32.mrf.mxu3 }
 0x3b6   : > { %v1794_v47 = vadd.f32 %v1768_v24, %v1683_v26  ;;  %v1893_v10 = vpack.c.bf16 %v1869_v6, %v1869_v6 }
 0x3b8   : > { %v1818_v22 = vmax.f32 %v1513_v0, %v1794_v47  ;;  %v2144_v52 = vpop.f32.mrf.mxu2  ;;  %v2123_v34 = vunpack.c.l.b16 %v1893_v10 }
 0x3b9   : > { %v4110_v15 = vadd.f32 %v2144_v52, %v2069_v28  ;;  %v2002_v59 = vpop.f32.mrf.mxu0  ;;  %v2080_v29 = vpop.f32.mrf.mxu1 }
 0x3ba   : > { %v1846_v46 = vadd.f32 %v3836_v39, %v1818_v22  ;;  %v2076_v3 = vadd.f32 %v2075_v14, %v2002_v59 }
 0x3bc   : > { %v1870_v54 = vmax.f32 %v1846_v46, 0.0 }
 0x3be   : > { %v1894_v57 = vpack.c.bf16 %v1870_v54, %v1870_v54 }
 0x3c0   : > { %v2124_v23 = vunpack.c.l.b16 %v1894_v57  ;;  %v2146_v61 = vpop.f32.mrf.mxu2 }
 0x3c1   : > { %v4113_v56 = vadd.f32 %v2146_v61, %v2071_v55  ;;  %v2005_v21 = vpop.f32.mrf.mxu0  ;;  %v2083_v8 = vpop.f32.mrf.mxu1 }
 0x3c2   : > { %v2079_v25 = vadd.f32 %v2078_v17, %v2005_v21  ;;  %v4115_v13 = vpack.c.b16 %v2124_v23, %v2123_v34 }
 0x3c4   : > { %2993 = vmatmul.msk.bf16.vlgmr.msrb.gmra.mxu0 %vm693_vm0, %v3885_v19  ;;  %3008 = vmatmul.msk.bf16.gmra.mxu1 %vm693_vm0, %v3885_v19 }
 0x3c5   : > { %2986 = vmatmul.msk.bf16.gmra.mxu2 %vm693_vm0, %v4115_v13 }
 0x3c8   : > { %v2149_v39 = vpop.f32.mrf.mxu2 }
 0x3c9   : > { %v4123_v28 = vadd.f32 %v2149_v39, %v2074_v35  ;;  %v2007_v11 = vpop.f32.mrf.mxu0  ;;  %v2085_v36 = vpop.f32.mrf.mxu1 }
 0x3ca   : > { %v2081_v58 = vadd.f32 %v2080_v29, %v2007_v11 }
 0x3d0   : > { %v2151_v27 = vpop.f32.mrf.mxu2 }
 0x3d1   : > { %v4125_v51 = vadd.f32 %v2151_v27, %v2076_v3  ;;  %v2010_v14 = vpop.f32.mrf.mxu0  ;;  %v2088_v30 = vpop.f32.mrf.mxu1 }
 0x3d2   : > { %v2084_v40 = vadd.f32 %v2083_v8, %v2010_v14 }
 0x3d4   : > { %2994 = vmatmul.msk.bf16.gmra.mxu0 %vm693_vm0, %v3919_v44  ;;  %3009 = vmatmul.msk.bf16.gmra.mxu1 %vm693_vm0, %v3919_v44 }
 0x3d5   : > { %3023 = vmatmul.msk.bf16.vlgmr.msrb.gmra.mxu2 %vm693_vm0, %v3919_v44 }
 0x3d8   : > { %v2154_v19 = vpop.f32.mrf.mxu2 }
 0x3d9   : > { %v4133_v41 = vadd.f32 %v2154_v19, %v2079_v25  ;;  %v2012_v48 = vpop.f32.mrf.mxu0  ;;  %v2090_v55 = vpop.f32.mrf.mxu1 }
 0x3da   : > { %v2086_v32 = vadd.f32 %v2085_v36, %v2012_v48 }
 0x3e0   : > { %v2156_v12 = vpop.f32.mrf.mxu2 }
 0x3e1   : > { %v4135_v49 = vadd.f32 %v2156_v12, %v2081_v58  ;;  %v2015_v20 = vpop.f32.mrf.mxu0  ;;  %v2093_v50 = vpop.f32.mrf.mxu1 }
 0x3e2   : > { %v2089_v37 = vadd.f32 %v2088_v30, %v2015_v20 }
 0x3e4   : > { %2995 = vmatmul.msk.bf16.gmra.mxu0 %vm693_vm0, %v3945_v63  ;;  %3010 = vmatmul.msk.bf16.gmra.mxu1 %vm693_vm0, %v3945_v63 }
 0x3e5   : > { %3024 = vmatmul.msk.bf16.gmra.mxu2 %vm693_vm0, %v3945_v63 }
 0x3e8   : > { %v2159_v44 = vpop.f32.mrf.mxu2 }
 0x3e9   : > { %v4143_v53 = vadd.f32 %v2159_v44, %v2084_v40  ;;  %v2017_v42 = vpop.f32.mrf.mxu0  ;;  %v2095_v60 = vpop.f32.mrf.mxu1 }
 0x3ea   : > { %v2091_v18 = vadd.f32 %v2090_v55, %v2017_v42 }
 0x3f0   : > { %v2161_v31 = vpop.f32.mrf.mxu2 }
 0x3f1   : > { %v4145_v62 = vadd.f32 %v2161_v31, %v2086_v32  ;;  %v2020_v17 = vpop.f32.mrf.mxu0  ;;  %v2098_v45 = vpop.f32.mrf.mxu1 }
 0x3f2   : > { %v2094_v16 = vadd.f32 %v2093_v50, %v2020_v17 }
 0x3f4   : > { %2996 = vmatmul.msk.bf16.gmra.mxu0 %vm693_vm0, %v3969_v1  ;;  %3011 = vmatmul.msk.bf16.gmra.mxu1 %vm693_vm0, %v3969_v1 }
 0x3f5   : > { %3025 = vmatmul.msk.bf16.gmra.mxu2 %vm693_vm0, %v3969_v1 }
 0x3f8   : > { %v2164_v63 = vpop.f32.mrf.mxu2 }
 0x3f9   : > { %v4153_v33 = vadd.f32 %v2164_v63, %v2089_v37  ;;  %v2022_v35 = vpop.f32.mrf.mxu0  ;;  %v2100_v26 = vpop.f32.mrf.mxu1 }
 0x3fa   : > { %v2096_v4 = vadd.f32 %v2095_v60, %v2022_v35 }
 0x400   : > { %v2166_v24 = vpop.f32.mrf.mxu2 }
 0x401   : > { %v4155_v0 = vadd.f32 %v2166_v24, %v2091_v18  ;;  %v2025_v47 = vpop.f32.mrf.mxu0  ;;  %v2103_v6 = vpop.f32.mrf.mxu1 }
 0x402   : > { %v2099_v22 = vadd.f32 %v2098_v45, %v2025_v47 }
 0x404   : > { %2997 = vmatmul.msk.bf16.gmra.mxu0 %vm693_vm0, %v3995_v9  ;;  %3012 = vmatmul.msk.bf16.gmra.mxu1 %vm693_vm0, %v3995_v9 }
 0x405   : > { %3026 = vmatmul.msk.bf16.gmra.mxu2 %vm693_vm0, %v3995_v9 }
 0x408   : > { %v2169_v1 = vpop.f32.mrf.mxu2 }
 0x409   : > { %v4163_v52 = vadd.f32 %v2169_v1, %v2094_v16  ;;  %v2027_v59 = vpop.f32.mrf.mxu0  ;;  %v2105_v29 = vpop.f32.mrf.mxu1 }
 0x40a   : > { %v2101_v46 = vadd.f32 %v2100_v26, %v2027_v59  ;;  %v4215_v59 = vld [vmem:[%s4363_s8] ss:$0 sm:$0xff] }
 0x410   : > { %v2171_v3 = vpop.f32.mrf.mxu2 }
 0x411   : > { %v4165_v10 = vadd.f32 %v2171_v3, %v2096_v4  ;;  %v2030_v54 = vpop.f32.mrf.mxu0  ;;  %v2108_v57 = vpop.f32.mrf.mxu1 }
 0x412   : > { %v2104_v34 = vadd.f32 %v2103_v6, %v2030_v54 }
 0x414   : > { %2998 = vmatmul.msk.bf16.gmra.mxu0 %vm693_vm0, %v4017_v2  ;;  %3013 = vmatmul.msk.bf16.gmra.mxu1 %vm693_vm0, %v4017_v2 }
 0x415   : > { %3027 = vmatmul.msk.bf16.gmra.mxu2 %vm693_vm0, %v4017_v2 }
 0x418   : > { %v2174_v9 = vpop.f32.mrf.mxu2 }
 0x419   : > { %v4173_v23 = vadd.f32 %v2174_v9, %v2099_v22  ;;  %v2032_v61 = vpop.f32.mrf.mxu0  ;;  %v2110_v21 = vpop.f32.mrf.mxu1 }
 0x41a   : > { %v2106_v8 = vadd.f32 %v2105_v29, %v2032_v61 }
 0x420   : > { %v2176_v25 = vpop.f32.mrf.mxu2 }
 0x421   : > { %v4175_v39 = vadd.f32 %v2176_v25, %v2101_v46  ;;  %v2035_v11 = vpop.f32.mrf.mxu0  ;;  %v2113_v36 = vpop.f32.mrf.mxu1 }
 0x422   : > { %v2109_v58 = vadd.f32 %v2108_v57, %v2035_v11 }
 0x424   : > { %2999 = vmatmul.msk.bf16.gmra.mxu0 %vm693_vm0, %v4043_v43  ;;  %3014 = vmatmul.msk.bf16.gmra.mxu1 %vm693_vm0, %v4043_v43 }
 0x425   : > { %3028 = vmatmul.msk.bf16.gmra.mxu2 %vm693_vm0, %v4043_v43 }
 0x428   : > { %v2179_v2 = vpop.f32.mrf.mxu2 }
 0x429   : > { %v4183_v27 = vadd.f32 %v2179_v2, %v2104_v34  ;;  %v2037_v14 = vpop.f32.mrf.mxu0  ;;  %v2115_v30 = vpop.f32.mrf.mxu1 }
 0x42a   : > { %v2111_v40 = vadd.f32 %v2110_v21, %v2037_v14 }
 0x430   : > { %v2181_v19 = vpop.f32.mrf.mxu2 }
 0x431   : > { %v4185_v48 = vadd.f32 %v2181_v19, %v2106_v8  ;;  %v2040_v55 = vpop.f32.mrf.mxu0  ;;  %v2299_v32 = vpop.f32.mrf.mxu1 }
 0x432   : > { %v2114_v12 = vadd.f32 %v2113_v36, %v2040_v55 }
 0x434   : > { %3000 = vmatmul.msk.bf16.gmra.mxu0 %vm693_vm0, %v4066_v38  ;;  %3015 = vmatmul.msk.bf16.gmra.mxu1 %vm693_vm0, %v4066_v38 }
 0x435   : > { %3029 = vmatmul.msk.bf16.gmra.mxu2 %vm693_vm0, %v4066_v38 }
 0x438   : > { %v2184_v43 = vpop.f32.mrf.mxu2 }
 0x439   : > { %v4193_v20 = vadd.f32 %v2184_v43, %v2109_v58  ;;  %v2042_v50 = vpop.f32.mrf.mxu0  ;;  %v2301_v44 = vpop.f32.mrf.mxu1 }
 0x43a   : > { %v2116_v37 = vadd.f32 %v2115_v30, %v2042_v50 }
 0x440   : > { %v2186_v42 = vpop.f32.mrf.mxu2 }
 0x441   : > { %v4195_v60 = vadd.f32 %v2186_v42, %v2111_v40  ;;  %v2234_v18 = vpop.f32.mrf.mxu0  ;;  %v2304_v31 = vpop.f32.mrf.mxu1 }
 0x442   : > { %v2300_v47 = vadd.f32 %v2299_v32, %v2234_v18 }
 0x444   : > { %3001 = vmatmul.msk.bf16.gmra.mxu0 %vm693_vm0, %v4084_v7  ;;  %3016 = vmatmul.msk.bf16.gmra.mxu1 %vm693_vm0, %v4084_v7 }
 0x445   : > { %3030 = vmatmul.msk.bf16.gmra.mxu2 %vm693_vm0, %v4084_v7 }
 0x448   : > { %v2189_v38 = vpop.f32.mrf.mxu2 }
 0x449   : > { %v4203_v17 = vadd.f32 %v2189_v38, %v2114_v12  ;;  %v2236_v45 = vpop.f32.mrf.mxu0  ;;  %v2306_v16 = vpop.f32.mrf.mxu1 }
 0x44a   : > { %v2302_v22 = vadd.f32 %v2301_v44, %v2236_v45 }
 0x450   : > { %v2191_v63 = vpop.f32.mrf.mxu2 }
 0x451   : > { %v4205_v35 = vadd.f32 %v2191_v63, %v2116_v37  ;;  %v2239_v26 = vpop.f32.mrf.mxu0  ;;  %v2309_v4 = vpop.f32.mrf.mxu1 }
 0x452   : > { %v2305_v21 = vadd.f32 %v2304_v31, %v2239_v26 }
 0x454   : > { %3002 = vmatmul.msk.bf16.gmra.mxu0 %vm693_vm0, %v4100_v5 }
 0x455   : > { %3031 = vmatmul.msk.bf16.gmra.mxu2 %vm693_vm0, %v4100_v5 }
 0x458   : > { %v2367_v24 = vpop.f32.mrf.mxu2 }
 0x459   : > { %v2241_v6 = vpop.f32.mrf.mxu0  ;;  %v2417_v7 = vadd.f32 %v2367_v24, %v2300_v47  ;;  %v2311_v54 = vpop.f32.mrf.mxu1 }
 0x45a   : > { %v2307_v58 = vadd.f32 %v2306_v16, %v2241_v6 }
 0x45b   : > { %v2437_v1 = vmax.f32 %v4110_v15, %v2417_v7 }
 0x45d   : > { %v2461_v57 = vadd.f32 %v4215_v59, %v2437_v1 }
 0x45f   : > { %v2481_v9 = vmax.f32 %v2461_v57, 0.0 }
 0x460   : > { %v2369_v29 = vpop.f32.mrf.mxu2 }
 0x461   : > { %v2418_v46 = vadd.f32 %v2369_v29, %v2302_v22  ;;  %v2244_v3 = vpop.f32.mrf.mxu0  ;;  %v2314_v36 = vpop.f32.mrf.mxu1 }
 0x462   : > { %v2310_v50 = vadd.f32 %v2309_v4, %v2244_v3 }
 0x463   : > { %v2438_v5 = vmax.f32 %v4113_v56, %v2418_v46 }
 0x465   : > { %v2462_v34 = vadd.f32 %v4215_v59, %v2438_v5  ;;  %3032 = vmatmul.msk.bf16.gmra.mxu2 %vm693_vm0, %v4115_v13 }
 0x467   : > { %v2482_v15 = vmax.f32 %v2462_v34, 0.0 }
 0x468   : > { %v2372_v61 = vpop.f32.mrf.mxu2 }
 0x469   : > { %v2501_v8 = vpack.c.bf16 %v2482_v15, %v2481_v9  ;;  %v2246_v25 = vpop.f32.mrf.mxu0  ;;  %v2419_v11 = vadd.f32 %v2372_v61, %v2305_v21  ;;  %v2316_v55 = vpop.f32.mrf.mxu1 }
 0x46b   : > { %3037 = vmatmul.msk.bf16.vlgmr.msrb.gmra.mxu3 %vm693_vm0, %v2501_v8  ;;  %v2439_v2 = vmax.f32 %v4123_v28, %v2419_v11  ;;  %v2312_v28 = vadd.f32 %v2311_v54, %v2246_v25 }
 0x46d   : > { %v2463_v40 = vadd.f32 %v4215_v59, %v2439_v2 }
 0x46f   : > { %v2483_v32 = vmax.f32 %v2463_v40, 0.0 }
 0x470   : > { %v2374_v14 = vpop.f32.mrf.mxu2 }
 0x471   : > { %v2420_v56 = vadd.f32 %v2374_v14, %v2307_v58  ;;  %v2249_v30 = vpop.f32.mrf.mxu0  ;;  %v2319_v31 = vpop.f32.mrf.mxu1 }
 0x472   : > { %v2315_v6 = vadd.f32 %v2314_v36, %v2249_v30 }
 0x473   : > { %v2440_v13 = vmax.f32 %v4125_v51, %v2420_v56 }
 0x475   : > { %v2464_v19 = vadd.f32 %v4215_v59, %v2440_v13 }
 0x477   : > { %v2484_v12 = vmax.f32 %v2464_v19, 0.0 }
 0x478   : > { %v2377_v43 = vpop.f32.mrf.mxu2 }
 0x479   : > { %v2502_v37 = vpack.c.bf16 %v2484_v12, %v2483_v32  ;;  %v2251_v44 = vpop.f32.mrf.mxu0  ;;  %v2421_v42 = vadd.f32 %v2377_v43, %v2310_v50  ;;  %v2321_v1 = vpop.f32.mrf.mxu1 }
 0x47b   : > { %3038 = vmatmul.msk.bf16.gmra.mxu3 %vm693_vm0, %v2502_v37  ;;  %v2441_v18 = vmax.f32 %v4133_v41, %v2421_v42  ;;  %v2317_v41 = vadd.f32 %v2316_v55, %v2251_v44 }
 0x47d   : > { %v2465_v51 = vadd.f32 %v4215_v59, %v2441_v18 }
 0x47f   : > { %v2485_v24 = vmax.f32 %v2465_v51, 0.0 }
 0x480   : > { %v2379_v38 = vpop.f32.mrf.mxu2 }
 0x481   : > { %v2422_v45 = vadd.f32 %v2379_v38, %v2312_v28  ;;  %v2254_v16 = vpop.f32.mrf.mxu0  ;;  %v2324_v34 = vpop.f32.mrf.mxu1 }
 0x482   : > { %v2320_v8 = vadd.f32 %v2319_v31, %v2254_v16 }
 0x483   : > { %v2442_v63 = vmax.f32 %v4135_v49, %v2422_v45 }
 0x485   : > { %v2466_v26 = vadd.f32 %v4215_v59, %v2442_v63 }
 0x487   : > { %v2486_v4 = vmax.f32 %v2466_v26, 0.0 }
 0x488   : > { %v2382_v47 = vpop.f32.mrf.mxu2 }
 0x489   : > { %v2503_v7 = vpack.c.bf16 %v2486_v4, %v2485_v24  ;;  %v2256_v22 = vpop.f32.mrf.mxu0  ;;  %v2423_v29 = vadd.f32 %v2382_v47, %v2315_v6 }
 0x48a   : > { %v2322_v58 = vadd.f32 %v2321_v1, %v2256_v22 }
 0x48b   : > { %3039 = vmatmul.msk.bf16.gmra.mxu3 %vm693_vm0, %v2503_v7  ;;  %v2443_v46 = vmax.f32 %v4143_v53, %v2423_v29  ;;  %v2326_v53 = vpop.f32.mrf.mxu1 }
 0x48d   : > { %v2467_v49 = vadd.f32 %v4215_v59, %v2443_v46 }
 0x48f   : > { %v2487_v15 = vmax.f32 %v2467_v49, 0.0 }
 0x490   : > { %v2384_v3 = vpop.f32.mrf.mxu2 }
 0x491   : > { %v2424_v54 = vadd.f32 %v2384_v3, %v2317_v41  ;;  %v2259_v57 = vpop.f32.mrf.mxu0 }
 0x492   : > { %v2325_v43 = vadd.f32 %v2324_v34, %v2259_v57 }
 0x493   : > { %v2444_v5 = vmax.f32 %v4145_v62, %v2424_v54  ;;  %v2329_v32 = vpop.f32.mrf.mxu1 }
 0x495   : > { %v2468_v9 = vadd.f32 %v4215_v59, %v2444_v5 }
 0x497   : > { %v2488_v61 = vmax.f32 %v2468_v9, 0.0 }
 0x498   : > { %v2387_v21 = vpop.f32.mrf.mxu2 }
 0x499   : > { %v2504_v25 = vpack.c.bf16 %v2488_v61, %v2487_v15  ;;  %v2425_v11 = vadd.f32 %v2387_v21, %v2320_v8  ;;  %v2261_v36 = vpop.f32.mrf.mxu0 }
 0x49a   : > { %v2327_v44 = vadd.f32 %v2326_v53, %v2261_v36 }
 0x49b   : > { %3040 = vmatmul.msk.bf16.gmra.mxu3 %vm693_vm0, %v2504_v25  ;;  %v2445_v2 = vmax.f32 %v4153_v33, %v2425_v11  ;;  %v2331_v31 = vpop.f32.mrf.mxu1 }
 0x49d   : > { %v2469_v62 = vadd.f32 %v4215_v59, %v2445_v2 }
 0x49f   : > { %v2489_v19 = vmax.f32 %v2469_v62, 0.0 }
 0x4a0   : > { %v2389_v14 = vpop.f32.mrf.mxu2 }
 0x4a1   : > { %v2426_v56 = vadd.f32 %v2389_v14, %v2322_v58  ;;  %v2264_v13 = vpop.f32.mrf.mxu0 }
 0x4a2   : > { %v2330_v26 = vadd.f32 %v2329_v32, %v2264_v13 }
 0x4a3   : > { %v2446_v30 = vmax.f32 %v4155_v0, %v2426_v56 }
 0x4a5   : > { %v2470_v40 = vadd.f32 %v4215_v59, %v2446_v30 }
 0x4a7   : > { %v2490_v55 = vmax.f32 %v2470_v40, 0.0 }
 0x4a8   : > { %v2392_v12 = vpop.f32.mrf.mxu2 }
 0x4a9   : > { %v2505_v50 = vpack.c.bf16 %v2490_v55, %v2489_v19  ;;  %v2427_v37 = vadd.f32 %v2392_v12, %v2325_v43  ;;  %v2266_v42 = vpop.f32.mrf.mxu0 }
 0x4aa   : > { %v2332_v6 = vadd.f32 %v2331_v31, %v2266_v42 }
 0x4ab   : > { %3041 = vmatmul.msk.bf16.gmra.mxu3 %vm693_vm0, %v2505_v50  ;;  %v2447_v33 = vmax.f32 %v4163_v52, %v2427_v37  ;;  %v2334_v52 = vpop.f32.mrf.mxu1 }
 0x4ad   : > { %v2471_v0 = vadd.f32 %v4215_v59, %v2447_v33 }
 0x4af   : > { %v2491_v16 = vmax.f32 %v2471_v0, 0.0 }
 0x4b0   : > { %v2394_v28 = vpop.f32.mrf.mxu2 }
 0x4b1   : > { %v2428_v18 = vadd.f32 %v2394_v28, %v2327_v44  ;;  %v2269_v4 = vpop.f32.mrf.mxu0 }
 0x4b2   : > { %v2335_v5 = vadd.f32 %v2334_v52, %v2269_v4 }
 0x4b3   : > { %v2448_v38 = vmax.f32 %v4165_v10, %v2428_v18  ;;  %v2336_v3 = vpop.f32.mrf.mxu1 }
 0x4b5   : > { %v2472_v45 = vadd.f32 %v4215_v59, %v2448_v38 }
 0x4b7   : > { %v2492_v51 = vmax.f32 %v2472_v45, 0.0 }
 0x4b8   : > { %v2397_v63 = vpop.f32.mrf.mxu2 }
 0x4b9   : > { %v2506_v24 = vpack.c.bf16 %v2492_v51, %v2491_v16  ;;  %v2429_v47 = vadd.f32 %v2397_v63, %v2330_v26  ;;  %v2271_v41 = vpop.f32.mrf.mxu0 }
 0x4bb   : > { %3042 = vmatmul.msk.bf16.gmra.mxu3 %vm693_vm0, %v2506_v24  ;;  %v2449_v7 = vmax.f32 %v4173_v23, %v2429_v47  ;;  %v2337_v23 = vadd.f32 %v2336_v3, %v2271_v41  ;;  %v2339_v21 = vpop.f32.mrf.mxu1 }
 0x4bd   : > { %v2473_v29 = vadd.f32 %v4215_v59, %v2449_v7 }
 0x4bf   : > { %v2493_v54 = vmax.f32 %v2473_v29, 0.0 }
 0x4c0   : > { %v2399_v22 = vpop.f32.mrf.mxu2 }
 0x4c1   : > { %v2430_v1 = vadd.f32 %v2399_v22, %v2332_v6  ;;  %v2274_v15 = vpop.f32.mrf.mxu0 }
 0x4c2   : > { %v2340_v56 = vadd.f32 %v2339_v21, %v2274_v15 }
 0x4c3   : > { %v2450_v10 = vmax.f32 %v4175_v39, %v2430_v1  ;;  %v2341_v30 = vpop.f32.mrf.mxu1 }
 0x4c5   : > { %v2474_v46 = vadd.f32 %v4215_v59, %v2450_v10 }
 0x4c7   : > { %v2494_v57 = vmax.f32 %v2474_v46, 0.0 }
 0x4c8   : > { %v2402_v49 = vpop.f32.mrf.mxu2 }
 0x4c9   : > { %v2507_v34 = vpack.c.bf16 %v2494_v57, %v2493_v54  ;;  %v2431_v9 = vadd.f32 %v2402_v49, %v2335_v5  ;;  %v2276_v2 = vpop.f32.mrf.mxu0 }
 0x4cb   : > { %3043 = vmatmul.msk.bf16.gmra.mxu3 %vm693_vm0, %v2507_v34  ;;  %v2451_v61 = vmax.f32 %v4183_v27, %v2431_v9  ;;  %v2342_v27 = vadd.f32 %v2341_v30, %v2276_v2  ;;  %v2344_v43 = vpop.f32.mrf.mxu1 }
 0x4cd   : > { %v2475_v39 = vadd.f32 %v4215_v59, %v2451_v61 }
 0x4cf   : > { %v2495_v53 = vmax.f32 %v2475_v39, 0.0 }
 0x4d0   : > { %v2404_v8 = vpop.f32.mrf.mxu2 }
 0x4d1   : > { %v2432_v25 = vadd.f32 %v2404_v8, %v2337_v23  ;;  %v2279_v32 = vpop.f32.mrf.mxu0 }
 0x4d2   : > { %v2345_v42 = vadd.f32 %v2344_v43, %v2279_v32 }
 0x4d3   : > { %v2452_v11 = vmax.f32 %v4185_v48, %v2432_v25  ;;  %v2346_v0 = vpop.f32.mrf.mxu1 }
 0x4d5   : > { %v2476_v36 = vadd.f32 %v4215_v59, %v2452_v11 }
 0x4d7   : > { %v2496_v58 = vmax.f32 %v2476_v36, 0.0 }
 0x4d8   : > { %v2407_v14 = vpop.f32.mrf.mxu2 }
 0x4d9   : > { %v2508_v62 = vpack.c.bf16 %v2496_v58, %v2495_v53  ;;  %v2433_v40 = vadd.f32 %v2407_v14, %v2340_v56  ;;  %v2281_v31 = vpop.f32.mrf.mxu0 }
 0x4da   : > { %v2347_v38 = vadd.f32 %v2346_v0, %v2281_v31 }
 0x4db   : > { %3044 = vmatmul.msk.bf16.gmra.mxu3 %vm693_vm0, %v2508_v62  ;;  %v2453_v13 = vmax.f32 %v4193_v20, %v2433_v40  ;;  %v4267_v20 = vld [vmem:[%s4365_s10] ss:$0 sm:$0xff] }
 0x4dd   : > { %v2477_v48 = vadd.f32 %v4215_v59, %v2453_v13 }
 0x4df   : > { %v2497_v37 = vmax.f32 %v2477_v48, 0.0 }
 0x4e0   : > { %v2409_v19 = vpop.f32.mrf.mxu2 }
 0x4e1   : > { %v2434_v55 = vadd.f32 %v2409_v19, %v2342_v27 }
 0x4e3   : > { %v2454_v12 = vmax.f32 %v4195_v60, %v2434_v55 }
 0x4e5   : > { %v2478_v50 = vadd.f32 %v4215_v59, %v2454_v12 }
 0x4e7   : > { %v2498_v44 = vmax.f32 %v2478_v50, 0.0 }
 0x4e8   : > { %v2412_v33 = vpop.f32.mrf.mxu2 }
 0x4e9   : > { %v2509_v28 = vpack.c.bf16 %v2498_v44, %v2497_v37  ;;  %v2435_v18 = vadd.f32 %v2412_v33, %v2345_v42 }
 0x4eb   : > { %3045 = vmatmul.msk.bf16.gmra.mxu3 %vm693_vm0, %v2509_v28  ;;  %v2455_v45 = vmax.f32 %v4203_v17, %v2435_v18 }
 0x4ed   : > { %v2479_v26 = vadd.f32 %v4215_v59, %v2455_v45 }
 0x4ee   : > { %v2562_v60 = vpop.f32.mrf.mxu3 }
 0x4ef   : > { %v2563_v16 = vadd.f32 %v4267_v20, %v2562_v60  ;;  %v2499_v17 = vmax.f32 %v2479_v26, 0.0 }
 0x4f0   : > { %v2414_v51 = vpop.f32.mrf.mxu2 }
 0x4f1   : > { %2612 = vst [vmem:[%s4271_s15] sm:$0xff] %v2563_v16  ;;  %v2436_v63 = vadd.f32 %v2414_v51, %v2347_v38 }
 0x4f3   : > { %v2456_v24 = vmax.f32 %v4205_v35, %v2436_v63 }
 0x4f5   : > { %v2480_v4 = vadd.f32 %v4215_v59, %v2456_v24 }
 0x4f6   : > { %v2564_v47 = vpop.f32.mrf.mxu3 }
 0x4f7   : > { %v2500_v52 = vmax.f32 %v2480_v4, 0.0  ;;  %v2565_v6 = vadd.f32 %v4267_v20, %v2564_v47 }
 0x4f9   : > { %v2510_v7 = vpack.c.bf16 %v2500_v52, %v2499_v17  ;;  %2613 = vst [vmem:[%s4271_s15 + $0x8] sm:$0xff] %v2565_v6 }
 0x4fb   : > { %3046 = vmatmul.msk.bf16.gmra.mxu3 %vm693_vm0, %v2510_v7 }
 0x4fe   : > { %v2567_v22 = vpop.f32.mrf.mxu3 }
 0x4ff   : > { %v2568_v1 = vadd.f32 %v4267_v20, %v2567_v22 }
 0x501   : > { %2614 = vst [vmem:[%s4271_s15 + $0x10] sm:$0xff] %v2568_v1 }
 0x506   : > { %v2569_v35 = vpop.f32.mrf.mxu3 }
 0x507   : > { %v2570_v59 = vadd.f32 %v4267_v20, %v2569_v35 }
 0x509   : > { %2615 = vst [vmem:[%s4271_s15 + $0x18] sm:$0xff] %v2570_v59 }
 0x50e   : > { %v2572_v29 = vpop.f32.mrf.mxu3 }
 0x50f   : > { %v2573_v10 = vadd.f32 %v4267_v20, %v2572_v29 }
 0x511   : > { %2616 = vst [vmem:[%s4271_s15 + $0x20] sm:$0xff] %v2573_v10 }
 0x516   : > { %v2574_v41 = vpop.f32.mrf.mxu3 }
 0x517   : > { %v2575_v46 = vadd.f32 %v4267_v20, %v2574_v41 }
 0x519   : > { %2617 = vst [vmem:[%s4271_s15 + $0x28] sm:$0xff] %v2575_v46 }
 0x51e   : > { %v2577_v3 = vpop.f32.mrf.mxu3 }
 0x51f   : > { %v2578_v54 = vadd.f32 %v4267_v20, %v2577_v3 }
 0x521   : > { %2618 = vst [vmem:[%s4271_s15 + $0x30] sm:$0xff] %v2578_v54 }
 0x526   : > { %v2579_v57 = vpop.f32.mrf.mxu3 }
 0x527   : > { %v2580_v49 = vadd.f32 %v4267_v20, %v2579_v57 }
 0x529   : > { %2619 = vst [vmem:[%s4271_s15 + $0x38] sm:$0xff] %v2580_v49 }
 0x52e   : > { %v2582_v5 = vpop.f32.mrf.mxu3 }
 0x52f   : > { %v2583_v34 = vadd.f32 %v4267_v20, %v2582_v5 }
 0x531   : > { %2620 = vst [vmem:[%s4271_s15 + $0x40] sm:$0xff] %v2583_v34 }
 0x536   : > { %v2584_v9 = vpop.f32.mrf.mxu3 }
 0x537   : > { %v2585_v15 = vadd.f32 %v4267_v20, %v2584_v9 }
 0x539   : > { %2621 = vst [vmem:[%s4271_s15 + $0x48] sm:$0xff] %v2585_v15 }
 0x53e   : > { %v2587_v23 = vpop.f32.mrf.mxu3 }
 0x53f   : > { %v2588_v61 = vadd.f32 %v4267_v20, %v2587_v23 }
 0x541   : > { %2622 = vst [vmem:[%s4271_s15 + $0x50] sm:$0xff] %v2588_v61 }
 0x546   : > { %v2589_v21 = vpop.f32.mrf.mxu3 }
 0x547   : > { %v2590_v8 = vadd.f32 %v4267_v20, %v2589_v21 }
 0x549   : > { %2623 = vst [vmem:[%s4271_s15 + $0x58] sm:$0xff] %v2590_v8 }
 0x54e   : > { %v2592_v25 = vpop.f32.mrf.mxu3 }
 0x54f   : > { %v2593_v39 = vadd.f32 %v4267_v20, %v2592_v25 }
 0x551   : > { %2624 = vst [vmem:[%s4271_s15 + $0x60] sm:$0xff] %v2593_v39 }
 0x556   : > { %v2594_v11 = vpop.f32.mrf.mxu3 }
 0x557   : > { %v2595_v36 = vadd.f32 %v4267_v20, %v2594_v11 }
 0x559   : > { %2625 = vst [vmem:[%s4271_s15 + $0x68] sm:$0xff] %v2595_v36 }
 0x55e   : > { %v2597_v53 = vpop.f32.mrf.mxu3 }
 0x55f   : > { %v2598_v58 = vadd.f32 %v4267_v20, %v2597_v53 }
 0x561   : > { %2626 = vst [vmem:[%s4271_s15 + $0x70] sm:$0xff] %v2598_v58 }
 0x566   : > { %v2599_v2 = vpop.f32.mrf.mxu3 }
 0x567   : > { %v2600_v14 = vadd.f32 %v4267_v20, %v2599_v2 }
 0x569   : > { %2627 = vst [vmem:[%s4271_s15 + $0x78] sm:$0xff] %v2600_v14 }
 0x56e   : > { %v2602_v56 = vpop.f32.mrf.mxu3 }
 0x56f   : > { %v2603_v62 = vadd.f32 %v4267_v20, %v2602_v56 }
 0x571   : > { %2628 = vst [vmem:[%s4271_s15 + $0x80] sm:$0xff] %v2603_v62 }
 0x576   : > { %v2604_v30 = vpop.f32.mrf.mxu3 }
 0x577   : > { %v2605_v40 = vadd.f32 %v4267_v20, %v2604_v30 }
 0x579   : > { %2629 = vst [vmem:[%s4271_s15 + $0x88] sm:$0xff] %v2605_v40 }
 0x57e   : > { %v2607_v27 = vpop.f32.mrf.mxu3 }
 0x57f   : > { %v2608_v13 = vadd.f32 %v4267_v20, %v2607_v27 }
 0x581   : > { %2630 = vst [vmem:[%s4271_s15 + $0x90] sm:$0xff] %v2608_v13 }
 0x586   : > { %v2609_v19 = vpop.f32.mrf.mxu3 }
 0x587   : > { %v2610_v55 = vadd.f32 %v4267_v20, %v2609_v19 }
 0x589   : > { %2631 = vst [vmem:[%s4271_s15 + $0x98] sm:$0xff] %v2610_v55 }
 0x58a   : > { %s3074_s30 = sshll.u32 %s2738_s21, 4  ;;  %s2655_s12 = sshll.u32 %s4271_s15, 4  ;;  %s2656_s12 = int_to_ptr.vmem [resolvable:$true] %s2655_s12 }
 0x58b   : > { %s2644_s22 = scalar_lea.hbm %s4366_s11, %s3074_s30  ;;  %s3168_s13 = smov 256  }
 0x58c   : > { %s2657_s24 = sshll.u32 %s2644_s22, 4  ;;  %3076 = sst [smem:[#allocation6]] (%p3273_p6), %s3168_s13  ;;  %s2658_s24 = int_to_ptr.hbm [resolvable:$true] %s2657_s24 }
 0x58d   : > { %s3169_s25 = smov 512   ;;  %s3170_s0 = smov 2  }
 0x58e   : > { %3077 = sst [smem:[#allocation6 + $0x1]] (%p3273_p6), %s3169_s25  ;;  %s3171_s21 = smov 128  }
 0x58f   : > { %3078 = sst [smem:[#allocation6 + $0x2]] (%p3273_p6), %s3170_s0  ;;  %s3172_s15 = smov 8  }
 0x590   : > { %3079 = sst [smem:[#allocation6 + $0x3]] (%p3273_p6), %s3171_s21  ;;  %s3173_s30 = smov [#allocation5]  }
 0x591   : > { %3080 = sst [smem:[#allocation6 + $0x4]] (%p3273_p6), %s3171_s21  ;;  %s3174_s14 = smov 0  }
 0x592   : > { %3081 = sst [smem:[#allocation6 + $0x5]] (%p3273_p6), %s3172_s15 }
 0x593   : > { %3082 = dma.general (%p3273_p6), %s2656_s12, 2560, %s2658_s24, %s2633_s29, %s3173_s30, [#allocation6], %s3174_s14, 0  }
 0x594 PF: > { %s2685_s16 = sand.u32 1, %s3154_s17   ;;  %p3085_p13 = pnand %p2741_p9, %p3277_p8 }
 0x595   : > { %s2686_s0 = scalar_lea.sflag [#allocation4], %s2685_s16 }
 0x596   : > { %p3086_p0 = pneg %p3085_p13 }
 0x598   : > { %3149 = dma.done.wait (%p3086_p0), %s2686_s0, 2560  }
 0x599   : > { %3151 = vsyncadd (%p3086_p0), %s2686_s0, 4294964736  ;;  %p21_p1 = scmp.ge.s32.totalorder %s3258_s23, 4   ;;  %s4415_s17 = smov %s3158_s18 }
 0x59a   : > { %s4416_s18 = smov %s3162_s19  ;;  %s4417_s19 = smov %s3271_s26 }
 0x59b   : > { %s4418_s20 = smov %s3258_s23  ;;  %23 = sbr.rel (!%p21_p1) target bundleno = 5 (0x5), region = 157 }
 0x5a0   :  { %2692 = vsyncpa [#allocation4], 1 }
 0x5a1   :  { %2694 = vsyncpa [#allocation4 + $0x1], 1 }

</bundles_post_ra>
